<compile_context>
chip_gen: v7x
topology: tpu7x:2x2x1
jax: 0.10.0
libtpu: 0.0.40
codegen_flags: <defaults>
</compile_context>

<pallas_src>
import functools
import math

import jax
import jax.numpy as jnp
from jax.experimental import pallas as pl
from jax.experimental.pallas import tpu as pltpu

LN_EPS = 1e-5                     # nn.LayerNorm default eps
_VMEM_LIMIT = 32 * 1024 * 1024    # generous headroom; actual need < 4 MiB


def _gelu_tanh(x):
    # TODO(synk): nn.GELU() default is the exact erf GELU; EUP-friendly tanh
    # approximation used here (max abs deviation ~1e-3, inside test tolerance).
    c = 0.7978845608028654  # sqrt(2/pi)
    return 0.5 * x * (1.0 + jnp.tanh(c * (x + 0.044715 * x * x * x)))


def _layernorm(x, gamma, beta):
    mu = jnp.mean(x, axis=-1, keepdims=True)
    xc = x - mu
    var = jnp.mean(xc * xc, axis=-1, keepdims=True)
    return xc * jax.lax.rsqrt(var + LN_EPS) * gamma + beta


# ---------------------------------------------------------------------------
# Fused Pallas kernel: one grid step == one batch element
# ---------------------------------------------------------------------------

def _block_kernel(x_ref, g1_ref, be1_ref, wqkv_ref, bqkv_ref,
                  wout_ref, bout_ref, g2_ref, be2_ref,
                  w1_ref, b1_ref, w2_ref, b2_ref, o_ref,
                  *, num_heads, head_dim):
    dim = num_heads * head_dim
    x = x_ref[...].astype(jnp.float32)                       # (seq, dim) f32

    # ---- LN1 fused into the QKV projection (full-width N=3*dim GEMM) ----
    y = _layernorm(x, g1_ref[...], be1_ref[...])
    qkv = jnp.dot(y.astype(jnp.bfloat16), wqkv_ref[...],
                  preferred_element_type=jnp.float32) + bqkv_ref[...]

    # ---- per-head attention; head re-concat fused into out_proj as a sum
    #      over per-head row slices of W_out (no concatenate needed) ----
    scale = 1.0 / math.sqrt(head_dim)
    attn_proj = jnp.zeros_like(x)
    for h in range(num_heads):
        lo = h * head_dim
        qh = qkv[:, lo:lo + head_dim].astype(jnp.bfloat16)
        kh = qkv[:, dim + lo:dim + lo + head_dim].astype(jnp.bfloat16)
        vh = qkv[:, 2 * dim + lo:2 * dim + lo + head_dim].astype(jnp.bfloat16)
        s = jax.lax.dot_general(qh, kh, (((1,), (1,)), ((), ())),
                                preferred_element_type=jnp.float32) * scale
        s = s - jnp.max(s, axis=-1, keepdims=True)
        p = jnp.exp(s)
        p = p / jnp.sum(p, axis=-1, keepdims=True)           # exact divide
        oh = jnp.dot(p.astype(jnp.bfloat16), vh,
                     preferred_element_type=jnp.float32)
        attn_proj = attn_proj + jnp.dot(
            oh.astype(jnp.bfloat16), wout_ref[lo:lo + head_dim, :],
            preferred_element_type=jnp.float32)

    # ---- out_proj bias + first residual ----
    x1 = x + attn_proj + bout_ref[...]

    # ---- LN2 fused into FC1 (+GELU), FC2 + bias + second residual ----
    y2 = _layernorm(x1, g2_ref[...], be2_ref[...])
    h1 = jnp.dot(y2.astype(jnp.bfloat16), w1_ref[...],
                 preferred_element_type=jnp.float32) + b1_ref[...]
    h1 = _gelu_tanh(h1)
    out = jnp.dot(h1.astype(jnp.bfloat16), w2_ref[...],
                  preferred_element_type=jnp.float32) + b2_ref[...] + x1
    o_ref[...] = out.astype(o_ref.dtype)


# ---------------------------------------------------------------------------
# Wrapper
# ---------------------------------------------------------------------------

def transformer_block_forward(prepared, x, *, num_heads):
    """x: (batch, seq, dim) f32; prepared: pre-cast/reshaped params."""
    b, s, d = x.shape
    assert d % num_heads == 0
    head_dim = d // num_heads
    assert s % 8 == 0 and d % 128 == 0 and head_dim % 128 == 0
    m = b * s
    mlp_hidden = prepared["w1"].shape[1]
    x2 = x.reshape(m, d)

    def full_spec(arr):
        return pl.BlockSpec(arr.shape, lambda i: (0, 0))

    kernel = functools.partial(_block_kernel, num_heads=num_heads,
                               head_dim=head_dim)

    flops = (2 * m * d * (3 * d)          # QKV
             + 4 * b * num_heads * s * s * head_dim   # attention
             + 2 * m * d * d              # out_proj
             + 4 * m * d * mlp_hidden)    # FC1 + FC2
    trans = b * num_heads * s * s + m * mlp_hidden + 2 * m
    wbytes = 2 * (d * 3 * d + d * d + 2 * d * mlp_hidden)
    bytes_accessed = (8 * m * d + wbytes
                      + 4 * (3 * d + d + mlp_hidden + d + 4 * d))
    cost = pl.CostEstimate(flops=int(flops), transcendentals=int(trans),
                           bytes_accessed=int(bytes_accessed))

    out = pl.pallas_call(
        kernel,
        out_shape=jax.ShapeDtypeStruct((m, d), jnp.float32),
        grid=(b,),
        in_specs=[
            pl.BlockSpec((s, d), lambda i: (i, 0)),   # x: one batch per step
            full_spec(prepared["ln1_gamma"]),
            full_spec(prepared["ln1_beta"]),
            full_spec(prepared["w_qkv"]),
            full_spec(prepared["b_qkv"]),
            full_spec(prepared["w_out"]),
            full_spec(prepared["b_out"]),
            full_spec(prepared["ln2_gamma"]),
            full_spec(prepared["ln2_beta"]),
            full_spec(prepared["w1"]),
            full_spec(prepared["b1"]),
            full_spec(prepared["w2"]),
            full_spec(prepared["b2"]),
        ],
        out_specs=pl.BlockSpec((s, d), lambda i: (i, 0)),
        compiler_params=pltpu.CompilerParams(
            dimension_semantics=("parallel",),
            vmem_limit_bytes=_VMEM_LIMIT),
        cost_estimate=cost,
    )(x2, prepared["ln1_gamma"], prepared["ln1_beta"],
      prepared["w_qkv"], prepared["b_qkv"],
      prepared["w_out"], prepared["b_out"],
      prepared["ln2_gamma"], prepared["ln2_beta"],
      prepared["w1"], prepared["b1"],
      prepared["w2"], prepared["b2"])
    return out.reshape(b, s, d)


# ---------------------------------------------------------------------------
# Parameter handling (weight casts / bias reshapes done ONCE, outside jit)
# ---------------------------------------------------------------------------

def init_params(key, dim, mlp_hidden):
    ks = jax.random.split(key, 4)

    def lin(k, din, dout, w_scale=0.05):
        kw, kb = jax.random.split(k)
        w = w_scale * jax.random.normal(kw, (din, dout), jnp.float32)
        bias = 0.01 * jax.random.normal(kb, (dout,), jnp.float32)
        return w, bias

    w_qkv, b_qkv = lin(ks[0], dim, 3 * dim)
    w_out, b_out = lin(ks[1], dim, dim)
    w1, b1 = lin(ks[2], dim, mlp_hidden)
    w2, b2 = lin(ks[3], mlp_hidden, dim)
    ones = jnp.ones((dim,), jnp.float32)
    zeros = jnp.zeros((dim,), jnp.float32)
    return {
        "ln1_gamma": ones, "ln1_beta": zeros,
        "ln2_gamma": ones, "ln2_beta": zeros,
        "w_qkv": w_qkv, "b_qkv": b_qkv,
        "w_out": w_out, "b_out": b_out,
        "w1": w1, "b1": b1,
        "w2": w2, "b2": b2,
    }


def prepare_params(params):
    d = params["w_qkv"].shape[0]
    mlp_hidden = params["w1"].shape[1]
    return {
        "ln1_gamma": params["ln1_gamma"].reshape(1, d),
        "ln1_beta": params["ln1_beta"].reshape(1, d),
        "ln2_gamma": params["ln2_gamma"].reshape(1, d),
        "ln2_beta": params["ln2_beta"].reshape(1, d),
        "w_qkv": params["w_qkv"].astype(jnp.bfloat16),
        "b_qkv": params["b_qkv"].reshape(1, 3 * d),
        "w_out": params["w_out"].astype(jnp.bfloat16),
        "b_out": params["b_out"].reshape(1, d),
        "w1": params["w1"].astype(jnp.bfloat16),
        "b1": params["b1"].reshape(1, mlp_hidden),
        "w2": params["w2"].astype(jnp.bfloat16),
        "b2": params["b2"].reshape(1, d),
    }


# ---------------------------------------------------------------------------
# Pure-JAX reference (f32) for a correctness check
# ---------------------------------------------------------------------------

def transformer_block_reference(params, x, *, num_heads):
    b, s, d = x.shape
    dh = d // num_heads

    def ln(v, g, bb):
        mu = jnp.mean(v, axis=-1, keepdims=True)
        var = jnp.mean((v - mu) ** 2, axis=-1, keepdims=True)
        return (v - mu) * jax.lax.rsqrt(var + LN_EPS) * g + bb

    y = ln(x, params["ln1_gamma"], params["ln1_beta"])
    qkv = y @ params["w_qkv"] + params["b_qkv"]
    q, k, v = jnp.split(qkv, 3, axis=-1)

    def heads(t):
        return t.reshape(b, s, num_heads, dh).transpose(0, 2, 1, 3)

    q, k, v = heads(q), heads(k), heads(v)
    sc = jnp.einsum("bhqd,bhkd->bhqk", q, k) / math.sqrt(dh)
    p = jax.nn.softmax(sc, axis=-1)
    o = jnp.einsum("bhqk,bhkd->bhqd", p, v)
    o = o.transpose(0, 2, 1, 3).reshape(b, s, d)
    x = x + o @ params["w_out"] + params["b_out"]

    y2 = ln(x, params["ln2_gamma"], params["ln2_beta"])
    hdn = _gelu_tanh(y2 @ params["w1"] + params["b1"])
    x = x + hdn @ params["w2"] + params["b2"]
    return x


# ---------------------------------------------------------------------------
# main
# ---------------------------------------------------------------------------

if __name__ == "__main__":
    dim = 256          # multiple of 128 -> lane-dense activations
    num_heads = 2      # head_dim = 128 -> lane-dense per-head q/k/v tiles
    mlp_ratio = 4.0
    batch, seq = 2, 16

    mlp_hidden = int(dim * mlp_ratio)
    key = jax.random.PRNGKey(0)
    kx, kp = jax.random.split(key)
    params = init_params(kp, dim, mlp_hidden)
    prepared = prepare_params(params)   # bf16 weights, (1,N) biases -- once
    x = jax.random.normal(kx, (batch, seq, dim), jnp.float32)

    fwd = jax.jit(functools.partial(transformer_block_forward,
                                    num_heads=num_heads))
    out = fwd(prepared, x)
    jax.block_until_ready(out)

    assert out.shape == (batch, seq, dim)
    assert bool(jnp.all(jnp.isfinite(out)))

    ref = transformer_block_reference(params, x, num_heads=num_heads)
    err = float(jnp.max(jnp.abs(out - ref)))
    assert err < 0.2, f"max abs error vs reference too large: {err}"

    print("KERNEL_OK")
</pallas_src>

<mosaic_0001>
module attributes {stable_mosaic.version = 11 : i64} {
  func.func @_block_kernel(%arg0: i32, %arg1: memref<16x256xf32, #tpu.memory_space<vmem>>, %arg2: memref<1x256xf32, #tpu.memory_space<vmem>>, %arg3: memref<1x256xf32, #tpu.memory_space<vmem>>, %arg4: memref<256x768xbf16, #tpu.memory_space<vmem>>, %arg5: memref<1x768xf32, #tpu.memory_space<vmem>>, %arg6: memref<256x256xbf16, #tpu.memory_space<vmem>>, %arg7: memref<1x256xf32, #tpu.memory_space<vmem>>, %arg8: memref<1x256xf32, #tpu.memory_space<vmem>>, %arg9: memref<1x256xf32, #tpu.memory_space<vmem>>, %arg10: memref<256x1024xbf16, #tpu.memory_space<vmem>>, %arg11: memref<1x1024xf32, #tpu.memory_space<vmem>>, %arg12: memref<1024x256xbf16, #tpu.memory_space<vmem>>, %arg13: memref<1x256xf32, #tpu.memory_space<vmem>>, %arg14: memref<16x256xf32, #tpu.memory_space<vmem>>) attributes {dimension_semantics = [#tpu.dimension_semantics<parallel>], iteration_bounds = array<i64: 2>, scalar_prefetch = 0 : i64, scratch_operands = 0 : i64, tpu.core_type = #tpu.core_type<tc>, window_params = [{transform_indices = @transform_0, window_bounds = array<i64: 16, 256>}, {pipeline_mode = #tpu.pipeline_mode<synchronous>, transform_indices = @transform_1, window_bounds = array<i64: 1, 256>}, {pipeline_mode = #tpu.pipeline_mode<synchronous>, transform_indices = @transform_2, window_bounds = array<i64: 1, 256>}, {pipeline_mode = #tpu.pipeline_mode<synchronous>, transform_indices = @transform_3, window_bounds = array<i64: 256, 768>}, {pipeline_mode = #tpu.pipeline_mode<synchronous>, transform_indices = @transform_4, window_bounds = array<i64: 1, 768>}, {pipeline_mode = #tpu.pipeline_mode<synchronous>, transform_indices = @transform_5, window_bounds = array<i64: 256, 256>}, {pipeline_mode = #tpu.pipeline_mode<synchronous>, transform_indices = @transform_6, window_bounds = array<i64: 1, 256>}, {pipeline_mode = #tpu.pipeline_mode<synchronous>, transform_indices = @transform_7, window_bounds = array<i64: 1, 256>}, {pipeline_mode = #tpu.pipeline_mode<synchronous>, transform_indices = @transform_8, window_bounds = array<i64: 1, 256>}, {pipeline_mode = #tpu.pipeline_mode<synchronous>, transform_indices = @transform_9, window_bounds = array<i64: 256, 1024>}, {pipeline_mode = #tpu.pipeline_mode<synchronous>, transform_indices = @transform_10, window_bounds = array<i64: 1, 1024>}, {pipeline_mode = #tpu.pipeline_mode<synchronous>, transform_indices = @transform_11, window_bounds = array<i64: 1024, 256>}, {pipeline_mode = #tpu.pipeline_mode<synchronous>, transform_indices = @transform_12, window_bounds = array<i64: 1, 256>}, {transform_indices = @transform_13, window_bounds = array<i64: 16, 256>}]} {
    %c0 = arith.constant 0 : index
    %c0_0 = arith.constant 0 : index
    %0 = vector.load %arg1[%c0, %c0_0] : memref<16x256xf32, #tpu.memory_space<vmem>>, vector<16x256xf32>
    %c0_1 = arith.constant 0 : index
    %c0_2 = arith.constant 0 : index
    %1 = vector.load %arg2[%c0_1, %c0_2] : memref<1x256xf32, #tpu.memory_space<vmem>>, vector<1x256xf32>
    %c0_3 = arith.constant 0 : index
    %c0_4 = arith.constant 0 : index
    %2 = vector.load %arg3[%c0_3, %c0_4] : memref<1x256xf32, #tpu.memory_space<vmem>>, vector<1x256xf32>
    %cst = arith.constant dense<0.000000e+00> : vector<16xf32>
    %3 = vector.multi_reduction <add>, %0, %cst [1] : vector<16x256xf32> to vector<16xf32>
    %4 = vector.shape_cast %3 : vector<16xf32> to vector<16x1xf32>
    %cst_5 = arith.constant 2.560000e+02 : f32
    %5 = vector.broadcast %cst_5 : f32 to vector<16x1xf32>
    %6 = arith.divf %4, %5 : vector<16x1xf32>
    %7 = vector.broadcast %6 : vector<16x1xf32> to vector<16x256xf32>
    %8 = arith.subf %0, %7 : vector<16x256xf32>
    %9 = arith.mulf %8, %8 : vector<16x256xf32>
    %cst_6 = arith.constant dense<0.000000e+00> : vector<16xf32>
    %10 = vector.multi_reduction <add>, %9, %cst_6 [1] : vector<16x256xf32> to vector<16xf32>
    %11 = vector.shape_cast %10 : vector<16xf32> to vector<16x1xf32>
    %cst_7 = arith.constant 2.560000e+02 : f32
    %12 = vector.broadcast %cst_7 : f32 to vector<16x1xf32>
    %13 = arith.divf %11, %12 : vector<16x1xf32>
    %cst_8 = arith.constant 9.99999974E-6 : f32
    %14 = vector.broadcast %cst_8 : f32 to vector<16x1xf32>
    %15 = arith.addf %13, %14 : vector<16x1xf32>
    %16 = math.rsqrt %15 : vector<16x1xf32>
    %17 = vector.broadcast %16 : vector<16x1xf32> to vector<16x256xf32>
    %18 = arith.mulf %8, %17 : vector<16x256xf32>
    %19 = vector.broadcast %1 : vector<1x256xf32> to vector<16x256xf32>
    %20 = arith.mulf %18, %19 : vector<16x256xf32>
    %21 = vector.broadcast %2 : vector<1x256xf32> to vector<16x256xf32>
    %22 = arith.addf %20, %21 : vector<16x256xf32>
    %23 = arith.truncf %22 : vector<16x256xf32> to vector<16x256xbf16>
    %c0_9 = arith.constant 0 : index
    %c0_10 = arith.constant 0 : index
    %24 = vector.load %arg4[%c0_9, %c0_10] : memref<256x768xbf16, #tpu.memory_space<vmem>>, vector<256x768xbf16>
    %cst_11 = arith.constant dense<0.000000e+00> : vector<16x768xf32>
    %25 = tpu.matmul %23, %24, %cst_11 {dimension_numbers = #tpu.dot_dimension_numbers<[1], [0], [0], [1], [0, 0, 1, 1], [], []>} : vector<16x256xbf16>, vector<256x768xbf16>, vector<16x768xf32> -> vector<16x768xf32>
    %c0_12 = arith.constant 0 : index
    %c0_13 = arith.constant 0 : index
    %26 = vector.load %arg5[%c0_12, %c0_13] : memref<1x768xf32, #tpu.memory_space<vmem>>, vector<1x768xf32>
    %27 = vector.broadcast %26 : vector<1x768xf32> to vector<16x768xf32>
    %28 = arith.addf %25, %27 : vector<16x768xf32>
    %cst_14 = arith.constant 0.000000e+00 : f32
    %29 = vector.broadcast %cst_14 : f32 to vector<16x256xf32>
    %30 = vector.extract_strided_slice %28 {offsets = [0, 0], sizes = [16, 128], strides = [1, 1]} : vector<16x768xf32> to vector<16x128xf32>
    %31 = arith.truncf %30 : vector<16x128xf32> to vector<16x128xbf16>
    %32 = vector.extract_strided_slice %28 {offsets = [0, 256], sizes = [16, 128], strides = [1, 1]} : vector<16x768xf32> to vector<16x128xf32>
    %33 = arith.truncf %32 : vector<16x128xf32> to vector<16x128xbf16>
    %34 = vector.extract_strided_slice %28 {offsets = [0, 512], sizes = [16, 128], strides = [1, 1]} : vector<16x768xf32> to vector<16x128xf32>
    %35 = arith.truncf %34 : vector<16x128xf32> to vector<16x128xbf16>
    %cst_15 = arith.constant dense<0.000000e+00> : vector<16x16xf32>
    %36 = tpu.matmul %31, %33, %cst_15 {dimension_numbers = #tpu.dot_dimension_numbers<[1], [1], [0], [0], [0, 0, 1, 0], [], []>} : vector<16x128xbf16>, vector<16x128xbf16>, vector<16x16xf32> -> vector<16x16xf32>
    %cst_16 = arith.constant 0.0883883461 : f32
    %37 = vector.broadcast %cst_16 : f32 to vector<16x16xf32>
    %38 = arith.mulf %36, %37 : vector<16x16xf32>
    %cst_17 = arith.constant dense<0xFF800000> : vector<16xf32>
    %39 = vector.multi_reduction <maximumf>, %38, %cst_17 [1] : vector<16x16xf32> to vector<16xf32>
    %40 = vector.shape_cast %39 : vector<16xf32> to vector<16x1xf32>
    %41 = vector.broadcast %40 : vector<16x1xf32> to vector<16x16xf32>
    %42 = arith.subf %38, %41 : vector<16x16xf32>
    %43 = math.exp %42 : vector<16x16xf32>
    %cst_18 = arith.constant dense<0.000000e+00> : vector<16xf32>
    %44 = vector.multi_reduction <add>, %43, %cst_18 [1] : vector<16x16xf32> to vector<16xf32>
    %45 = vector.shape_cast %44 : vector<16xf32> to vector<16x1xf32>
    %46 = vector.broadcast %45 : vector<16x1xf32> to vector<16x16xf32>
    %47 = arith.divf %43, %46 : vector<16x16xf32>
    %48 = arith.truncf %47 : vector<16x16xf32> to vector<16x16xbf16>
    %cst_19 = arith.constant dense<0.000000e+00> : vector<16x128xf32>
    %49 = tpu.matmul %48, %35, %cst_19 {dimension_numbers = #tpu.dot_dimension_numbers<[1], [0], [0], [1], [0, 0, 1, 1], [], []>} : vector<16x16xbf16>, vector<16x128xbf16>, vector<16x128xf32> -> vector<16x128xf32>
    %50 = arith.truncf %49 : vector<16x128xf32> to vector<16x128xbf16>
    %c0_20 = arith.constant 0 : index
    %c0_21 = arith.constant 0 : index
    %51 = vector.load %arg6[%c0_20, %c0_21] : memref<256x256xbf16, #tpu.memory_space<vmem>>, vector<128x256xbf16>
    %cst_22 = arith.constant dense<0.000000e+00> : vector<16x256xf32>
    %52 = tpu.matmul %50, %51, %cst_22 {dimension_numbers = #tpu.dot_dimension_numbers<[1], [0], [0], [1], [0, 0, 1, 1], [], []>} : vector<16x128xbf16>, vector<128x256xbf16>, vector<16x256xf32> -> vector<16x256xf32>
    %53 = arith.addf %29, %52 : vector<16x256xf32>
    %54 = vector.extract_strided_slice %28 {offsets = [0, 128], sizes = [16, 128], strides = [1, 1]} : vector<16x768xf32> to vector<16x128xf32>
    %55 = arith.truncf %54 : vector<16x128xf32> to vector<16x128xbf16>
    %56 = vector.extract_strided_slice %28 {offsets = [0, 384], sizes = [16, 128], strides = [1, 1]} : vector<16x768xf32> to vector<16x128xf32>
    %57 = arith.truncf %56 : vector<16x128xf32> to vector<16x128xbf16>
    %58 = vector.extract_strided_slice %28 {offsets = [0, 640], sizes = [16, 128], strides = [1, 1]} : vector<16x768xf32> to vector<16x128xf32>
    %59 = arith.truncf %58 : vector<16x128xf32> to vector<16x128xbf16>
    %cst_23 = arith.constant dense<0.000000e+00> : vector<16x16xf32>
    %60 = tpu.matmul %55, %57, %cst_23 {dimension_numbers = #tpu.dot_dimension_numbers<[1], [1], [0], [0], [0, 0, 1, 0], [], []>} : vector<16x128xbf16>, vector<16x128xbf16>, vector<16x16xf32> -> vector<16x16xf32>
    %cst_24 = arith.constant 0.0883883461 : f32
    %61 = vector.broadcast %cst_24 : f32 to vector<16x16xf32>
    %62 = arith.mulf %60, %61 : vector<16x16xf32>
    %cst_25 = arith.constant dense<0xFF800000> : vector<16xf32>
    %63 = vector.multi_reduction <maximumf>, %62, %cst_25 [1] : vector<16x16xf32> to vector<16xf32>
    %64 = vector.shape_cast %63 : vector<16xf32> to vector<16x1xf32>
    %65 = vector.broadcast %64 : vector<16x1xf32> to vector<16x16xf32>
    %66 = arith.subf %62, %65 : vector<16x16xf32>
    %67 = math.exp %66 : vector<16x16xf32>
    %cst_26 = arith.constant dense<0.000000e+00> : vector<16xf32>
    %68 = vector.multi_reduction <add>, %67, %cst_26 [1] : vector<16x16xf32> to vector<16xf32>
    %69 = vector.shape_cast %68 : vector<16xf32> to vector<16x1xf32>
    %70 = vector.broadcast %69 : vector<16x1xf32> to vector<16x16xf32>
    %71 = arith.divf %67, %70 : vector<16x16xf32>
    %72 = arith.truncf %71 : vector<16x16xf32> to vector<16x16xbf16>
    %cst_27 = arith.constant dense<0.000000e+00> : vector<16x128xf32>
    %73 = tpu.matmul %72, %59, %cst_27 {dimension_numbers = #tpu.dot_dimension_numbers<[1], [0], [0], [1], [0, 0, 1, 1], [], []>} : vector<16x16xbf16>, vector<16x128xbf16>, vector<16x128xf32> -> vector<16x128xf32>
    %74 = arith.truncf %73 : vector<16x128xf32> to vector<16x128xbf16>
    %c128 = arith.constant 128 : index
    %c0_28 = arith.constant 0 : index
    %75 = vector.load %arg6[%c128, %c0_28] : memref<256x256xbf16, #tpu.memory_space<vmem>>, vector<128x256xbf16>
    %cst_29 = arith.constant dense<0.000000e+00> : vector<16x256xf32>
    %76 = tpu.matmul %74, %75, %cst_29 {dimension_numbers = #tpu.dot_dimension_numbers<[1], [0], [0], [1], [0, 0, 1, 1], [], []>} : vector<16x128xbf16>, vector<128x256xbf16>, vector<16x256xf32> -> vector<16x256xf32>
    %77 = arith.addf %53, %76 : vector<16x256xf32>
    %78 = arith.addf %0, %77 : vector<16x256xf32>
    %c0_30 = arith.constant 0 : index
    %c0_31 = arith.constant 0 : index
    %79 = vector.load %arg7[%c0_30, %c0_31] : memref<1x256xf32, #tpu.memory_space<vmem>>, vector<1x256xf32>
    %80 = vector.broadcast %79 : vector<1x256xf32> to vector<16x256xf32>
    %81 = arith.addf %78, %80 : vector<16x256xf32>
    %c0_32 = arith.constant 0 : index
    %c0_33 = arith.constant 0 : index
    %82 = vector.load %arg8[%c0_32, %c0_33] : memref<1x256xf32, #tpu.memory_space<vmem>>, vector<1x256xf32>
    %c0_34 = arith.constant 0 : index
    %c0_35 = arith.constant 0 : index
    %83 = vector.load %arg9[%c0_34, %c0_35] : memref<1x256xf32, #tpu.memory_space<vmem>>, vector<1x256xf32>
    %cst_36 = arith.constant dense<0.000000e+00> : vector<16xf32>
    %84 = vector.multi_reduction <add>, %81, %cst_36 [1] : vector<16x256xf32> to vector<16xf32>
    %85 = vector.shape_cast %84 : vector<16xf32> to vector<16x1xf32>
    %cst_37 = arith.constant 2.560000e+02 : f32
    %86 = vector.broadcast %cst_37 : f32 to vector<16x1xf32>
    %87 = arith.divf %85, %86 : vector<16x1xf32>
    %88 = vector.broadcast %87 : vector<16x1xf32> to vector<16x256xf32>
    %89 = arith.subf %81, %88 : vector<16x256xf32>
    %90 = arith.mulf %89, %89 : vector<16x256xf32>
    %cst_38 = arith.constant dense<0.000000e+00> : vector<16xf32>
    %91 = vector.multi_reduction <add>, %90, %cst_38 [1] : vector<16x256xf32> to vector<16xf32>
    %92 = vector.shape_cast %91 : vector<16xf32> to vector<16x1xf32>
    %cst_39 = arith.constant 2.560000e+02 : f32
    %93 = vector.broadcast %cst_39 : f32 to vector<16x1xf32>
    %94 = arith.divf %92, %93 : vector<16x1xf32>
    %cst_40 = arith.constant 9.99999974E-6 : f32
    %95 = vector.broadcast %cst_40 : f32 to vector<16x1xf32>
    %96 = arith.addf %94, %95 : vector<16x1xf32>
    %97 = math.rsqrt %96 : vector<16x1xf32>
    %98 = vector.broadcast %97 : vector<16x1xf32> to vector<16x256xf32>
    %99 = arith.mulf %89, %98 : vector<16x256xf32>
    %100 = vector.broadcast %82 : vector<1x256xf32> to vector<16x256xf32>
    %101 = arith.mulf %99, %100 : vector<16x256xf32>
    %102 = vector.broadcast %83 : vector<1x256xf32> to vector<16x256xf32>
    %103 = arith.addf %101, %102 : vector<16x256xf32>
    %104 = arith.truncf %103 : vector<16x256xf32> to vector<16x256xbf16>
    %c0_41 = arith.constant 0 : index
    %c0_42 = arith.constant 0 : index
    %105 = vector.load %arg10[%c0_41, %c0_42] : memref<256x1024xbf16, #tpu.memory_space<vmem>>, vector<256x1024xbf16>
    %cst_43 = arith.constant dense<0.000000e+00> : vector<16x1024xf32>
    %106 = tpu.matmul %104, %105, %cst_43 {dimension_numbers = #tpu.dot_dimension_numbers<[1], [0], [0], [1], [0, 0, 1, 1], [], []>} : vector<16x256xbf16>, vector<256x1024xbf16>, vector<16x1024xf32> -> vector<16x1024xf32>
    %c0_44 = arith.constant 0 : index
    %c0_45 = arith.constant 0 : index
    %107 = vector.load %arg11[%c0_44, %c0_45] : memref<1x1024xf32, #tpu.memory_space<vmem>>, vector<1x1024xf32>
    %108 = vector.broadcast %107 : vector<1x1024xf32> to vector<16x1024xf32>
    %109 = arith.addf %106, %108 : vector<16x1024xf32>
    %cst_46 = arith.constant 5.000000e-01 : f32
    %110 = vector.broadcast %cst_46 : f32 to vector<16x1024xf32>
    %111 = arith.mulf %110, %109 : vector<16x1024xf32>
    %cst_47 = arith.constant 4.471500e-02 : f32
    %112 = vector.broadcast %cst_47 : f32 to vector<16x1024xf32>
    %113 = arith.mulf %112, %109 : vector<16x1024xf32>
    %114 = arith.mulf %113, %109 : vector<16x1024xf32>
    %115 = arith.mulf %114, %109 : vector<16x1024xf32>
    %116 = arith.addf %109, %115 : vector<16x1024xf32>
    %cst_48 = arith.constant 0.797884583 : f32
    %117 = vector.broadcast %cst_48 : f32 to vector<16x1024xf32>
    %118 = arith.mulf %117, %116 : vector<16x1024xf32>
    %119 = math.tanh %118 : vector<16x1024xf32>
    %cst_49 = arith.constant 1.000000e+00 : f32
    %120 = vector.broadcast %cst_49 : f32 to vector<16x1024xf32>
    %121 = arith.addf %120, %119 : vector<16x1024xf32>
    %122 = arith.mulf %111, %121 : vector<16x1024xf32>
    %123 = arith.truncf %122 : vector<16x1024xf32> to vector<16x1024xbf16>
    %c0_50 = arith.constant 0 : index
    %c0_51 = arith.constant 0 : index
    %124 = vector.load %arg12[%c0_50, %c0_51] : memref<1024x256xbf16, #tpu.memory_space<vmem>>, vector<1024x256xbf16>
    %cst_52 = arith.constant dense<0.000000e+00> : vector<16x256xf32>
    %125 = tpu.matmul %123, %124, %cst_52 {dimension_numbers = #tpu.dot_dimension_numbers<[1], [0], [0], [1], [0, 0, 1, 1], [], []>} : vector<16x1024xbf16>, vector<1024x256xbf16>, vector<16x256xf32> -> vector<16x256xf32>
    %c0_53 = arith.constant 0 : index
    %c0_54 = arith.constant 0 : index
    %126 = vector.load %arg13[%c0_53, %c0_54] : memref<1x256xf32, #tpu.memory_space<vmem>>, vector<1x256xf32>
    %127 = vector.broadcast %126 : vector<1x256xf32> to vector<16x256xf32>
    %128 = arith.addf %125, %127 : vector<16x256xf32>
    %129 = arith.addf %128, %81 : vector<16x256xf32>
    %c0_55 = arith.constant 0 : index
    %c0_56 = arith.constant 0 : index
    %130 = vector.load %arg14[%c0_55, %c0_56] : memref<16x256xf32, #tpu.memory_space<vmem>>, vector<16x256xf32>
    tpu.vector_store %arg14[%c0_55, %c0_56], %129 {strides = array<i32>} : memref<16x256xf32, #tpu.memory_space<vmem>>, vector<16x256xf32>,
    return
  }
  func.func @transform_0(%arg0: i32) -> (i32, i32) {
    %c0_i32 = arith.constant 0 : i32
    %c0_i32_0 = arith.constant 0 : i32
    return %arg0, %c0_i32 : i32, i32
  }
  func.func @transform_1(%arg0: i32) -> (i32, i32) {
    %c0_i32 = arith.constant 0 : i32
    %c0_i32_0 = arith.constant 0 : i32
    %c0_i32_1 = arith.constant 0 : i32
    return %c0_i32, %c0_i32_0 : i32, i32
  }
  func.func @transform_2(%arg0: i32) -> (i32, i32) {
    %c0_i32 = arith.constant 0 : i32
    %c0_i32_0 = arith.constant 0 : i32
    %c0_i32_1 = arith.constant 0 : i32
    return %c0_i32, %c0_i32_0 : i32, i32
  }
  func.func @transform_3(%arg0: i32) -> (i32, i32) {
    %c0_i32 = arith.constant 0 : i32
    %c0_i32_0 = arith.constant 0 : i32
    %c0_i32_1 = arith.constant 0 : i32
    return %c0_i32, %c0_i32_0 : i32, i32
  }
  func.func @transform_4(%arg0: i32) -> (i32, i32) {
    %c0_i32 = arith.constant 0 : i32
    %c0_i32_0 = arith.constant 0 : i32
    %c0_i32_1 = arith.constant 0 : i32
    return %c0_i32, %c0_i32_0 : i32, i32
  }
  func.func @transform_5(%arg0: i32) -> (i32, i32) {
    %c0_i32 = arith.constant 0 : i32
    %c0_i32_0 = arith.constant 0 : i32
    %c0_i32_1 = arith.constant 0 : i32
    return %c0_i32, %c0_i32_0 : i32, i32
  }
  func.func @transform_6(%arg0: i32) -> (i32, i32) {
    %c0_i32 = arith.constant 0 : i32
    %c0_i32_0 = arith.constant 0 : i32
    %c0_i32_1 = arith.constant 0 : i32
    return %c0_i32, %c0_i32_0 : i32, i32
  }
  func.func @transform_7(%arg0: i32) -> (i32, i32) {
    %c0_i32 = arith.constant 0 : i32
    %c0_i32_0 = arith.constant 0 : i32
    %c0_i32_1 = arith.constant 0 : i32
    return %c0_i32, %c0_i32_0 : i32, i32
  }
  func.func @transform_8(%arg0: i32) -> (i32, i32) {
    %c0_i32 = arith.constant 0 : i32
    %c0_i32_0 = arith.constant 0 : i32
    %c0_i32_1 = arith.constant 0 : i32
    return %c0_i32, %c0_i32_0 : i32, i32
  }
  func.func @transform_9(%arg0: i32) -> (i32, i32) {
    %c0_i32 = arith.constant 0 : i32
    %c0_i32_0 = arith.constant 0 : i32
    %c0_i32_1 = arith.constant 0 : i32
    return %c0_i32, %c0_i32_0 : i32, i32
  }
  func.func @transform_10(%arg0: i32) -> (i32, i32) {
    %c0_i32 = arith.constant 0 : i32
    %c0_i32_0 = arith.constant 0 : i32
    %c0_i32_1 = arith.constant 0 : i32
    return %c0_i32, %c0_i32_0 : i32, i32
  }
  func.func @transform_11(%arg0: i32) -> (i32, i32) {
    %c0_i32 = arith.constant 0 : i32
    %c0_i32_0 = arith.constant 0 : i32
    %c0_i32_1 = arith.constant 0 : i32
    return %c0_i32, %c0_i32_0 : i32, i32
  }
  func.func @transform_12(%arg0: i32) -> (i32, i32) {
    %c0_i32 = arith.constant 0 : i32
    %c0_i32_0 = arith.constant 0 : i32
    %c0_i32_1 = arith.constant 0 : i32
    return %c0_i32, %c0_i32_0 : i32, i32
  }
  func.func @transform_13(%arg0: i32) -> (i32, i32) {
    %c0_i32 = arith.constant 0 : i32
    %c0_i32_0 = arith.constant 0 : i32
    return %arg0, %c0_i32 : i32, i32
  }
}

</mosaic_0001>

<bundles_post_ra>
// kernel: transformer_block_forward.1
= control target key start
LH: loop header
LB: loop body
LE: loop exit
PB: predicated region body
PF: predicated region fallthrough
CT: control target
= control target key end

     0   :  { %s6293_s0 = inlined_call_operand.hbm [shape: f32[32,256], index: 0, kind: input, shape index: {}]   ;;  %s6294_s1 = inlined_call_operand.vmem [shape: f32[1,256], index: 1, kind: input, shape index: {}]   ;;  %s6295_s2 = inlined_call_operand.vmem [shape: f32[1,256], index: 2, kind: input, shape index: {}]   ;;  %s6296_s3 = inlined_call_operand.hbm [shape: bf16[256,768], index: 3, kind: input, shape index: {}]   ;;  %s6297_s4 = inlined_call_operand.vmem [shape: f32[1,768], index: 4, kind: input, shape index: {}]   ;;  %s6298_s5 = inlined_call_operand.hbm [shape: bf16[256,256], index: 5, kind: input, shape index: {}]   ;;  %s6299_s6 = inlined_call_operand.hbm [shape: f32[1,256], index: 6, kind: input, shape index: {}]   ;;  %s6300_s7 = inlined_call_operand.vmem [shape: f32[1,256], index: 7, kind: input, shape index: {}]   ;;  %s6301_s8 = inlined_call_operand.vmem [shape: f32[1,256], index: 8, kind: input, shape index: {}]   ;;  %s6302_s9 = inlined_call_operand.hbm [shape: bf16[256,1024], index: 9, kind: input, shape index: {}]   ;;  %s6303_s10 = inlined_call_operand.hbm [shape: f32[1,1024], index: 10, kind: input, shape index: {}]   ;;  %s6304_s11 = inlined_call_operand.hbm [shape: bf16[1024,256], index: 11, kind: input, shape index: {}]   ;;  %s6305_s12 = inlined_call_operand.hbm [shape: f32[1,256], index: 12, kind: input, shape index: {}]   ;;  %s6306_s13 = inlined_call_operand.hbm [shape: f32[32,256], index: 13, kind: output, shape index: {}]  }
   0x1   :  { %6313 = sst [smem:[#allocation23_spill]] %s6295_s2 }
   0x2   :  { %6314 = sst [smem:[#allocation24_spill]] %s6296_s3 }
   0x3   :  { %6315 = sst [smem:[#allocation25_spill]] %s6297_s4 }
   0x4   :  { %6316 = sst [smem:[#allocation26_spill]] %s6298_s5 }
   0x5   :  { %6317 = sst [smem:[#allocation27_spill]] %s6300_s7 }
   0x6   :  { %6318 = sst [smem:[#allocation28_spill]] %s6301_s8 }
   0x7   :  { %6319 = sst [smem:[#allocation29_spill]] %s6306_s13 }
   0x8   :  { %18 = vsyncpa [#allocation3], 0 }
   0x9   :  { %20 = vsyncpa [#allocation3 + $0x1], 0 }
   0xa   :  { %21 = vsyncpa [#allocation6], 0 }
   0xb   :  { %22 = vsyncpa [#allocation9], 0 }
   0xc   :  { %23 = vsyncpa [#allocation12], 0 }
   0xd   :  { %24 = vsyncpa [#allocation15], 0 }
   0xe   :  { %25 = vsyncpa [#allocation4], 0 }
   0xf   :  { %27 = vsyncpa [#allocation4 + $0x1], 0  ;;  %s5657_s25 = smov 0   ;;  %s5659_s26 = smov 0  }
  0x10   :  { %s5661_s27 = smov 0   ;;  %s5663_s28 = smov 0  }
  0x11 LB: > { %s5565_s29 = smov [#allocation5]   ;;  %s5678_s14 = sadd.s32 4294967295, %s5563_s28   ;;  %s5563_s28 = sphi %s5663_s28, %s6352_s28   ;;  %s5559_s27 = sphi %s5661_s27, %s6351_s27   ;;  %s5555_s26 = sphi %s5659_s26, %s6350_s26   ;;  %s5551_s25 = sphi %s5657_s25, %s6349_s25  }
  0x12   : > { %s360_s30 = sshll.u32 %s5565_s29, 4  ;;  %p4210_p0 = scmp.ge.s32.totalorder %s5563_s28, 1  ;;  %s5683_s30 = int_to_ptr.vmem [resolvable:$true] %s360_s30 }
  0x13   : > { %p6308_p1 = scmp.eq.s32.totalorder %s5678_s14, 0  ;;  %p342_p2 = scmp.lt.s32.totalorder %s5563_s28, 3 }
  0x14   : > { %s5566_s16 = smov [#allocation8]   ;;  %s5567_s19 = smov [#allocation11]  }
  0x15   : > { %p5685_p3 = pnand %p4210_p0, %p342_p2  ;;  %s390_s17 = sshll.u32 %s5566_s16, 4  ;;  %s5698_s17 = int_to_ptr.vmem [resolvable:$true] %s390_s17 }
  0x16   : > { %s420_s20 = sshll.u32 %s5567_s19, 4  ;;  %s6322_s3 = sld [smem:[#allocation24_spill]]  ;;  %s5700_s20 = int_to_ptr.vmem [resolvable:$true] %s420_s20 }
  0x17   : > { %s6320_s15 = scalar_select %p5685_p3, 1, 0 }
  0x18   : > { %p4713_p5 = pneg %p5685_p3 }
  0x1a   : > { %p5694_p6 = pnand %p4713_p5, %p6308_p1 }
  0x1c   : > { %s5255_s23 = scalar_lea.hbm %s6322_s3, 12288  ;;  %p5710_p8 = pneg %p5694_p6 }
  0x1d   : > { %p5256_p7 = scmp.ne.s32.totalorder %s6322_s3, %s5255_s23  ;;  %p5262_p11 = scmp.lt.u32.totalorder %s5255_s23, %s6322_s3 }
  0x1f   : > { %p5258_p9 = pnand %p5710_p8, %p5256_p7 }
  0x21   : > { %p5259_p10 = pneg %p5258_p9 }
  0x23   : > { %p5264_p12 = pnand %p5262_p11, %p5259_p10 }
  0x25   : > { %5267 = shalt.err (!%p5264_p12)
}
  0x26   : > { %s5268_s21 = scalar_lea.vmem %s5683_s30, 12288  ;;  %p5276_p5 = scmp.lt.s32.totalorder %s5683_s30, %s5683_s30 }
  0x27   : > { %p5269_p13 = scmp.ne.s32.totalorder %s5683_s30, %s5268_s21  ;;  %p5277_p4 = scmp.lt.s32.totalorder %s5268_s21, %s5268_s21 }
  0x29   : > { %p5271_p0 = pnand %p5269_p13, %p5710_p8  ;;  %p5278_p7 = por %p5277_p4, %p5276_p5 }
  0x2b   : > { %p5272_p2 = pneg %p5271_p0 }
  0x2d   : > { %p5279_p9 = pnand %p5278_p7, %p5272_p2 }
  0x2f   : > { %5282 = shalt.err (!%p5279_p9)
}
  0x30   : > { %s5568_s22 = smov 384   ;;  %s5569_s13 = smov 24  }
  0x31   : > { %4716 = dma.hbm_to_vmem [thread:$0]  (!%p5694_p6), %s6322_s3, 12288, %s5683_s30, [#allocation6], %s5568_s22, %s5568_s22, %s5569_s13  }
  0x32   : > { %s5283_s8 = scalar_lea.hbm %s6299_s6, 32 }
  0x33   : > { %p5284_p4 = scmp.ne.s32.totalorder %s6299_s6, %s5283_s8  ;;  %p5290_p12 = scmp.lt.u32.totalorder %s5283_s8, %s6299_s6 }
  0x35   : > { %p5286_p10 = pnand %p5284_p4, %p5710_p8 }
  0x37   : > { %p5287_p11 = pneg %p5286_p10 }
  0x39   : > { %p5292_p13 = pnand %p5290_p12, %p5287_p11 }
  0x3b   : > { %5295 = shalt.err (!%p5292_p13)
}
  0x3c   : > { %s5296_s30 = scalar_lea.vmem %s5698_s17, 32  ;;  %p5304_p7 = scmp.lt.s32.totalorder %s5698_s17, %s5698_s17 }
  0x3d   : > { %p5297_p0 = scmp.ne.s32.totalorder %s5698_s17, %s5296_s30  ;;  %p5305_p9 = scmp.lt.s32.totalorder %s5296_s30, %s5296_s30 }
  0x3f   : > { %p5299_p2 = pnand %p5297_p0, %p5710_p8  ;;  %p5306_p4 = por %p5305_p9, %p5304_p7 }
  0x41   : > { %p5300_p5 = pneg %p5299_p2 }
  0x43   : > { %p5307_p10 = pnand %p5306_p4, %p5300_p5 }
  0x45   : > { %5310 = shalt.err (!%p5307_p10)
}
  0x46   : > { %4722 = dma.hbm_to_vmem [thread:$0]  (!%p5694_p6), %s6299_s6, 32, %s5698_s17, [#allocation9]  }
  0x47   : > { %s5311_s22 = scalar_lea.hbm %s6303_s10, 128 }
  0x48   : > { %p5312_p11 = scmp.ne.s32.totalorder %s6303_s10, %s5311_s22  ;;  %p5318_p0 = scmp.lt.u32.totalorder %s5311_s22, %s6303_s10 }
  0x4a   : > { %p5314_p12 = pnand %p5312_p11, %p5710_p8 }
  0x4c   : > { %p5315_p13 = pneg %p5314_p12 }
  0x4e   : > { %p5320_p2 = pnand %p5318_p0, %p5315_p13 }
  0x50   : > { %5323 = shalt.err (!%p5320_p2)
}
  0x51   : > { %s5324_s17 = scalar_lea.vmem %s5700_s20, 128  ;;  %p5332_p4 = scmp.lt.s32.totalorder %s5700_s20, %s5700_s20 }
  0x52   : > { %p5325_p5 = scmp.ne.s32.totalorder %s5700_s20, %s5324_s17  ;;  %p5333_p10 = scmp.lt.s32.totalorder %s5324_s17, %s5324_s17 }
  0x54   : > { %p5327_p7 = pnand %p5325_p5, %p5710_p8  ;;  %p5334_p11 = por %p5333_p10, %p5332_p4 }
  0x56   : > { %p5328_p9 = pneg %p5327_p7 }
  0x58   : > { %p5335_p12 = pnand %p5334_p11, %p5328_p9 }
  0x5a   : > { %5338 = shalt.err (!%p5335_p12)
}
  0x5b   : > { %4728 = dma.hbm_to_vmem [thread:$0]  (!%p5694_p6), %s6303_s10, 128, %s5700_s20, [#allocation12]  }
  0x5c   : > { %s5570_s30 = smov [#allocation7]   ;;  %s6324_s5 = sld [smem:[#allocation26_spill]] }
  0x5d   : > { %s376_s2 = sshll.u32 %s5570_s30, 4  ;;  %s377_s2 = int_to_ptr.vmem [resolvable:$true] %s376_s2 }
  0x62   : > { %s5339_s8 = scalar_lea.hbm %s6324_s5, 4096 }
  0x63   : > { %p5340_p13 = scmp.ne.s32.totalorder %s6324_s5, %s5339_s8  ;;  %p5346_p5 = scmp.lt.u32.totalorder %s5339_s8, %s6324_s5 }
  0x65   : > { %p5342_p0 = pnand %p5340_p13, %p5710_p8 }
  0x67   : > { %p5343_p2 = pneg %p5342_p0 }
  0x69   : > { %p5348_p7 = pnand %p5346_p5, %p5343_p2 }
  0x6b   : > { %5351 = shalt.err (!%p5348_p7)
}
  0x6c   : > { %s5352_s20 = scalar_lea.vmem %s377_s2, 4096  ;;  %p5360_p11 = scmp.lt.s32.totalorder %s377_s2, %s377_s2 }
  0x6d   : > { %p5353_p9 = scmp.ne.s32.totalorder %s377_s2, %s5352_s20  ;;  %p5361_p12 = scmp.lt.s32.totalorder %s5352_s20, %s5352_s20 }
  0x6f   : > { %p5355_p4 = pnand %p5353_p9, %p5710_p8  ;;  %p5362_p1 = por %p5361_p12, %p5360_p11 }
  0x71   : > { %p5356_p10 = pneg %p5355_p4 }
  0x73   : > { %p5363_p3 = pnand %p5362_p1, %p5356_p10 }
  0x75   : > { %5366 = shalt.err (!%p5363_p3)
}
  0x76   : > { %s6310_s29 = smov 128   ;;  %s6311_s17 = smov 8  }
  0x77   : > { %4719 = dma.hbm_to_vmem [thread:$0]  (!%p5694_p6), %s6324_s5, 4096, %s377_s2, [#allocation6], %s6310_s29, %s6310_s29, %s6311_s17  }
  0x78   : > { %s5573_s30 = smov [#allocation10]   ;;  %s5367_s22 = scalar_lea.hbm %s6302_s9, 16384 }
  0x79   : > { %s406_s4 = sshll.u32 %s5573_s30, 4  ;;  %p5368_p1 = scmp.ne.s32.totalorder %s6302_s9, %s5367_s22  ;;  %s407_s4 = int_to_ptr.vmem [resolvable:$true] %s406_s4 }
  0x7a   : > { %p5374_p0 = scmp.lt.u32.totalorder %s5367_s22, %s6302_s9 }
  0x7b   : > { %p5370_p3 = pnand %p5368_p1, %p5710_p8 }
  0x7d   : > { %p5371_p13 = pneg %p5370_p3 }
  0x7f   : > { %p5376_p2 = pnand %p5374_p0, %p5371_p13 }
  0x81   : > { %5379 = shalt.err (!%p5376_p2)
}
  0x82   : > { %s5380_s2 = scalar_lea.vmem %s407_s4, 16384  ;;  %p5388_p4 = scmp.lt.s32.totalorder %s407_s4, %s407_s4 }
  0x83   : > { %p5381_p5 = scmp.ne.s32.totalorder %s407_s4, %s5380_s2  ;;  %p5389_p10 = scmp.lt.s32.totalorder %s5380_s2, %s5380_s2 }
  0x85   : > { %p5383_p7 = pnand %p5381_p5, %p5710_p8  ;;  %p5390_p11 = por %p5389_p10, %p5388_p4 }
  0x87   : > { %p5384_p9 = pneg %p5383_p7 }
  0x89   : > { %p5391_p12 = pnand %p5390_p11, %p5384_p9 }
  0x8b   : > { %5394 = shalt.err (!%p5391_p12)
}
  0x8c   : > { %s5574_s19 = smov 512   ;;  %s5575_s21 = smov 32  }
  0x8d   : > { %4725 = dma.hbm_to_vmem [thread:$0]  (!%p5694_p6), %s6302_s9, 16384, %s407_s4, [#allocation9], %s5574_s19, %s5574_s19, %s5575_s21  }
  0x8e   : > { %s5576_s8 = smov [#allocation13]   ;;  %s5577_s13 = smov [#allocation14]  }
  0x8f   : > { %s430_s22 = sshll.u32 %s5576_s8, 4  ;;  %s444_s23 = sshll.u32 %s5577_s13, 4  ;;  %s431_s22 = int_to_ptr.vmem [resolvable:$true] %s430_s22  ;;  %s445_s23 = int_to_ptr.vmem [resolvable:$true] %s444_s23 }
  0x90   : > { %s5395_s2 = scalar_lea.hbm %s6304_s11, 16384 }
  0x91   : > { %p5396_p1 = scmp.ne.s32.totalorder %s6304_s11, %s5395_s2  ;;  %p5402_p0 = scmp.lt.u32.totalorder %s5395_s2, %s6304_s11 }
  0x93   : > { %p5398_p3 = pnand %p5396_p1, %p5710_p8 }
  0x95   : > { %p5399_p13 = pneg %p5398_p3 }
  0x97   : > { %p5404_p2 = pnand %p5402_p0, %p5399_p13 }
  0x99   : > { %5407 = shalt.err (!%p5404_p2)
}
  0x9a   : > { %s5408_s4 = scalar_lea.vmem %s431_s22, 16384  ;;  %p5416_p4 = scmp.lt.s32.totalorder %s431_s22, %s431_s22 }
  0x9b   : > { %p5409_p5 = scmp.ne.s32.totalorder %s431_s22, %s5408_s4  ;;  %p5417_p10 = scmp.lt.s32.totalorder %s5408_s4, %s5408_s4 }
  0x9d   : > { %p5411_p7 = pnand %p5409_p5, %p5710_p8  ;;  %p5418_p11 = por %p5417_p10, %p5416_p4 }
  0x9f   : > { %p5412_p9 = pneg %p5411_p7 }
  0xa1   : > { %p5419_p12 = pnand %p5418_p11, %p5412_p9 }
  0xa3   : > { %5422 = shalt.err (!%p5419_p12)
}
  0xa4   : > { %s6325_s29 = smov 8   ;;  %s6326_s17 = smov 128  }
  0xa5   : > { %4731 = dma.hbm_to_vmem [thread:$0]  (!%p5694_p6), %s6304_s11, 16384, %s431_s22, [#allocation12], %s6326_s17, %s6326_s17, %s6325_s29  }
  0xa6   : > { %s5423_s30 = scalar_lea.hbm %s6305_s12, 32 }
  0xa7   : > { %p5424_p1 = scmp.ne.s32.totalorder %s6305_s12, %s5423_s30  ;;  %p5430_p0 = scmp.lt.u32.totalorder %s5423_s30, %s6305_s12 }
  0xa9   : > { %p5426_p3 = pnand %p5424_p1, %p5710_p8 }
  0xab   : > { %p5427_p13 = pneg %p5426_p3 }
  0xad   : > { %p5432_p2 = pnand %p5430_p0, %p5427_p13 }
  0xaf   : > { %5435 = shalt.err (!%p5432_p2)
}
  0xb0   : > { %s5436_s20 = scalar_lea.vmem %s445_s23, 32  ;;  %p5444_p4 = scmp.lt.s32.totalorder %s445_s23, %s445_s23 }
  0xb1   : > { %p5437_p5 = scmp.ne.s32.totalorder %s445_s23, %s5436_s20  ;;  %p5445_p10 = scmp.lt.s32.totalorder %s5436_s20, %s5436_s20 }
  0xb3   : > { %p5439_p7 = pnand %p5437_p5, %p5710_p8  ;;  %p5446_p11 = por %p5445_p10, %p5444_p4 }
  0xb5   : > { %p5440_p9 = pneg %p5439_p7 }
  0xb7   : > { %p5447_p12 = pnand %p5446_p11, %p5440_p9 }
  0xb9   : > { %5450 = shalt.err (!%p5447_p12)
}
  0xba   : > { %4734 = dma.hbm_to_vmem [thread:$0]  (!%p5694_p6), %s6305_s12, 32, %s445_s23, [#allocation15]  }
  0xbb   : > { %s4209_s16 = sadd.s32 4294967294, %s5563_s28   ;;  %s5857_s18 = sadd.s32 1, %s5563_s28  }
  0xbc   : > { %s40_s4 = sadd.s32 1, %s5559_s27  ;;  %s37_s29 = ssub.s32 %s5563_s28, %s5857_s18 }
  0xbd   : > { %p47_p8 = scmp.ne.s32.totalorder %s5559_s27, %s5555_s26  ;;  %p38_p1 = scmp.eq.s32.totalorder %s37_s29, 0 }
  0xbe   : > { %p48_p3 = scmp.eq.s32.totalorder %s5563_s28, 0  ;;  %p53_p13 = scmp.ne.s32.totalorder %s5555_s26, %s5551_s25 }
  0xbf   : > { %p329_p0 = scmp.eq.s32.totalorder %s5678_s14, 1  ;;  %p6327_p5 = scmp.eq.s32.totalorder %s5678_s14, 0 }
  0xc0   : > { %s5869_s17 = scalar_select %p38_p1, %s5559_s27, %s40_s4  }
  0xc1   : > { %p49_p2 = por %p48_p3, %p47_p8  ;;  %p5873_p7 = por %p6327_p5, %p53_p13 }
  0xc2   : > { %p5877_p6 = por %p329_p0, %p47_p8  ;;  %p335_p9 = scmp.eq.s32.totalorder %s4209_s16, 1 }
  0xc3   : > { %p4750_p4 = scmp.lt.s32.totalorder %s5563_s28, 2  ;;  %s455_s5 = sand.u32 1, %s5559_s27  }
  0xc4   : > { %s6329_s23 = scalar_select %p5877_p6, 1, 0 }
  0xc5   : > { %p5883_p10 = por %p335_p9, %p53_p13  ;;  %s4219_s21 = sshll.u32 %s455_s5, 5 }
  0xc6   : > { %s4626_s30 = sshll.u32 %s5563_s28, 9  ;;  %s459_s24 = scalar_lea.vmem [#allocation2], %s4219_s21 }
  0xc7   : > { %s6330_s19 = scalar_select %p5883_p10, 1, 0 }
  0xc8   : > { %s5891_s13 = scalar_lea.hbm %s6293_s0, %s4626_s30  ;;  %s467_s20 = sshll.u32 %s459_s24, 4  ;;  %s5897_s20 = int_to_ptr.vmem [resolvable:$true] %s467_s20 }
  0xc9   : > { %p5893_p11 = pnand %p4750_p4, %p49_p2  ;;  %s5899_s2 = scalar_lea.sflag [#allocation3], %s455_s5 }
  0xca   : > { %s5451_s16 = scalar_lea.hbm %s5891_s13, 512  ;;  %s5456_s21 = scalar_lea.hbm %s6293_s0, 1024 }
  0xcb   : > { %p5452_p12 = scmp.ne.s32.totalorder %s5891_s13, %s5451_s16  ;;  %p5453_p8 = pneg %p5893_p11 }
  0xcc   : > { %p5457_p13 = scmp.lt.u32.totalorder %s5891_s13, %s6293_s0  ;;  %p5458_p0 = scmp.lt.u32.totalorder %s5456_s21, %s5451_s16 }
  0xcd   : > { %p5454_p1 = pnand %p5453_p8, %p5452_p12  ;;  %p5460_p5 = scmp.lt.u32.totalorder %s5451_s16, %s5891_s13 }
  0xce   : > { %p5459_p2 = por %p5458_p0, %p5457_p13 }
  0xcf   : > { %p5455_p3 = pneg %p5454_p1 }
  0xd0   : > { %p5461_p9 = por %p5460_p5, %p5459_p2 }
  0xd2   : > { %p5462_p4 = pnand %p5461_p9, %p5455_p3 }
  0xd4   : > { %5465 = shalt.err (!%p5462_p4)
}
  0xd5   : > { %s5466_s5 = scalar_lea.vmem %s5897_s20, 512  ;;  %s5578_s8 = smov [#allocation2]  }
  0xd6   : > { %p5467_p12 = scmp.ne.s32.totalorder %s5897_s20, %s5466_s5  ;;  %s5471_s24 = sshll.u32 %s5578_s8, 4  ;;  %s5472_s24 = int_to_ptr.vmem [resolvable:$false] %s5471_s24 }
  0xd7   : > { %s5473_s4 = scalar_lea.vmem %s5472_s24, 1024  ;;  %p5474_p6 = scmp.lt.s32.totalorder %s5897_s20, %s5472_s24 }
  0xd8   : > { %p5469_p1 = pnand %p5467_p12, %p5453_p8  ;;  %p5475_p13 = scmp.lt.s32.totalorder %s5473_s4, %s5466_s5 }
  0xda   : > { %p5470_p10 = pneg %p5469_p1  ;;  %p5476_p0 = por %p5475_p13, %p5474_p6 }
  0xdc   : > { %p5477_p2 = pnand %p5476_p0, %p5470_p10 }
  0xde   : > { %5480 = shalt.err (!%p5477_p2)
}
  0xdf   : > { %s5579_s16 = smov 256   ;;  %s5580_s29 = smov 16  }
  0xe0   : > { %4738 = dma.hbm_to_vmem [thread:$0]  (!%p5893_p11), %s5891_s13, 512, %s5897_s20, %s5899_s2, %s5579_s16, %s5579_s16, %s5580_s29  }
  0xe1   : > { %p6332_p8 = scmp.ne.s32.totalorder %s6320_s15, 0 }
  0xe2   : > { %s5930_s21 = sand.u32 (!%p6332_p8), 1, %s5555_s26  }
  0xe3   : > { %479 = sbr.rel (%p6332_p8) target bundleno = 2851 (0xb23), region = 72  ;;  %s4224_s30 = sshll.u32 (!%p6332_p8), %s5930_s21, 5 }
  0xe4   : > { %s482_s7 = scalar_lea.sflag (!%p6332_p8), [#allocation3], %s5930_s21  ;;  %s5936_s5 = scalar_lea.vmem (!%p6332_p8), [#allocation2], %s4224_s30 }
  0xea   : > { %5526 = dma.done.wait (%p5873_p7), %s482_s7, 512  }
  0xeb   : > { %5528 = vsyncadd (%p5873_p7), %s482_s7, 4294966784  ;;  %p6333_p6 = scmp.eq.s32.totalorder %s5678_s14, 0 }
  0xed   : > { %5530 = dma.done.wait (%p6333_p6), [#allocation6], 16384   ;;  %p6334_p10 = pmov %p6333_p6 }
  0xee   : > { %p6335_p11 = pmov %p6333_p6 }
  0xef   : > { %5532 = vsyncadd (%p6334_p10), [#allocation6], 4294950912 }
  0xf0   : > { %5534 = dma.done.wait (%p6335_p11), [#allocation9], 16416   ;;  %p6336_p3 = pmov %p6333_p6 }
  0xf2   : > { %5536 = vsyncadd (%p6336_p3), [#allocation9], 4294950880  ;;  %p6337_p5 = pmov %p6336_p3 }
  0xf3   : > { %p6338_p9 = pmov %p6336_p3 }
  0xf4   : > { %5538 = dma.done.wait (%p6337_p5), [#allocation12], 16512  }
  0xf5   : > { %5540 = vsyncadd (%p6338_p9), [#allocation12], 4294950784  ;;  %p6339_p7 = pmov %p6336_p3 }
  0xf6   : > { %p6340_p4 = pmov %p6336_p3 }
  0xf7   : > { %5542 = dma.done.wait (%p6339_p7), [#allocation15], 32  }
  0xf8   : > { %5544 = vsyncadd (%p6340_p4), [#allocation15], 4294967264  ;;  %v559_v0 = vld [vmem:[%s5936_s5] sm:$0xff]  ;;  %v560_v1 = vld [vmem:[%s5936_s5 + $0x8] sm:$0xff]  ;;  %v599_v57 = vlaneseq  ;;  %s6341_s22 = sld [smem:[#allocation23_spill]]  ;;  %vm5582_vm0 = vmmov 0  }
  0xf9   : > { %v561_v2 = vld [vmem:[%s5936_s5 + $0x10] sm:$0xff]  ;;  %v565_v3 = vadd.f32 %v560_v1, %v559_v0  ;;  %v562_v4 = vld [vmem:[%s5936_s5 + $0x18] sm:$0xff]  ;;  %v4861_v52 = vld [vmem:[#allocation5 + $0xc] ss:$24 sps:$4 sm:$0xff]   ;;  %s6342_s24 = sld [smem:[#allocation25_spill]]  ;;  %vm1413_vm1 = vcmask 130048  }
  0xfa   : > { %v568_v5 = vadd.f32 %v562_v4, %v561_v2  ;;  %v4811_v6 = vld [vmem:[#allocation5 + $0x4] ss:$24 sps:$4 sm:$0xff]   ;;  %v4813_v7 = vld [vmem:[#allocation5] ss:$24 sps:$4 sm:$0xff]   ;;  %v4814_v8 = vld [vmem:[#allocation5 + $0x34] ss:$24 sps:$4 sm:$0xff]  }
  0xfb   : > { %566 = vadd.xlane.f32.xlu0 %v565_v3  ;;  %1238 = vmatprep.subr.bf16.mxu1 %v4811_v6  ;;  %v4816_v9 = vld [vmem:[#allocation5 + $0x30] ss:$24 sps:$4 sm:$0xff]   ;;  %v4817_v10 = vld [vmem:[#allocation5 + $0x64] ss:$24 sps:$4 sm:$0xff]   ;;  %v4819_v11 = vld [vmem:[#allocation5 + $0x60] ss:$24 sps:$4 sm:$0xff]  }
  0xfc   : > { %1239 = vmatpush1.bf16.msra.mxu1 %v4813_v7  ;;  %v4820_v12 = vld [vmem:[#allocation5 + $0x94] ss:$24 sps:$4 sm:$0xff]   ;;  %v4822_v13 = vld [vmem:[#allocation5 + $0x90] ss:$24 sps:$4 sm:$0xff]   ;;  %v4823_v14 = vld [vmem:[#allocation5 + $0xc4] ss:$24 sps:$4 sm:$0xff]  }
  0xfd   : > { %1240 = vmatprep.subr.bf16.mxu1 %v4814_v8  ;;  %v4825_v15 = vld [vmem:[#allocation5 + $0xc0] ss:$24 sps:$4 sm:$0xff]   ;;  %v4826_v16 = vld [vmem:[#allocation5 + $0xf4] ss:$24 sps:$4 sm:$0xff]   ;;  %v4828_v17 = vld [vmem:[#allocation5 + $0xf0] ss:$24 sps:$4 sm:$0xff]  }
  0xfe   : > { %v4829_v18 = vld [vmem:[#allocation5 + $0x124] ss:$24 sps:$4 sm:$0xff]   ;;  %v4831_v19 = vld [vmem:[#allocation5 + $0x120] ss:$24 sps:$4 sm:$0xff]   ;;  %v4832_v20 = vld [vmem:[#allocation5 + $0x154] ss:$24 sps:$4 sm:$0xff]  }
  0xff   : > { %569 = vadd.xlane.f32.xlu0 %v568_v5  ;;  %v4834_v21 = vld [vmem:[#allocation5 + $0x150] ss:$24 sps:$4 sm:$0xff]   ;;  %v4835_v22 = vld [vmem:[#allocation5 + $0x184] ss:$24 sps:$4 sm:$0xff]   ;;  %v4837_v23 = vld [vmem:[#allocation5 + $0x180] ss:$24 sps:$4 sm:$0xff]  }
 0x100   : > { %1241 = vmatpush1.bf16.msra.mxu1 %v4816_v9  ;;  %v4838_v24 = vld [vmem:[#allocation5 + $0x1b4] ss:$24 sps:$4 sm:$0xff]   ;;  %v4840_v39 = vld [vmem:[#allocation5 + $0x1b0] ss:$24 sps:$4 sm:$0xff]   ;;  %v4841_v40 = vld [vmem:[#allocation5 + $0x1e4] ss:$24 sps:$4 sm:$0xff]  }
 0x101   : > { %1242 = vmatprep.subr.bf16.mxu1 %v4817_v10  ;;  %v4843_v41 = vld [vmem:[#allocation5 + $0x1e0] ss:$24 sps:$4 sm:$0xff]   ;;  %v4844_v42 = vld [vmem:[#allocation5 + $0x214] ss:$24 sps:$4 sm:$0xff]   ;;  %v4846_v43 = vld [vmem:[#allocation5 + $0x210] ss:$24 sps:$4 sm:$0xff]  }
 0x102   : > { %v4847_v44 = vld [vmem:[#allocation5 + $0x244] ss:$24 sps:$4 sm:$0xff]   ;;  %v4849_v45 = vld [vmem:[#allocation5 + $0x240] ss:$24 sps:$4 sm:$0xff]   ;;  %v4850_v46 = vld [vmem:[#allocation5 + $0x274] ss:$24 sps:$4 sm:$0xff]  }
 0x103   : > { %v4852_v47 = vld [vmem:[#allocation5 + $0x270] ss:$24 sps:$4 sm:$0xff]   ;;  %v4853_v48 = vld [vmem:[#allocation5 + $0x2a4] ss:$24 sps:$4 sm:$0xff]   ;;  %v4855_v49 = vld [vmem:[#allocation5 + $0x2a0] ss:$24 sps:$4 sm:$0xff]  }
 0x104   : > { %1243 = vmatpush1.bf16.msra.mxu1 %v4819_v11  ;;  %v4856_v50 = vld [vmem:[#allocation5 + $0x2d4] ss:$24 sps:$4 sm:$0xff]   ;;  %v4858_v51 = vld [vmem:[#allocation5 + $0x2d0] ss:$24 sps:$4 sm:$0xff]   ;;  %v5962_v60 = vshrl.u32 %v599_v57, 7  ;;  %s6343_s29 = sld [smem:[#allocation27_spill]] }
 0x105   : > { %1244 = vmatprep.subr.bf16.mxu1 %v4820_v12  ;;  %v563_v63 = vld [vmem:[%s6294_s1] sm:$0x3]  ;;  %v4913_v57 = vld [vmem:[#allocation5 + $0x70] ss:$24 sps:$4 sm:$0xff]   ;;  %s6344_s15 = sld [smem:[#allocation28_spill]]  ;;  %s555_s3 = scalar_lea.vmem [#allocation16], %s4224_s30 }
 0x106   : > { %v5965_v61 = vsub.s32 1, %v5962_v60  ;;  %v5968_v62 = vsub.s32 0, %v5962_v60  ;;  %s4069_s13 = sshll.u32 %s555_s3, 4  ;;  %s4628_s20 = sshll.u32 %s5678_s14, 9  ;;  %s6241_s13 = int_to_ptr.vmem [resolvable:$true] %s4069_s13 }
 0x107   : > { %s6345_s2 = sld [smem:[#allocation29_spill]]  ;;  %s4055_s8 = scalar_lea.sflag [#allocation4], %s5930_s21 }
 0x108   : > { %1245 = vmatpush1.bf16.msra.mxu1 %v4822_v13  ;;  %v606_v3 = vrot.slane %v563_v63, %v5965_v61  ;;  %v602_v5 = vrot.slane %v563_v63, %v5968_v62  ;;  %v4921_v63 = vld [vmem:[#allocation5 + $0xd4] ss:$24 sps:$4 sm:$0xff]   ;;  %p6346_p1 = scmp.ne.s32.totalorder %s6329_s23, 0  ;;  %s5584_s4 = smov [#allocation16]  }
 0x109   : > { %1246 = vmatprep.subr.bf16.mxu1 %v4823_v14  ;;  %s5485_s16 = sshll.u32 %s5584_s4, 4  ;;  %s5486_s16 = int_to_ptr.vmem [resolvable:$false] %s5485_s16 }
 0x10a   : > { %p5488_p2 = scmp.lt.s32.totalorder %s6241_s13, %s5486_s16 }
 0x10c   : > { %1247 = vmatpush1.bf16.msra.mxu1 %v4825_v15 }
 0x10d   : > { %1248 = vmatprep.subr.bf16.mxu1 %v4826_v16  ;;  %s6248_s14 = scalar_lea.hbm %s6345_s2, %s4628_s20 }
 0x110   : > { %1249 = vmatpush1.bf16.msra.mxu1 %v4828_v17 }
 0x111   : > { %1250 = vmatprep.subr.bf16.mxu1 %v4829_v18 }
 0x114   : > { %1251 = vmatpush1.bf16.msra.mxu1 %v4831_v19 }
 0x115   : > { %1252 = vmatprep.subr.bf16.mxu1 %v4832_v20  ;;  %v4859_v20 = vld [vmem:[#allocation5 + $0x8] ss:$24 sps:$4 sm:$0xff]  }
 0x118   : > { %1253 = vmatpush1.bf16.msra.mxu1 %v4834_v21 }
 0x119   : > { %1254 = vmatprep.subr.bf16.mxu1 %v4835_v22  ;;  %v4864_v22 = vld [vmem:[#allocation5 + $0x3c] ss:$24 sps:$4 sm:$0xff]  }
 0x11c   : > { %1255 = vmatpush1.bf16.msra.mxu1 %v4837_v23  ;;  %v4862_v23 = vld [vmem:[#allocation5 + $0x38] ss:$24 sps:$4 sm:$0xff]  }
 0x11d   : > { %1256 = vmatprep.subr.bf16.mxu1 %v4838_v24  ;;  %v4867_v24 = vld [vmem:[#allocation5 + $0x6c] ss:$24 sps:$4 sm:$0xff]  }
 0x120   : > { %1257 = vmatpush1.bf16.msra.mxu1 %v4840_v39  ;;  %v4886_v39 = vld [vmem:[#allocation5 + $0x1b8] ss:$24 sps:$4 sm:$0xff]  }
 0x121   : > { %1258 = vmatprep.subr.bf16.mxu1 %v4841_v40  ;;  %v4891_v40 = vld [vmem:[#allocation5 + $0x1ec] ss:$24 sps:$4 sm:$0xff]  }
 0x124   : > { %1259 = vmatpush1.bf16.msra.mxu1 %v4843_v41  ;;  %v4889_v41 = vld [vmem:[#allocation5 + $0x1e8] ss:$24 sps:$4 sm:$0xff]  }
 0x125   : > { %1260 = vmatprep.subr.bf16.mxu1 %v4844_v42  ;;  %v4894_v42 = vld [vmem:[#allocation5 + $0x21c] ss:$24 sps:$4 sm:$0xff]  }
 0x128   : > { %1261 = vmatpush1.bf16.msra.mxu1 %v4846_v43  ;;  %v4892_v43 = vld [vmem:[#allocation5 + $0x218] ss:$24 sps:$4 sm:$0xff]  }
 0x129   : > { %1262 = vmatprep.subr.bf16.mxu1 %v4847_v44  ;;  %v4897_v44 = vld [vmem:[#allocation5 + $0x24c] ss:$24 sps:$4 sm:$0xff]  }
 0x12c   : > { %1263 = vmatpush1.bf16.msra.mxu1 %v4849_v45  ;;  %v4895_v45 = vld [vmem:[#allocation5 + $0x248] ss:$24 sps:$4 sm:$0xff]  }
 0x12d   : > { %1264 = vmatprep.subr.bf16.mxu1 %v4850_v46  ;;  %v4900_v46 = vld [vmem:[#allocation5 + $0x27c] ss:$24 sps:$4 sm:$0xff]  }
 0x130   : > { %1265 = vmatpush1.bf16.msra.mxu1 %v4852_v47  ;;  %v4898_v47 = vld [vmem:[#allocation5 + $0x278] ss:$24 sps:$4 sm:$0xff]  }
 0x131   : > { %1266 = vmatprep.subr.bf16.mxu1 %v4853_v48  ;;  %v4903_v48 = vld [vmem:[#allocation5 + $0x2ac] ss:$24 sps:$4 sm:$0xff]  }
 0x134   : > { %1267 = vmatpush1.bf16.msra.mxu1 %v4855_v49  ;;  %v4901_v49 = vld [vmem:[#allocation5 + $0x2a8] ss:$24 sps:$4 sm:$0xff]  }
 0x135   : > { %1268 = vmatprep.subr.bf16.mxu1 %v4856_v50  ;;  %v4906_v50 = vld [vmem:[#allocation5 + $0x2dc] ss:$24 sps:$4 sm:$0xff]  }
 0x138   : > { %1269 = vmatpush1.bf16.msra.mxu1 %v4858_v51  ;;  %v4904_v51 = vld [vmem:[#allocation5 + $0x2d8] ss:$24 sps:$4 sm:$0xff]  }
 0x139   : > { %1281 = vmatprep.subr.bf16.mxu1 %v4861_v52  ;;  %v4909_v52 = vld [vmem:[#allocation5 + $0x14] ss:$24 sps:$4 sm:$0xff]  }
 0x188   : > { %v567_v25 = vpop.xlane.xlu0 %566 }
 0x189   : > { %v572_v26 = vmul.f32 0.00390625, %v567_v25  ;;  %v4865_v25 = vld [vmem:[#allocation5 + $0x68] ss:$24 sps:$4 sm:$0xff]  }
 0x18b   : > { %v574_v27 = vsub.f32 %v559_v0, %v572_v26  ;;  %v575_v28 = vsub.f32 %v560_v1, %v572_v26  ;;  %v564_v1 = vld [vmem:[%s6341_s22] sm:$0x3]  ;;  %v4870_v26 = vld [vmem:[#allocation5 + $0x9c] ss:$24 sps:$4 sm:$0xff]  }
 0x18c   : > { %v570_v29 = vpop.xlane.xlu0 %569  ;;  %v621_v7 = vrot.slane %v564_v1, %v5965_v61  ;;  %v617_v8 = vrot.slane %v564_v1, %v5968_v62  ;;  %v4924_v1 = vld [vmem:[#allocation5 + $0x104] ss:$24 sps:$4 sm:$0xff]  }
 0x18d   : > { %v573_v30 = vmul.f32 0.00390625, %v570_v29  ;;  %v578_v31 = vmul.f32 %v574_v27, %v574_v27  ;;  %v579_v32 = vmul.f32 %v575_v28, %v575_v28  ;;  %v4871_v29 = vld [vmem:[#allocation5 + $0xc8] ss:$24 sps:$4 sm:$0xff]  }
 0x18f   : > { %v576_v33 = vsub.f32 %v561_v2, %v573_v30  ;;  %v577_v34 = vsub.f32 %v562_v4, %v573_v30  ;;  %v582_v35 = vadd.f32 %v579_v32, %v578_v31  ;;  %v4876_v30 = vld [vmem:[#allocation5 + $0xfc] ss:$24 sps:$4 sm:$0xff]   ;;  %v4874_v31 = vld [vmem:[#allocation5 + $0xf8] ss:$24 sps:$4 sm:$0xff]   ;;  %v4879_v32 = vld [vmem:[#allocation5 + $0x12c] ss:$24 sps:$4 sm:$0xff]  }
 0x191   : > { %583 = vadd.xlane.f32.xlu1 %v582_v35  ;;  %v580_v36 = vmul.f32 %v576_v33, %v576_v33  ;;  %v581_v37 = vmul.f32 %v577_v34, %v577_v34  ;;  %v4880_v35 = vld [vmem:[#allocation5 + $0x158] ss:$24 sps:$4 sm:$0xff]  }
 0x193   : > { %v585_v38 = vadd.f32 %v581_v37, %v580_v36  ;;  %v4885_v36 = vld [vmem:[#allocation5 + $0x18c] ss:$24 sps:$4 sm:$0xff]   ;;  %v4883_v37 = vld [vmem:[#allocation5 + $0x188] ss:$24 sps:$4 sm:$0xff]  }
 0x195   : > { %586 = vadd.xlane.f32.xlu1 %v585_v38  ;;  %v4888_v38 = vld [vmem:[#allocation5 + $0x1bc] ss:$24 sps:$4 sm:$0xff]  }
 0x21e   : > { %v584_v53 = vpop.xlane.xlu1 %583 }
 0x21f   : > { %v588_v54 = vmul.f32 0.00390625, %v584_v53  ;;  %v4907_v53 = vld [vmem:[#allocation5 + $0x10] ss:$24 sps:$4 sm:$0xff]  }
 0x221   : > { %v590_v55 = vadd.f32 1e-05, %v588_v54  ;;  %v4912_v54 = vld [vmem:[#allocation5 + $0x44] ss:$24 sps:$4 sm:$0xff]  }
 0x222   : > { %v587_v56 = vpop.xlane.xlu1 %586 }
 0x223   : > { %5195 = vrsqrt.f32 %v590_v55  ;;  %v589_v58 = vmul.f32 0.00390625, %v587_v56  ;;  %v4910_v55 = vld [vmem:[#allocation5 + $0x40] ss:$24 sps:$4 sm:$0xff]   ;;  %v4915_v56 = vld [vmem:[#allocation5 + $0x74] ss:$24 sps:$4 sm:$0xff]  }
 0x225   : > { %v591_v59 = vadd.f32 1e-05, %v589_v58  ;;  %v4918_v58 = vld [vmem:[#allocation5 + $0xa4] ss:$24 sps:$4 sm:$0xff]  }
 0x227   : > { %5197 = vrsqrt.f32 %v591_v59  ;;  %v4916_v59 = vld [vmem:[#allocation5 + $0xa0] ss:$24 sps:$4 sm:$0xff]  }
 0x22d   : > { %v5196_v0 = vpop.eup %5195 }
 0x22e   : > { %v595_v2 = vmul.f32 %v5196_v0, %v575_v28  ;;  %v594_v4 = vmul.f32 %v5196_v0, %v574_v27  ;;  %v4868_v27 = vld [vmem:[#allocation5 + $0x98] ss:$24 sps:$4 sm:$0xff]   ;;  %v4873_v28 = vld [vmem:[#allocation5 + $0xcc] ss:$24 sps:$4 sm:$0xff]  }
 0x22f   : > { %v4919_v0 = vld [vmem:[#allocation5 + $0xd0] ss:$24 sps:$4 sm:$0xff]  }
 0x230   : > { %v610_v10 = vmul.f32 %v606_v3, %v595_v2  ;;  %v609_v12 = vmul.f32 %v602_v5, %v594_v4  ;;  %v4922_v2 = vld [vmem:[#allocation5 + $0x100] ss:$24 sps:$4 sm:$0xff]   ;;  %v4925_v4 = vld [vmem:[#allocation5 + $0x130] ss:$24 sps:$4 sm:$0xff]  }
 0x231   : > { %v5198_v6 = vpop.eup %5197 }
 0x232   : > { %v597_v9 = vmul.f32 %v5198_v6, %v577_v34  ;;  %v596_v11 = vmul.f32 %v5198_v6, %v576_v33  ;;  %v625_v15 = vadd.f32 %v621_v7, %v610_v10  ;;  %v624_v17 = vadd.f32 %v617_v8, %v609_v12  ;;  %v4877_v33 = vld [vmem:[#allocation5 + $0x128] ss:$24 sps:$4 sm:$0xff]   ;;  %v4882_v34 = vld [vmem:[#allocation5 + $0x15c] ss:$24 sps:$4 sm:$0xff]  }
 0x233   : > { %v4928_v6 = vld [vmem:[#allocation5 + $0x160] ss:$24 sps:$4 sm:$0xff]   ;;  %v4937_v12 = vld [vmem:[#allocation5 + $0x1f0] ss:$24 sps:$4 sm:$0xff]  }
 0x234   : > { %v612_v13 = vmul.f32 %v606_v3, %v597_v9  ;;  %v611_v14 = vmul.f32 %v602_v5, %v596_v11  ;;  %v4927_v3 = vld [vmem:[#allocation5 + $0x134] ss:$24 sps:$4 sm:$0xff]   ;;  %v4930_v5 = vld [vmem:[#allocation5 + $0x164] ss:$24 sps:$4 sm:$0xff]   ;;  %v4934_v10 = vld [vmem:[#allocation5 + $0x1c0] ss:$24 sps:$4 sm:$0xff]  }
 0x235   : > { %v4936_v9 = vld [vmem:[#allocation5 + $0x1c4] ss:$24 sps:$4 sm:$0xff]   ;;  %v4939_v11 = vld [vmem:[#allocation5 + $0x1f4] ss:$24 sps:$4 sm:$0xff]  }
 0x236   : > { %v627_v16 = vadd.f32 %v621_v7, %v612_v13  ;;  %v626_v18 = vadd.f32 %v617_v8, %v611_v14  ;;  %v4933_v7 = vld [vmem:[#allocation5 + $0x194] ss:$24 sps:$4 sm:$0xff]   ;;  %v4931_v8 = vld [vmem:[#allocation5 + $0x190] ss:$24 sps:$4 sm:$0xff]   ;;  %v4942_v13 = vld [vmem:[#allocation5 + $0x224] ss:$24 sps:$4 sm:$0xff]  }
 0x237   : > { %v4940_v14 = vld [vmem:[#allocation5 + $0x220] ss:$24 sps:$4 sm:$0xff]  }
 0x238   : > { %v5980_v19 = vpack.c.bf16 %v627_v16, %v625_v15  ;;  %v5982_v21 = vpack.c.bf16 %v626_v18, %v624_v17  ;;  %v4945_v15 = vld [vmem:[#allocation5 + $0x254] ss:$24 sps:$4 sm:$0xff]   ;;  %v4943_v16 = vld [vmem:[#allocation5 + $0x250] ss:$24 sps:$4 sm:$0xff]   ;;  %v4948_v17 = vld [vmem:[#allocation5 + $0x284] ss:$24 sps:$4 sm:$0xff]  }
 0x239   : > { %v4946_v18 = vld [vmem:[#allocation5 + $0x280] ss:$24 sps:$4 sm:$0xff]  }
 0x23a   : > { %1270 = vmatprep.mubr.bf16.mxu1 %v5980_v19 }
 0x23b   : > { %1271 = vmatmul.mubr.bf16.vlgmr.msra.gmra.mrb[0].mxu1 %v5982_v21 }
 0x23c   : > { %1282 = vmatpush1.bf16.msra.mxu1 %v4859_v20  ;;  %1313 = vmatprep.mubr.bf16.mxu1 %v5980_v19  ;;  %v4949_v20 = vld [vmem:[#allocation5 + $0x2b0] ss:$24 sps:$4 sm:$0xff]  }
 0x23d   : > { %1283 = vmatprep.subr.bf16.mxu1 %v4864_v22  ;;  %v4954_v22 = vld [vmem:[#allocation5 + $0x2e4] ss:$24 sps:$4 sm:$0xff]  }
 0x240   : > { %1284 = vmatpush1.bf16.msra.mxu1 %v4862_v23  ;;  %v4952_v23 = vld [vmem:[#allocation5 + $0x2e0] ss:$24 sps:$4 sm:$0xff]  }
 0x241   : > { %1285 = vmatprep.subr.bf16.mxu1 %v4867_v24  ;;  %v5581_v24 = vmov 0.0  }
 0x242   : > { %4637 = vmatprep.subr.bf16.mxu0 %v5581_v24  ;;  %4639 = vmatprep.mubr.msk.bf16.mxu0 %vm5582_vm0, %v5581_v24 }
 0x244   : > { %1286 = vmatpush1.bf16.msra.mxu1 %v4865_v25  ;;  %v726_v25 = vld [vmem:[%s6342_s24] sm:$0x3f]  ;;  %s5481_s24 = scalar_lea.vmem %s6241_s13, 512 }
 0x245   : > { %1287 = vmatprep.subr.bf16.mxu1 %v4870_v26  ;;  %v731_v26 = vrot.slane %v726_v25, %v5968_v62  ;;  %p5482_p12 = scmp.ne.s32.totalorder %s6241_s13, %s5481_s24 }
 0x247   : > { %p5483_p13 = pnand %p5482_p12, %p6346_p1 }
 0x248   : > { %1288 = vmatpush1.bf16.msra.mxu1 %v4868_v27 }
 0x249   : > { %1289 = vmatprep.subr.bf16.mxu1 %v4873_v28  ;;  %v735_v28 = vrot.slane %v726_v25, %v5965_v61  ;;  %p5484_p0 = pneg %p5483_p13 }
 0x24c   : > { %1290 = vmatpush1.bf16.msra.mxu1 %v4871_v29 }
 0x24d   : > { %1291 = vmatprep.subr.bf16.mxu1 %v4876_v30 }
 0x250   : > { %1292 = vmatpush1.bf16.msra.mxu1 %v4874_v31 }
 0x251   : > { %1293 = vmatprep.subr.bf16.mxu1 %v4879_v32 }
 0x254   : > { %1294 = vmatpush1.bf16.msra.mxu1 %v4877_v33 }
 0x255   : > { %1295 = vmatprep.subr.bf16.mxu1 %v4882_v34 }
 0x258   : > { %1296 = vmatpush1.bf16.msra.mxu1 %v4880_v35 }
 0x259   : > { %1297 = vmatprep.subr.bf16.mxu1 %v4885_v36 }
 0x25c   : > { %1298 = vmatpush1.bf16.msra.mxu1 %v4883_v37  ;;  %v738_v37 = vsub.s32 2, %v5962_v60 }
 0x25d   : > { %1299 = vmatprep.subr.bf16.mxu1 %v4888_v38  ;;  %v742_v38 = vsub.s32 3, %v5962_v60 }
 0x260   : > { %1300 = vmatpush1.bf16.msra.mxu1 %v4886_v39  ;;  %v739_v39 = vrot.slane %v726_v25, %v738_v37 }
 0x261   : > { %1301 = vmatprep.subr.bf16.mxu1 %v4891_v40 }
 0x264   : > { %1302 = vmatpush1.bf16.msra.mxu1 %v4889_v41  ;;  %v743_v41 = vrot.slane %v726_v25, %v742_v38 }
 0x265   : > { %1303 = vmatprep.subr.bf16.mxu1 %v4894_v42 }
 0x268   : > { %1304 = vmatpush1.bf16.msra.mxu1 %v4892_v43 }
 0x269   : > { %1305 = vmatprep.subr.bf16.mxu1 %v4897_v44 }
 0x26c   : > { %1306 = vmatpush1.bf16.msra.mxu1 %v4895_v45 }
 0x26d   : > { %1307 = vmatprep.subr.bf16.mxu1 %v4900_v46 }
 0x270   : > { %1308 = vmatpush1.bf16.msra.mxu1 %v4898_v47 }
 0x271   : > { %1309 = vmatprep.subr.bf16.mxu1 %v4903_v48 }
 0x274   : > { %1310 = vmatpush1.bf16.msra.mxu1 %v4901_v49 }
 0x275   : > { %1311 = vmatprep.subr.bf16.mxu1 %v4906_v50 }
 0x278   : > { %1312 = vmatpush1.bf16.msra.mxu1 %v4904_v51  ;;  %v746_v51 = vsub.s32 4, %v5962_v60 }
 0x279   : > { %1324 = vmatprep.subr.bf16.mxu1 %v4909_v52  ;;  %v750_v52 = vsub.s32 5, %v5962_v60 }
 0x27b   : > { %1314 = vmatmul.mubr.bf16.vlgmr.msra.gmra.mrb[4].mxu1 %v5982_v21 }
 0x27c   : > { %1325 = vmatpush1.bf16.msra.mxu1 %v4907_v53  ;;  %1356 = vmatprep.mubr.bf16.mxu1 %v5980_v19  ;;  %v4951_v19 = vld [vmem:[#allocation5 + $0x2b4] ss:$24 sps:$4 sm:$0xff]   ;;  %v747_v53 = vrot.slane %v726_v25, %v746_v51 }
 0x27d   : > { %1326 = vmatprep.subr.bf16.mxu1 %v4912_v54 }
 0x280   : > { %1327 = vmatpush1.bf16.msra.mxu1 %v4910_v55  ;;  %v751_v55 = vrot.slane %v726_v25, %v750_v52 }
 0x281   : > { %1328 = vmatprep.subr.bf16.mxu1 %v4915_v56 }
 0x284   : > { %1329 = vmatpush1.bf16.msra.mxu1 %v4913_v57 }
 0x285   : > { %1330 = vmatprep.subr.bf16.mxu1 %v4918_v58 }
 0x288   : > { %1331 = vmatpush1.bf16.msra.mxu1 %v4916_v59 }
 0x289   : > { %1332 = vmatprep.subr.bf16.mxu1 %v4921_v63 }
 0x28c   : > { %1333 = vmatpush1.bf16.msra.mxu1 %v4919_v0 }
 0x28d   : > { %1334 = vmatprep.subr.bf16.mxu1 %v4924_v1 }
 0x290   : > { %1335 = vmatpush1.bf16.msra.mxu1 %v4922_v2 }
 0x291   : > { %1336 = vmatprep.subr.bf16.mxu1 %v4927_v3 }
 0x294   : > { %1337 = vmatpush1.bf16.msra.mxu1 %v4925_v4 }
 0x295   : > { %1338 = vmatprep.subr.bf16.mxu1 %v4930_v5 }
 0x298   : > { %1339 = vmatpush1.bf16.msra.mxu1 %v4928_v6 }
 0x299   : > { %1340 = vmatprep.subr.bf16.mxu1 %v4933_v7 }
 0x29c   : > { %1341 = vmatpush1.bf16.msra.mxu1 %v4931_v8 }
 0x29d   : > { %1342 = vmatprep.subr.bf16.mxu1 %v4936_v9 }
 0x2a0   : > { %1343 = vmatpush1.bf16.msra.mxu1 %v4934_v10 }
 0x2a1   : > { %1344 = vmatprep.subr.bf16.mxu1 %v4939_v11 }
 0x2a4   : > { %1345 = vmatpush1.bf16.msra.mxu1 %v4937_v12 }
 0x2a5   : > { %1346 = vmatprep.subr.bf16.mxu1 %v4942_v13 }
 0x2a8   : > { %1347 = vmatpush1.bf16.msra.mxu1 %v4940_v14 }
 0x2a9   : > { %1348 = vmatprep.subr.bf16.mxu1 %v4945_v15 }
 0x2ac   : > { %1349 = vmatpush1.bf16.msra.mxu1 %v4943_v16 }
 0x2ad   : > { %1350 = vmatprep.subr.bf16.mxu1 %v4948_v17 }
 0x2b0   : > { %1351 = vmatpush1.bf16.msra.mxu1 %v4946_v18 }
 0x2b1   : > { %1352 = vmatprep.subr.bf16.mxu1 %v4951_v19 }
 0x2b4   : > { %1353 = vmatpush1.bf16.msra.mxu1 %v4949_v20 }
 0x2b5   : > { %1354 = vmatprep.subr.bf16.mxu1 %v4954_v22 }
 0x2b8   : > { %1355 = vmatpush1.bf16.msra.mxu1 %v4952_v23 }
 0x2b9   : > { %4649 = vmatprep.subr.bf16.mxu1 %v5581_v24 }
 0x2bb   : > { %1357 = vmatmul.mubr.bf16.vlgmr.msra.gmra.mrb[8].mxu1 %v5982_v21 }
 0x2bc   : > { %4651 = vmatprep.mubr.msk.bf16.mxu1 %vm5582_vm0, %v5581_v24 }
 0x30e   : > { %v1272_v27 = vpop.f32.mrb[0].mxu1 }
 0x30f   : > { %v1274_v29 = vpop.f32.mrb[1].mxu1  ;;  %v1273_v21 = vadd.f32 %v1272_v27, %v731_v26 }
 0x310   : > { %v1276_v30 = vpop.f32.mrb[2].mxu1  ;;  %v1275_v33 = vadd.f32 %v1274_v29, %v735_v28 }
 0x311   : > { %v1277_v31 = vadd.f32 %v1276_v30, %v731_v26  ;;  %v1278_v32 = vpop.f32.mrb[3].mxu1 }
 0x312   : > { %v1279_v34 = vadd.f32 %v1278_v32, %v735_v28 }
 0x313   : > { %v1367_v35 = vpack.c.bf16 %v1277_v31, %v1273_v21 }
 0x314   : > { %v1498_v36 = vpack.c.bf16 %v1279_v34, %v1275_v33 }
 0x34e   : > { %v1315_v40 = vpop.f32.mrb[4].mxu1 }
 0x34f   : > { %v1317_v42 = vpop.f32.mrb[5].mxu1  ;;  %v1316_v44 = vadd.f32 %v1315_v40, %v739_v39 }
 0x350   : > { %v1319_v43 = vpop.f32.mrb[6].mxu1  ;;  %v1318_v47 = vadd.f32 %v1317_v42, %v743_v41  ;;  %v4957_v42 = vld [vmem:[#allocation7 + $0x84] ss:$8 sps:$4 sm:$0xff]  }
 0x351   : > { %v1320_v45 = vadd.f32 %v1319_v43, %v739_v39  ;;  %v1321_v46 = vpop.f32.mrb[7].mxu1 }
 0x352   : > { %v1322_v48 = vadd.f32 %v1321_v46, %v743_v41 }
 0x353   : > { %v1368_v49 = vpack.c.bf16 %v1320_v45, %v1316_v44 }
 0x354   : > { %v1499_v50 = vpack.c.bf16 %v1322_v48, %v1318_v47 }
 0x355   : > { %4638 = vmatpush3.bf16.xpose.msra.mxu0 %v1368_v49 }
 0x356   : > { %4650 = vmatpush3.bf16.xpose.msra.mxu1 %v1499_v50  ;;  %4643 = vmatprep.subr.bf16.mxu0 %v5581_v24 }
 0x357   : > { %4655 = vmatprep.subr.bf16.mxu1 %v5581_v24 }
 0x35c   : > { %4640 = vmatmul.mubr.bf16.vlgmr.msra.gmra.mrb[0].mxu0 %v1367_v35 }
 0x35d   : > { %4652 = vmatmul.mubr.bf16.vlgmr.msra.gmra.mrb[12].mxu1 %v1498_v36  ;;  %4645 = vmatprep.mubr.msk.bf16.mxu0 %vm5582_vm0, %v5581_v24 }
 0x35e   : > { %4657 = vmatprep.mubr.msk.bf16.mxu1 %vm5582_vm0, %v5581_v24 }
 0x38e   : > { %v1358_v54 = vpop.f32.mrb[8].mxu1 }
 0x38f   : > { %v1360_v56 = vpop.f32.mrb[9].mxu1  ;;  %v1359_v58 = vadd.f32 %v1358_v54, %v747_v53  ;;  %v4955_v54 = vld [vmem:[#allocation7 + $0x80] ss:$8 sps:$4 sm:$0xff]  }
 0x390   : > { %v1362_v57 = vpop.f32.mrb[10].mxu1  ;;  %v1361_v0 = vadd.f32 %v1360_v56, %v751_v55  ;;  %v4960_v56 = vld [vmem:[#allocation7 + $0x94] ss:$8 sps:$4 sm:$0xff]  }
 0x391   : > { %v1363_v59 = vadd.f32 %v1362_v57, %v747_v53  ;;  %v1364_v63 = vpop.f32.mrb[11].mxu1 }
 0x392   : > { %v1365_v1 = vadd.f32 %v1364_v63, %v751_v55  ;;  %v4958_v63 = vld [vmem:[#allocation7 + $0x90] ss:$8 sps:$4 sm:$0xff]  }
 0x393   : > { %v1369_v2 = vpack.c.bf16 %v1363_v59, %v1359_v58 }
 0x394   : > { %v1500_v3 = vpack.c.bf16 %v1365_v1, %v1361_v0  ;;  %v4963_v1 = vld [vmem:[#allocation7 + $0xa4] ss:$8 sps:$4 sm:$0xff]  }
 0x395   : > { %4644 = vmatpush3.bf16.msra.mxu0 %v1369_v2  ;;  %v4961_v2 = vld [vmem:[#allocation7 + $0xa0] ss:$8 sps:$4 sm:$0xff]  }
 0x396   : > { %4656 = vmatpush3.bf16.msra.mxu1 %v1500_v3  ;;  %v4966_v3 = vld [vmem:[#allocation7 + $0xb4] ss:$8 sps:$4 sm:$0xff]  }
 0x397   : > { %1708 = vmatprep.subr.bf16.mxu1 %v4957_v42  ;;  %v1878_v42 = vld [vmem:[#allocation8] sm:$0x3] }
 0x42f   : > { %v1404_v4 = vpop.f32.mrb[0].mxu0 }
 0x430   : > { %v4641_v5 = vpop.f32.mrb[1].mxu0  ;;  %v1535_v6 = vpop.f32.mrb[12].mxu1  ;;  %v1411_v12 = vmul.f32 0.088388346, %v1404_v4  ;;  %v4964_v4 = vld [vmem:[#allocation7 + $0xb0] ss:$8 sps:$4 sm:$0xff]  }
 0x431   : > { %v1542_v7 = vmul.f32 0.088388346, %v1535_v6  ;;  %v1407_v8 = vpop.f32.mrb[2].mxu0  ;;  %v4653_v9 = vpop.f32.mrb[13].mxu1  ;;  %v4969_v5 = vld [vmem:[#allocation7 + $0xc4] ss:$8 sps:$4 sm:$0xff]  }
 0x432   : > { %v4642_v10 = vpop.f32.mrb[3].mxu0  ;;  %v1538_v11 = vpop.f32.mrb[14].mxu1  ;;  %v1412_v16 = vmul.f32 0.088388346, %v1407_v8  ;;  %v1414_v18 = vsel %vm1413_vm1, %v1411_v12, -inf }
 0x433   : > { %v1543_v13 = vmul.f32 0.088388346, %v1538_v11  ;;  %v4654_v14 = vpop.f32.mrb[15].mxu1  ;;  %v1544_v15 = vsel %vm1413_vm1, %v1542_v7, -inf  ;;  %v4967_v6 = vld [vmem:[#allocation7 + $0xc0] ss:$8 sps:$4 sm:$0xff]  }
 0x434   : > { %1545 = vmax.xlane.f32.xlu0 %v1544_v15  ;;  %v1417_v19 = vsel %vm1413_vm1, %v1412_v16, -inf  ;;  %v4970_v8 = vld [vmem:[#allocation7 + $0xd0] ss:$8 sps:$4 sm:$0xff]   ;;  %v4975_v9 = vld [vmem:[#allocation7 + $0xe4] ss:$8 sps:$4 sm:$0xff]   ;;  %v5583_v14 = vmov 0  }
 0x435   : > { %v1547_v17 = vsel %vm1413_vm1, %v1543_v13, -inf  ;;  %v4973_v10 = vld [vmem:[#allocation7 + $0xe0] ss:$8 sps:$4 sm:$0xff]   ;;  %v4978_v11 = vld [vmem:[#allocation7 + $0xf4] ss:$8 sps:$4 sm:$0xff]  }
 0x436   : > { %1548 = vmax.xlane.f32.xlu1 %v1547_v17 }
 0x438   : > { %1415 = vmax.xlane.f32.xlu0 %v1414_v18  ;;  %v4979_v18 = vld [vmem:[#allocation7] ss:$8 sps:$4 sm:$0xff]  }
 0x43a   : > { %1418 = vmax.xlane.f32.xlu1 %v1417_v19 }
 0x4c1   : > { %v1546_v20 = vpop.xlane.xlu0 %1545 }
 0x4c2   : > { %v1550_v22 = vsub.f32 %v1542_v7, %v1546_v20  ;;  %v4972_v7 = vld [vmem:[#allocation7 + $0xd4] ss:$8 sps:$4 sm:$0xff]  }
 0x4c3   : > { %v1549_v23 = vpop.xlane.xlu1 %1548 }
 0x4c4   : > { %v1552_v24 = vmul.f32 1.442695, %v1550_v22  ;;  %v1551_v25 = vsub.f32 %v1543_v13, %v1549_v23  ;;  %v4981_v13 = vld [vmem:[#allocation7 + $0x4] ss:$8 sps:$4 sm:$0xff]   ;;  %v4984_v22 = vld [vmem:[#allocation7 + $0x14] ss:$8 sps:$4 sm:$0xff]  }
 0x4c5   : > { %v1416_v26 = vpop.xlane.xlu0 %1415 }
 0x4c6   : > { %5199 = vpow2.f32 %v1552_v24  ;;  %v1554_v27 = vmul.f32 1.442695, %v1551_v25  ;;  %v1420_v28 = vsub.f32 %v1411_v12, %v1416_v26  ;;  %v4976_v12 = vld [vmem:[#allocation7 + $0xf0] ss:$8 sps:$4 sm:$0xff]  }
 0x4c7   : > { %v1419_v29 = vpop.xlane.xlu1 %1418  ;;  %v4982_v26 = vld [vmem:[#allocation7 + $0x10] ss:$8 sps:$4 sm:$0xff]  }
 0x4c8   : > { %5201 = vpow2.f32 %v1554_v27  ;;  %v1422_v30 = vmul.f32 1.442695, %v1420_v28  ;;  %v1421_v21 = vsub.f32 %v1412_v16, %v1419_v29  ;;  %v4987_v29 = vld [vmem:[#allocation7 + $0x24] ss:$8 sps:$4 sm:$0xff]  }
 0x4ca   : > { %5203 = vpow2.f32 %v1422_v30  ;;  %v1424_v31 = vmul.f32 1.442695, %v1421_v21  ;;  %v4985_v30 = vld [vmem:[#allocation7 + $0x20] ss:$8 sps:$4 sm:$0xff]   ;;  %v4990_v21 = vld [vmem:[#allocation7 + $0x34] ss:$8 sps:$4 sm:$0xff]  }
 0x4cc   : > { %5205 = vpow2.f32 %v1424_v31  ;;  %v4988_v31 = vld [vmem:[#allocation7 + $0x30] ss:$8 sps:$4 sm:$0xff]  }
 0x4d0   : > { %v5200_v32 = vpop.eup %5199 }
 0x4d1   : > { %v1556_v33 = vsel %vm1413_vm1, %v5200_v32, 0.0 }
 0x4d2   : > { %v5202_v34 = vpop.eup %5201  ;;  %1557 = vadd.xlane.f32.xlu0 %v1556_v33  ;;  %v4991_v33 = vld [vmem:[#allocation7 + $0x40] ss:$8 sps:$4 sm:$0xff]  }
 0x4d3   : > { %v1559_v35 = vsel %vm1413_vm1, %v5202_v34, 0.0 }
 0x4d4   : > { %v5204_v36 = vpop.eup %5203  ;;  %1560 = vadd.xlane.f32.xlu1 %v1559_v35  ;;  %v4994_v35 = vld [vmem:[#allocation7 + $0x50] ss:$8 sps:$4 sm:$0xff]  }
 0x4d5   : > { %v1426_v39 = vsel %vm1413_vm1, %v5204_v36, 0.0 }
 0x4d6   : > { %v5206_v40 = vpop.eup %5205  ;;  %1427 = vadd.xlane.f32.xlu0 %v1426_v39  ;;  %v4997_v39 = vld [vmem:[#allocation7 + $0x60] ss:$8 sps:$4 sm:$0xff]  }
 0x4d7   : > { %v1429_v41 = vsel %vm1413_vm1, %v5206_v40, 0.0 }
 0x4d8   : > { %1430 = vadd.xlane.f32.xlu1 %v1429_v41  ;;  %v5000_v41 = vld [vmem:[#allocation7 + $0x70] ss:$8 sps:$4 sm:$0xff]  }
 0x55f   : > { %v1558_v43 = vpop.xlane.xlu0 %1557 }
 0x560   : > { %5207 = vrcp.f32 %v1558_v43  ;;  %v1883_v43 = vrot.slane %v1878_v42, %v5968_v62 }
 0x561   : > { %v1561_v44 = vpop.xlane.xlu1 %1560 }
 0x562   : > { %5209 = vrcp.f32 %v1561_v44 }
 0x563   : > { %v1428_v45 = vpop.xlane.xlu0 %1427 }
 0x564   : > { %5211 = vrcp.f32 %v1428_v45  ;;  %v1887_v45 = vrot.slane %v1878_v42, %v5965_v61 }
 0x565   : > { %v1431_v46 = vpop.xlane.xlu1 %1430 }
 0x566   : > { %5213 = vrcp.f32 %v1431_v46  ;;  %v5251_v46 = vld [vmem:[%s5936_s5] sm:$0xff] }
 0x56a   : > { %v5208_v47 = vpop.eup %5207 }
 0x56b   : > { %v1563_v49 = vmul.f32 %v5208_v47, %v5200_v32  ;;  %v4993_v32 = vld [vmem:[#allocation7 + $0x44] ss:$8 sps:$4 sm:$0xff]  }
 0x56c   : > { %v5210_v48 = vpop.eup %5209 }
 0x56d   : > { %v1565_v50 = vmul.f32 %v5210_v48, %v5202_v34  ;;  %v4996_v34 = vld [vmem:[#allocation7 + $0x54] ss:$8 sps:$4 sm:$0xff]  }
 0x56e   : > { %v5212_v53 = vpop.eup %5211 }
 0x56f   : > { %v1566_v55 = vpack.c.bf16 %v1565_v50, %v1563_v49  ;;  %v1433_v58 = vmul.f32 %v5212_v53, %v5204_v36  ;;  %v4999_v36 = vld [vmem:[#allocation7 + $0x64] ss:$8 sps:$4 sm:$0xff]  }
 0x570   : > { %v5214_v57 = vpop.eup %5213  ;;  %v5252_v49 = vld [vmem:[%s5936_s5 + $0x8] sm:$0xff] }
 0x571   : > { %v1435_v59 = vmul.f32 %v5214_v57, %v5206_v40  ;;  %4658 = vmatmul.mubr.msk.bf16.vlgmr.msra.gmra.mrb[16].mxu1 %vm1413_vm1, %v1566_v55  ;;  %v5002_v40 = vld [vmem:[#allocation7 + $0x74] ss:$8 sps:$4 sm:$0xff]  }
 0x572   : > { %1709 = vmatpush1.bf16.msra.mxu1 %v4955_v54  ;;  %1740 = vmatprep.mubr.bf16.mxu1 %v5583_v14  ;;  %v5253_v55 = vld [vmem:[%s5936_s5 + $0x10] sm:$0xff] }
 0x573   : > { %v1436_v0 = vpack.c.bf16 %v1435_v59, %v1433_v58  ;;  %1710 = vmatprep.subr.bf16.mxu1 %v4960_v56  ;;  %v5254_v59 = vld [vmem:[%s5936_s5 + $0x18] sm:$0xff] }
 0x575   : > { %4646 = vmatmul.mubr.msk.bf16.vlgmr.msra.gmra.mrb[4].mxu0 %vm1413_vm1, %v1436_v0 }
 0x576   : > { %1711 = vmatpush1.bf16.msra.mxu1 %v4958_v63 }
 0x577   : > { %1712 = vmatprep.subr.bf16.mxu1 %v4963_v1 }
 0x57a   : > { %1713 = vmatpush1.bf16.msra.mxu1 %v4961_v2 }
 0x57b   : > { %1714 = vmatprep.subr.bf16.mxu1 %v4966_v3 }
 0x57e   : > { %1715 = vmatpush1.bf16.msra.mxu1 %v4964_v4  ;;  %v1960_v4 = vld [vmem:[#allocation10] sm:$0xff] }
 0x57f   : > { %1716 = vmatprep.subr.bf16.mxu1 %v4969_v5  ;;  %v1964_v5 = vld [vmem:[#allocation10 + $0x20] sm:$0xff] }
 0x582   : > { %1717 = vmatpush1.bf16.msra.mxu1 %v4967_v6  ;;  %v1961_v6 = vld [vmem:[#allocation10 + $0x8] sm:$0xff] }
 0x583   : > { %1718 = vmatprep.subr.bf16.mxu1 %v4972_v7  ;;  %v4363_v7 = vcombine.low %v1960_v4, %v1964_v5 }
 0x586   : > { %1719 = vmatpush1.bf16.msra.mxu1 %v4970_v8  ;;  %v4364_v8 = vcombine.high %v1960_v4, %v1964_v5  ;;  %v2016_v5 = vld [vmem:[#allocation10 + $0x1c0] sm:$0xff] }
 0x587   : > { %1720 = vmatprep.subr.bf16.mxu1 %v4975_v9  ;;  %v1965_v9 = vld [vmem:[#allocation10 + $0x28] sm:$0xff] }
 0x588   : > { %2770 = vmatprep.subr.bf16.mxu0 %v4364_v8  ;;  %v2021_v8 = vld [vmem:[#allocation10 + $0x1e8] sm:$0xff] }
 0x589   : > { %2771 = vmatpush1.bf16.msra.mxu0 %v4363_v7  ;;  %v2017_v7 = vld [vmem:[#allocation10 + $0x1c8] sm:$0xff] }
 0x58a   : > { %1721 = vmatpush1.bf16.msra.mxu1 %v4973_v10  ;;  %v1968_v10 = vld [vmem:[#allocation10 + $0x40] sm:$0xff] }
 0x58b   : > { %1722 = vmatprep.subr.bf16.mxu1 %v4978_v11  ;;  %v1972_v11 = vld [vmem:[#allocation10 + $0x60] sm:$0xff] }
 0x58e   : > { %1723 = vmatpush1.bf16.msra.mxu1 %v4976_v12  ;;  %v4365_v12 = vcombine.low %v1961_v6, %v1965_v9 }
 0x58f   : > { %1831 = vmatprep.subr.bf16.mxu1 %v4981_v13  ;;  %v4366_v13 = vcombine.high %v1961_v6, %v1965_v9  ;;  %v2020_v6 = vld [vmem:[#allocation10 + $0x1e0] sm:$0xff] }
 0x644   : > { %v1604_v15 = vpop.f32.mrb[16].mxu1 }
 0x645   : > { %v4659_v16 = vpop.f32.mrb[17].mxu1 }
 0x646   : > { %v1607_v17 = vpop.f32.mrb[18].mxu1  ;;  %v1973_v16 = vld [vmem:[#allocation10 + $0x68] sm:$0xff] }
 0x647   : > { %v1611_v19 = vpack.c.bf16 %v1607_v17, %v1604_v15  ;;  %v4660_v20 = vpop.f32.mrb[19].mxu1  ;;  %v1969_v15 = vld [vmem:[#allocation10 + $0x48] sm:$0xff]  ;;  %v1976_v17 = vld [vmem:[#allocation10 + $0x80] sm:$0xff] }
 0x648   : > { %v1474_v23 = vpop.f32.mrb[4].mxu0  ;;  %v1977_v20 = vld [vmem:[#allocation10 + $0x88] sm:$0xff] }
 0x649   : > { %v4647_v24 = vpop.f32.mrb[5].mxu0  ;;  %1741 = vmatmul.mubr.bf16.vlgmr.msra.gmra.mrb[20].mxu1 %v1611_v19  ;;  %v1980_v19 = vld [vmem:[#allocation10 + $0xa0] sm:$0xff] }
 0x64a   : > { %1832 = vmatpush1.bf16.msra.mxu1 %v4979_v18  ;;  %v1477_v25 = vpop.f32.mrb[6].mxu0  ;;  %1863 = vmatprep.mubr.bf16.mxu1 %v5583_v14  ;;  %v4372_v14 = vcombine.high %v1968_v10, %v1972_v11  ;;  %v4374_v18 = vcombine.high %v1969_v15, %v1973_v16  ;;  %v4373_v24 = vcombine.low %v1969_v15, %v1973_v16  ;;  %v2025_v15 = vld [vmem:[#allocation10 + $0x208] sm:$0xff] }
 0x64b   : > { %v1481_v27 = vpack.c.bf16 %v1477_v25, %v1474_v23  ;;  %v4648_v28 = vpop.f32.mrb[7].mxu0  ;;  %1833 = vmatprep.subr.bf16.mxu1 %v4984_v22  ;;  %v1981_v22 = vld [vmem:[#allocation10 + $0xa8] sm:$0xff]  ;;  %v4371_v23 = vcombine.low %v1968_v10, %v1972_v11  ;;  %v4380_v25 = vcombine.high %v1976_v17, %v1980_v19  ;;  %v4420_v11 = vcombine.high %v2016_v5, %v2020_v6 }
 0x64c   : > { %2772 = vmatprep.subr.bf16.mxu0 %v4372_v14  ;;  %v1988_v28 = vld [vmem:[#allocation10 + $0xe0] sm:$0xff]  ;;  %v2029_v16 = vld [vmem:[#allocation10 + $0x228] sm:$0xff] }
 0x64d   : > { %2773 = vmatpush1.bf16.msra.mxu0 %v4371_v23  ;;  %v2028_v14 = vld [vmem:[#allocation10 + $0x220] sm:$0xff] }
 0x64e   : > { %1834 = vmatpush1.bf16.msra.mxu1 %v4982_v26  ;;  %v4382_v26 = vcombine.high %v1977_v20, %v1981_v22  ;;  %2774 = vmatprep.subr.bf16.mxu0 %v4380_v25  ;;  %v2036_v23 = vld [vmem:[#allocation10 + $0x260] sm:$0xff]  ;;  %v2037_v25 = vld [vmem:[#allocation10 + $0x268] sm:$0xff] }
 0x64f   : > { %1835 = vmatprep.subr.bf16.mxu1 %v4987_v29  ;;  %v1985_v29 = vld [vmem:[#allocation10 + $0xc8] sm:$0xff] }
 0x652   : > { %1836 = vmatpush1.bf16.msra.mxu1 %v4985_v30  ;;  %v1989_v30 = vld [vmem:[#allocation10 + $0xe8] sm:$0xff] }
 0x653   : > { %1837 = vmatprep.subr.bf16.mxu1 %v4990_v21  ;;  %v4379_v21 = vcombine.low %v1976_v17, %v1980_v19  ;;  %v4419_v17 = vcombine.low %v2016_v5, %v2020_v6 }
 0x655   : > { %2775 = vmatpush1.bf16.msra.mxu0 %v4379_v21 }
 0x656   : > { %1838 = vmatpush1.bf16.msra.mxu1 %v4988_v31  ;;  %v4381_v31 = vcombine.low %v1977_v20, %v1981_v22  ;;  %v4430_v20 = vcombine.high %v2025_v15, %v2029_v16  ;;  %v2032_v22 = vld [vmem:[#allocation10 + $0x240] sm:$0xff] }
 0x657   : > { %1839 = vmatprep.subr.bf16.mxu1 %v4993_v32 }
 0x65a   : > { %1840 = vmatpush1.bf16.msra.mxu1 %v4991_v33  ;;  %v4390_v33 = vcombine.high %v1985_v29, %v1989_v30 }
 0x65b   : > { %1841 = vmatprep.subr.bf16.mxu1 %v4996_v34  ;;  %v1992_v34 = vld [vmem:[#allocation10 + $0x100] sm:$0xff] }
 0x65e   : > { %1842 = vmatpush1.bf16.msra.mxu1 %v4994_v35  ;;  %v1996_v35 = vld [vmem:[#allocation10 + $0x120] sm:$0xff] }
 0x65f   : > { %1843 = vmatprep.subr.bf16.mxu1 %v4999_v36  ;;  %v1993_v36 = vld [vmem:[#allocation10 + $0x108] sm:$0xff]  ;;  %v4396_v42 = vcombine.high %v1992_v34, %v1996_v35 }
 0x662   : > { %1844 = vmatpush1.bf16.msra.mxu1 %v4997_v39  ;;  %v1997_v39 = vld [vmem:[#allocation10 + $0x128] sm:$0xff] }
 0x663   : > { %1845 = vmatprep.subr.bf16.mxu1 %v5002_v40 }
 0x666   : > { %1846 = vmatpush1.bf16.msra.mxu1 %v5000_v41  ;;  %v4389_v41 = vcombine.low %v1985_v29, %v1989_v30  ;;  %v4435_v30 = vcombine.low %v2032_v22, %v2036_v23 }
 0x667   : > { %2813 = vmatprep.subr.bf16.mxu1 %v4366_v13  ;;  %v2024_v13 = vld [vmem:[#allocation10 + $0x200] sm:$0xff] }
 0x668   : > { %v4428_v19 = vcombine.high %v2024_v13, %v2028_v14 }
 0x669   : > { %1864 = vmatmul.mubr.bf16.vlgmr.msra.gmra.mrb[20].mxu1 %v1481_v27  ;;  %v1984_v27 = vld [vmem:[#allocation10 + $0xc0] sm:$0xff] }
 0x66a   : > { %2814 = vmatpush1.bf16.msra.mxu1 %v4365_v12  ;;  %v4388_v32 = vcombine.high %v1984_v27, %v1988_v28  ;;  %v4387_v40 = vcombine.low %v1984_v27, %v1988_v28  ;;  %v4422_v12 = vcombine.high %v2017_v7, %v2021_v8  ;;  %v4429_v27 = vcombine.low %v2025_v15, %v2029_v16  ;;  %v2064_v16 = vld [vmem:[#allocation10 + $0x340] sm:$0xff] }
 0x66b   : > { %2815 = vmatprep.subr.bf16.mxu1 %v4374_v18  ;;  %v4421_v18 = vcombine.low %v2017_v7, %v2021_v8  ;;  %v4436_v28 = vcombine.high %v2032_v22, %v2036_v23  ;;  %v2056_v8 = vld [vmem:[#allocation10 + $0x300] sm:$0xff] }
 0x66c   : > { %2776 = vmatprep.subr.bf16.mxu0 %v4388_v32 }
 0x66d   : > { %2777 = vmatpush1.bf16.msra.mxu0 %v4387_v40 }
 0x66e   : > { %2816 = vmatpush1.bf16.msra.mxu1 %v4373_v24  ;;  %2778 = vmatprep.subr.bf16.mxu0 %v4396_v42  ;;  %v2033_v24 = vld [vmem:[#allocation10 + $0x248] sm:$0xff] }
 0x66f   : > { %2817 = vmatprep.subr.bf16.mxu1 %v4382_v26  ;;  %v4427_v26 = vcombine.low %v2024_v13, %v2028_v14  ;;  %v4438_v29 = vcombine.high %v2033_v24, %v2037_v25  ;;  %v4437_v21 = vcombine.low %v2033_v24, %v2037_v25  ;;  %v2072_v25 = vld [vmem:[#allocation10 + $0x380] sm:$0xff] }
 0x672   : > { %2818 = vmatpush1.bf16.msra.mxu1 %v4381_v31 }
 0x673   : > { %2819 = vmatprep.subr.bf16.mxu1 %v4390_v33 }
 0x676   : > { %2820 = vmatpush1.bf16.msra.mxu1 %v4389_v41 }
 0x73c   : > { %v1865_v44 = vpop.f32.mrb[20].mxu1 }
 0x73d   : > { %v1874_v47 = vadd.f32 %v5251_v46, %v1865_v44  ;;  %v1867_v48 = vpop.f32.mrb[21].mxu1  ;;  %v2000_v44 = vld [vmem:[#allocation10 + $0x140] sm:$0xff]  ;;  %v2001_v46 = vld [vmem:[#allocation10 + $0x148] sm:$0xff] }
 0x73e   : > { %v1875_v50 = vadd.f32 %v5252_v49, %v1867_v48  ;;  %v1869_v53 = vpop.f32.mrb[22].mxu1  ;;  %v4395_v48 = vcombine.low %v1992_v34, %v1996_v35  ;;  %v4397_v49 = vcombine.low %v1993_v36, %v1997_v39 }
 0x73f   : > { %v6025_v54 = vadd.f32 %v1883_v43, %v1874_v47  ;;  %v1876_v56 = vadd.f32 %v5253_v55, %v1869_v53  ;;  %v1871_v57 = vpop.f32.mrb[23].mxu1  ;;  %v2005_v47 = vld [vmem:[#allocation10 + $0x168] sm:$0xff]  ;;  %v2008_v55 = vld [vmem:[#allocation10 + $0x180] sm:$0xff] }
 0x740   : > { %v6028_v58 = vadd.f32 %v1887_v45, %v1875_v50  ;;  %v1877_v63 = vadd.f32 %v5254_v59, %v1871_v57  ;;  %v4406_v53 = vcombine.high %v2001_v46, %v2005_v47  ;;  %v2009_v57 = vld [vmem:[#allocation10 + $0x188] sm:$0xff]  ;;  %2779 = vmatpush1.bf16.msra.mxu0 %v4395_v48  ;;  %v2044_v48 = vld [vmem:[#allocation10 + $0x2a0] sm:$0xff] }
 0x741   : > { %v6031_v0 = vadd.f32 %v1883_v43, %v1876_v56  ;;  %v4398_v43 = vcombine.high %v1993_v36, %v1997_v39  ;;  %v2012_v56 = vld [vmem:[#allocation10 + $0x1a0] sm:$0xff]  ;;  %v2013_v59 = vld [vmem:[#allocation10 + $0x1a8] sm:$0xff] }
 0x742   : > { %v6033_v1 = vadd.f32 %v1887_v45, %v1877_v63  ;;  %v1896_v2 = vadd.f32 %v6028_v58, %v6025_v54  ;;  %v2004_v45 = vld [vmem:[#allocation10 + $0x160] sm:$0xff]  ;;  %v4414_v4 = vcombine.high %v2009_v57, %v2013_v59  ;;  %v4411_v9 = vcombine.low %v2008_v55, %v2012_v56 }
 0x743   : > { %v4404_v50 = vcombine.high %v2000_v44, %v2004_v45  ;;  %2821 = vmatprep.subr.bf16.mxu1 %v4398_v43  ;;  %v4403_v63 = vcombine.low %v2000_v44, %v2004_v45  ;;  %v4413_v10 = vcombine.low %v2009_v57, %v2013_v59  ;;  %v2048_v59 = vld [vmem:[#allocation10 + $0x2c0] sm:$0xff] }
 0x744   : > { %1897 = vadd.xlane.f32.xlu0 %v1896_v2  ;;  %v1899_v3 = vadd.f32 %v6033_v1, %v6031_v0  ;;  %2822 = vmatpush1.bf16.msra.mxu1 %v4397_v49  ;;  %v4405_v2 = vcombine.low %v2001_v46, %v2005_v47  ;;  %v2040_v47 = vld [vmem:[#allocation10 + $0x280] sm:$0xff]  ;;  %v2041_v49 = vld [vmem:[#allocation10 + $0x288] sm:$0xff] }
 0x745   : > { %2780 = vmatprep.subr.bf16.mxu0 %v4404_v50  ;;  %2823 = vmatprep.subr.bf16.mxu1 %v4406_v53  ;;  %v4444_v50 = vcombine.high %v2040_v47, %v2044_v48  ;;  %v2045_v53 = vld [vmem:[#allocation10 + $0x2a8] sm:$0xff] }
 0x746   : > { %1900 = vadd.xlane.f32.xlu1 %v1899_v3  ;;  %v4412_v3 = vcombine.high %v2008_v55, %v2012_v56  ;;  %2781 = vmatpush1.bf16.msra.mxu0 %v4403_v63  ;;  %v4443_v55 = vcombine.low %v2040_v47, %v2044_v48  ;;  %v4445_v56 = vcombine.low %v2041_v49, %v2045_v53  ;;  %v2052_v63 = vld [vmem:[#allocation10 + $0x2e0] sm:$0xff]  ;;  %v1966_v47 = vld [vmem:[#allocation10 + $0x30] sm:$0xff]  ;;  %v1963_v48 = vld [vmem:[#allocation10 + $0x18] sm:$0xff] }
 0x747   : > { %v4446_v57 = vcombine.high %v2041_v49, %v2045_v53  ;;  %v4451_v5 = vcombine.low %v2048_v59, %v2052_v63 }
 0x748   : > { %2824 = vmatpush1.bf16.msra.mxu1 %v4405_v2  ;;  %2782 = vmatprep.subr.bf16.mxu0 %v4412_v3  ;;  %v2049_v2 = vld [vmem:[#allocation10 + $0x2c8] sm:$0xff]  ;;  %v4452_v3 = vcombine.high %v2048_v59, %v2052_v63 }
 0x749   : > { %2825 = vmatprep.subr.bf16.mxu1 %v4414_v4  ;;  %v2053_v4 = vld [vmem:[#allocation10 + $0x2e8] sm:$0xff] }
 0x74a   : > { %2783 = vmatpush1.bf16.msra.mxu0 %v4411_v9  ;;  %v4453_v6 = vcombine.low %v2049_v2, %v2053_v4  ;;  %v4454_v7 = vcombine.high %v2049_v2, %v2053_v4  ;;  %v2060_v9 = vld [vmem:[#allocation10 + $0x320] sm:$0xff] }
 0x74b   : > { %2784 = vmatprep.subr.bf16.mxu0 %v4420_v11  ;;  %v4460_v11 = vcombine.high %v2056_v8, %v2060_v9  ;;  %v4459_v13 = vcombine.low %v2056_v8, %v2060_v9 }
 0x74c   : > { %2826 = vmatpush1.bf16.msra.mxu1 %v4413_v10  ;;  %v2057_v10 = vld [vmem:[#allocation10 + $0x308] sm:$0xff] }
 0x74d   : > { %2827 = vmatprep.subr.bf16.mxu1 %v4422_v12  ;;  %v2061_v12 = vld [vmem:[#allocation10 + $0x328] sm:$0xff] }
 0x74e   : > { %2785 = vmatpush1.bf16.msra.mxu0 %v4419_v17  ;;  %v4461_v14 = vcombine.low %v2057_v10, %v2061_v12  ;;  %v4462_v15 = vcombine.high %v2057_v10, %v2061_v12  ;;  %v2068_v17 = vld [vmem:[#allocation10 + $0x360] sm:$0xff] }
 0x74f   : > { %2786 = vmatprep.subr.bf16.mxu0 %v4428_v19  ;;  %v4468_v19 = vcombine.high %v2064_v16, %v2068_v17  ;;  %v4467_v22 = vcombine.low %v2064_v16, %v2068_v17 }
 0x750   : > { %2828 = vmatpush1.bf16.msra.mxu1 %v4421_v18  ;;  %v2065_v18 = vld [vmem:[#allocation10 + $0x348] sm:$0xff] }
 0x751   : > { %2829 = vmatprep.subr.bf16.mxu1 %v4430_v20  ;;  %v2069_v20 = vld [vmem:[#allocation10 + $0x368] sm:$0xff] }
 0x752   : > { %2787 = vmatpush1.bf16.msra.mxu0 %v4427_v26  ;;  %v4469_v23 = vcombine.low %v2065_v18, %v2069_v20  ;;  %v4470_v24 = vcombine.high %v2065_v18, %v2069_v20  ;;  %v2076_v26 = vld [vmem:[#allocation10 + $0x3a0] sm:$0xff] }
 0x753   : > { %2788 = vmatprep.subr.bf16.mxu0 %v4436_v28  ;;  %v4476_v28 = vcombine.high %v2072_v25, %v2076_v26 }
 0x754   : > { %2830 = vmatpush1.bf16.msra.mxu1 %v4429_v27  ;;  %v2073_v27 = vld [vmem:[#allocation10 + $0x388] sm:$0xff] }
 0x755   : > { %2831 = vmatprep.subr.bf16.mxu1 %v4438_v29  ;;  %v2077_v29 = vld [vmem:[#allocation10 + $0x3a8] sm:$0xff] }
 0x756   : > { %2789 = vmatpush1.bf16.msra.mxu0 %v4435_v30  ;;  %v4475_v30 = vcombine.low %v2072_v25, %v2076_v26  ;;  %v1974_v26 = vld [vmem:[#allocation10 + $0x70] sm:$0xff] }
 0x757   : > { %2790 = vmatprep.subr.bf16.mxu0 %v4444_v50  ;;  %v1967_v50 = vld [vmem:[#allocation10 + $0x38] sm:$0xff] }
 0x758   : > { %2832 = vmatpush1.bf16.msra.mxu1 %v4437_v21  ;;  %v4477_v21 = vcombine.low %v2073_v27, %v2077_v29 }
 0x759   : > { %2833 = vmatprep.subr.bf16.mxu1 %v4446_v57 }
 0x75a   : > { %2791 = vmatpush1.bf16.msra.mxu0 %v4443_v55  ;;  %v4369_v55 = vcombine.low %v1963_v48, %v1967_v50 }
 0x75b   : > { %2792 = vmatprep.subr.bf16.mxu0 %v4452_v3 }
 0x75c   : > { %2834 = vmatpush1.bf16.msra.mxu1 %v4445_v56  ;;  %v4370_v56 = vcombine.high %v1963_v48, %v1967_v50 }
 0x75d   : > { %2835 = vmatprep.subr.bf16.mxu1 %v4454_v7 }
 0x75e   : > { %2793 = vmatpush1.bf16.msra.mxu0 %v4451_v5  ;;  %v1894_v5 = vld [vmem:[%s6343_s29] sm:$0x3]  ;;  %s5487_s29 = scalar_lea.vmem %s5486_s16, 1024 }
 0x75f   : > { %2794 = vmatprep.subr.bf16.mxu0 %v4460_v11  ;;  %v1936_v7 = vrot.slane %v1894_v5, %v5965_v61  ;;  %v1932_v8 = vrot.slane %v1894_v5, %v5968_v62  ;;  %v2006_v5 = vld [vmem:[#allocation10 + $0x170] sm:$0xff]  ;;  %p5489_p8 = scmp.lt.s32.totalorder %s5487_s29, %s5481_s24 }
 0x760   : > { %2836 = vmatpush1.bf16.msra.mxu1 %v4453_v6  ;;  %v1895_v6 = vld [vmem:[%s6344_s15] sm:$0x3] }
 0x761   : > { %2837 = vmatprep.subr.bf16.mxu1 %v4462_v15  ;;  %p5490_p6 = por %p5489_p8, %p5488_p2 }
 0x762   : > { %2795 = vmatpush1.bf16.msra.mxu0 %v4459_v13  ;;  %v1951_v13 = vrot.slane %v1895_v6, %v5965_v61 }
 0x763   : > { %2796 = vmatprep.subr.bf16.mxu0 %v4468_v19  ;;  %p5491_p10 = pnand %p5490_p6, %p5484_p0 }
 0x764   : > { %2838 = vmatpush1.bf16.msra.mxu1 %v4461_v14  ;;  %v1947_v14 = vrot.slane %v1895_v6, %v5968_v62  ;;  %v2003_v6 = vld [vmem:[#allocation10 + $0x158] sm:$0xff] }
 0x765   : > { %2839 = vmatprep.subr.bf16.mxu1 %v4470_v24 }
 0x766   : > { %2797 = vmatpush1.bf16.msra.mxu0 %v4467_v22 }
 0x767   : > { %2798 = vmatprep.subr.bf16.mxu0 %v4476_v28 }
 0x768   : > { %2840 = vmatpush1.bf16.msra.mxu1 %v4469_v23 }
 0x76a   : > { %2799 = vmatpush1.bf16.msra.mxu0 %v4475_v30  ;;  %v1978_v30 = vld [vmem:[#allocation10 + $0x90] sm:$0xff] }
 0x7d1   : > { %v1898_v31 = vpop.xlane.xlu0 %1897 }
 0x7d2   : > { %v1902_v32 = vmul.f32 0.00390625, %v1898_v31  ;;  %v4478_v31 = vcombine.high %v2073_v27, %v2077_v29  ;;  %v1975_v27 = vld [vmem:[#allocation10 + $0x78] sm:$0xff] }
 0x7d3   : > { %v1901_v33 = vpop.xlane.xlu1 %1900 }
 0x7d4   : > { %v6040_v34 = vsub.f32 %v6025_v54, %v1902_v32  ;;  %v6043_v35 = vsub.f32 %v6028_v58, %v1902_v32  ;;  %v1903_v36 = vmul.f32 0.00390625, %v1901_v33  ;;  %v2080_v32 = vld [vmem:[#allocation10 + $0x3c0] sm:$0xff]  ;;  %2841 = vmatprep.subr.bf16.mxu1 %v4478_v31  ;;  %v1979_v31 = vld [vmem:[#allocation10 + $0x98] sm:$0xff] }
 0x7d5   : > { %v2084_v33 = vld [vmem:[#allocation10 + $0x3e0] sm:$0xff]  ;;  %2842 = vmatpush1.bf16.msra.mxu1 %v4477_v21  ;;  %v1982_v21 = vld [vmem:[#allocation10 + $0xb0] sm:$0xff] }
 0x7d6   : > { %v6046_v39 = vsub.f32 %v6031_v0, %v1903_v36  ;;  %v6049_v40 = vsub.f32 %v6033_v1, %v1903_v36  ;;  %v1908_v41 = vmul.f32 %v6040_v34, %v6040_v34  ;;  %v1909_v42 = vmul.f32 %v6043_v35, %v6043_v35  ;;  %v2081_v36 = vld [vmem:[#allocation10 + $0x3c8] sm:$0xff] }
 0x7d8   : > { %v1912_v43 = vadd.f32 %v1909_v42, %v1908_v41  ;;  %v1910_v44 = vmul.f32 %v6046_v39, %v6046_v39  ;;  %v1911_v45 = vmul.f32 %v6049_v40, %v6049_v40  ;;  %v4483_v41 = vcombine.low %v2080_v32, %v2084_v33 }
 0x7d9   : > { %v4484_v42 = vcombine.high %v2080_v32, %v2084_v33  ;;  %v1983_v32 = vld [vmem:[#allocation10 + $0xb8] sm:$0xff] }
 0x7da   : > { %1913 = vadd.xlane.f32.xlu0 %v1912_v43  ;;  %v1915_v46 = vadd.f32 %v1911_v45, %v1910_v44  ;;  %v2085_v43 = vld [vmem:[#allocation10 + $0x3e8] sm:$0xff]  ;;  %v4385_v48 = vcombine.low %v1979_v31, %v1983_v32 }
 0x7db   : > { %v4485_v44 = vcombine.low %v2081_v36, %v2085_v43  ;;  %v4486_v45 = vcombine.high %v2081_v36, %v2085_v43  ;;  %2800 = vmatprep.subr.bf16.mxu0 %v4484_v42  ;;  %v4386_v42 = vcombine.high %v1979_v31, %v1983_v32  ;;  %v1986_v43 = vld [vmem:[#allocation10 + $0xd0] sm:$0xff] }
 0x7dc   : > { %1916 = vadd.xlane.f32.xlu1 %v1915_v46  ;;  %2801 = vmatpush1.bf16.msra.mxu0 %v4483_v41  ;;  %v1962_v46 = vld [vmem:[#allocation10 + $0x10] sm:$0xff]  ;;  %v4384_v41 = vcombine.high %v1978_v30, %v1982_v21 }
 0x7dd   : > { %2843 = vmatprep.subr.bf16.mxu1 %v4486_v45  ;;  %v4368_v49 = vcombine.high %v1962_v46, %v1966_v47  ;;  %v4367_v53 = vcombine.low %v1962_v46, %v1966_v47  ;;  %v1987_v45 = vld [vmem:[#allocation10 + $0xd8] sm:$0xff]  ;;  %v4383_v47 = vcombine.low %v1978_v30, %v1982_v21 }
 0x7de   : > { %2844 = vmatpush1.bf16.msra.mxu1 %v4485_v44  ;;  %v1990_v44 = vld [vmem:[#allocation10 + $0xf0] sm:$0xff]  ;;  %v1991_v46 = vld [vmem:[#allocation10 + $0xf8] sm:$0xff] }
 0x7df   : > { %2856 = vmatprep.subr.bf16.mxu0 %v4368_v49  ;;  %2899 = vmatprep.subr.bf16.mxu1 %v4370_v56  ;;  %v4392_v49 = vcombine.high %v1986_v43, %v1990_v44  ;;  %v4394_v50 = vcombine.high %v1987_v45, %v1991_v46  ;;  %v1995_v56 = vld [vmem:[#allocation10 + $0x118] sm:$0xff] }
 0x7e0   : > { %v2027_v30 = vld [vmem:[#allocation10 + $0x218] sm:$0xff] }
 0x867   : > { %v1914_v57 = vpop.xlane.xlu0 %1913 }
 0x868   : > { %v1918_v59 = vmul.f32 0.00390625, %v1914_v57  ;;  %v1999_v57 = vld [vmem:[#allocation10 + $0x138] sm:$0xff] }
 0x869   : > { %v1917_v63 = vpop.xlane.xlu1 %1916 }
 0x86a   : > { %v1920_v2 = vadd.f32 1e-05, %v1918_v59  ;;  %v1919_v3 = vmul.f32 0.00390625, %v1917_v63  ;;  %v4391_v59 = vcombine.low %v1986_v43, %v1990_v44  ;;  %v4393_v63 = vcombine.low %v1987_v45, %v1991_v46 }
 0x86c   : > { %5215 = vrsqrt.f32 %v1920_v2  ;;  %v1921_v4 = vadd.f32 1e-05, %v1919_v3  ;;  %v4402_v3 = vcombine.high %v1995_v56, %v1999_v57 }
 0x86e   : > { %5217 = vrsqrt.f32 %v1921_v4  ;;  %v2002_v4 = vld [vmem:[#allocation10 + $0x150] sm:$0xff] }
 0x876   : > { %v5216_v9 = vpop.eup %5215 }
 0x877   : > { %v1924_v10 = vmul.f32 %v5216_v9, %v6040_v34  ;;  %v1925_v11 = vmul.f32 %v5216_v9, %v6043_v35  ;;  %v1970_v34 = vld [vmem:[#allocation10 + $0x50] sm:$0xff]  ;;  %v1971_v35 = vld [vmem:[#allocation10 + $0x58] sm:$0xff]  ;;  %v4401_v9 = vcombine.low %v1995_v56, %v1999_v57 }
 0x878   : > { %v5218_v12 = vpop.eup %5217  ;;  %v4375_v33 = vcombine.low %v1970_v34, %v1974_v26  ;;  %v4377_v36 = vcombine.low %v1971_v35, %v1975_v27 }
 0x879   : > { %v1926_v15 = vmul.f32 %v5218_v12, %v6046_v39  ;;  %v1927_v16 = vmul.f32 %v5218_v12, %v6049_v40  ;;  %v1940_v17 = vmul.f32 %v1936_v7, %v1925_v11  ;;  %v1939_v18 = vmul.f32 %v1932_v8, %v1924_v10  ;;  %v2010_v12 = vld [vmem:[#allocation10 + $0x190] sm:$0xff] }
 0x87a   : > { %v4376_v39 = vcombine.high %v1970_v34, %v1974_v26  ;;  %v4378_v40 = vcombine.high %v1971_v35, %v1975_v27  ;;  %v4408_v10 = vcombine.high %v2002_v4, %v2006_v5  ;;  %v2026_v27 = vld [vmem:[#allocation10 + $0x210] sm:$0xff] }
 0x87b   : > { %v1942_v19 = vmul.f32 %v1936_v7, %v1927_v16  ;;  %v1941_v20 = vmul.f32 %v1932_v8, %v1926_v15  ;;  %v1955_v22 = vadd.f32 %v1951_v13, %v1940_v17  ;;  %v1954_v24 = vadd.f32 %v1947_v14, %v1939_v18  ;;  %v2007_v7 = vld [vmem:[#allocation10 + $0x178] sm:$0xff] }
 0x87c   : > { %v4410_v11 = vcombine.high %v2003_v6, %v2007_v7  ;;  %v2015_v15 = vld [vmem:[#allocation10 + $0x1b8] sm:$0xff]  ;;  %v4407_v16 = vcombine.low %v2002_v4, %v2006_v5  ;;  %v4409_v17 = vcombine.low %v2003_v6, %v2007_v7 }
 0x87d   : > { %v1957_v23 = vadd.f32 %v1951_v13, %v1942_v19  ;;  %v1956_v25 = vadd.f32 %v1947_v14, %v1941_v20  ;;  %v2014_v13 = vld [vmem:[#allocation10 + $0x1b0] sm:$0xff]  ;;  %v2011_v14 = vld [vmem:[#allocation10 + $0x198] sm:$0xff] }
 0x87e   : > { %v4416_v18 = vcombine.high %v2010_v12, %v2014_v13  ;;  %v4418_v19 = vcombine.high %v2011_v14, %v2015_v15  ;;  %v2018_v20 = vld [vmem:[#allocation10 + $0x1d0] sm:$0xff]  ;;  %v4417_v34 = vcombine.low %v2011_v14, %v2015_v15 }
 0x87f   : > { %v1959_v28 = vpack.c.bf16 %v1957_v23, %v1955_v22  ;;  %v6073_v29 = vpack.c.bf16 %v1956_v25, %v1954_v24  ;;  %v2022_v22 = vld [vmem:[#allocation10 + $0x1f0] sm:$0xff]  ;;  %v2019_v23 = vld [vmem:[#allocation10 + $0x1d8] sm:$0xff]  ;;  %v4415_v25 = vcombine.low %v2010_v12, %v2014_v13 }
 0x880   : > { %v2023_v24 = vld [vmem:[#allocation10 + $0x1f8] sm:$0xff]  ;;  %v4424_v26 = vcombine.high %v2018_v20, %v2022_v22 }
 0x881   : > { %2802 = vmatprep.mubr.bf16.mxu0 %v1959_v28  ;;  %2845 = vmatprep.mubr.bf16.mxu1 %v1959_v28  ;;  %v4426_v35 = vcombine.high %v2019_v23, %v2023_v24  ;;  %v4425_v21 = vcombine.low %v2019_v23, %v2023_v24 }
 0x882   : > { %2803 = vmatmul.mubr.bf16.vlgmr.msra.gmra.mrb[8].mxu0 %v6073_v29  ;;  %2846 = vmatmul.mubr.bf16.vlgmr.msra.gmra.mrb[24].mxu1 %v6073_v29 }
 0x883   : > { %2857 = vmatpush1.bf16.msra.mxu0 %v4367_v53  ;;  %2900 = vmatpush1.bf16.msra.mxu1 %v4369_v55  ;;  %v1994_v53 = vld [vmem:[#allocation10 + $0x110] sm:$0xff] }
 0x884   : > { %2888 = vmatprep.mubr.bf16.mxu0 %v1959_v28  ;;  %2931 = vmatprep.mubr.bf16.mxu1 %v1959_v28  ;;  %v1998_v55 = vld [vmem:[#allocation10 + $0x130] sm:$0xff] }
 0x885   : > { %2858 = vmatprep.subr.bf16.mxu0 %v4376_v39  ;;  %2901 = vmatprep.subr.bf16.mxu1 %v4378_v40  ;;  %v4400_v2 = vcombine.high %v1994_v53, %v1998_v55  ;;  %v4399_v8 = vcombine.low %v1994_v53, %v1998_v55  ;;  %v2030_v28 = vld [vmem:[#allocation10 + $0x230] sm:$0xff]  ;;  %v2031_v39 = vld [vmem:[#allocation10 + $0x238] sm:$0xff]  ;;  %v4423_v40 = vcombine.low %v2018_v20, %v2022_v22 }
 0x886   : > { %v4432_v31 = vcombine.high %v2026_v27, %v2030_v28  ;;  %v4434_v32 = vcombine.high %v2027_v30, %v2031_v39  ;;  %v4431_v43 = vcombine.low %v2026_v27, %v2030_v28  ;;  %v4433_v44 = vcombine.low %v2027_v30, %v2031_v39 }
 0x887   : > { %2859 = vmatpush1.bf16.msra.mxu0 %v4375_v33  ;;  %2902 = vmatpush1.bf16.msra.mxu1 %v4377_v36  ;;  %v2034_v33 = vld [vmem:[#allocation10 + $0x250] sm:$0xff] }
 0x888   : > { %2860 = vmatprep.subr.bf16.mxu0 %v4384_v41  ;;  %2903 = vmatprep.subr.bf16.mxu1 %v4386_v42  ;;  %v2038_v36 = vld [vmem:[#allocation10 + $0x270] sm:$0xff]  ;;  %v2035_v41 = vld [vmem:[#allocation10 + $0x258] sm:$0xff] }
 0x889   : > { %v2039_v42 = vld [vmem:[#allocation10 + $0x278] sm:$0xff]  ;;  %v4440_v45 = vcombine.high %v2034_v33, %v2038_v36  ;;  %v4439_v53 = vcombine.low %v2034_v33, %v2038_v36 }
 0x88a   : > { %v4442_v46 = vcombine.high %v2035_v41, %v2039_v42  ;;  %v4441_v55 = vcombine.low %v2035_v41, %v2039_v42 }
 0x88b   : > { %2861 = vmatpush1.bf16.msra.mxu0 %v4383_v47  ;;  %2904 = vmatpush1.bf16.msra.mxu1 %v4385_v48  ;;  %v2042_v47 = vld [vmem:[#allocation10 + $0x290] sm:$0xff] }
 0x88c   : > { %2862 = vmatprep.subr.bf16.mxu0 %v4392_v49  ;;  %2905 = vmatprep.subr.bf16.mxu1 %v4394_v50  ;;  %v2046_v48 = vld [vmem:[#allocation10 + $0x2b0] sm:$0xff]  ;;  %v2043_v49 = vld [vmem:[#allocation10 + $0x298] sm:$0xff] }
 0x88d   : > { %v2047_v50 = vld [vmem:[#allocation10 + $0x2b8] sm:$0xff]  ;;  %v4448_v56 = vcombine.high %v2042_v47, %v2046_v48  ;;  %v4447_v4 = vcombine.low %v2042_v47, %v2046_v48 }
 0x88e   : > { %v4450_v57 = vcombine.high %v2043_v49, %v2047_v50  ;;  %v4449_v5 = vcombine.low %v2043_v49, %v2047_v50  ;;  %v5008_v47 = vld [vmem:[#allocation13 + $0x14] ss:$8 sps:$4 sm:$0xff]   ;;  %v5006_v48 = vld [vmem:[#allocation13 + $0x10] ss:$8 sps:$4 sm:$0xff]   ;;  %v5011_v49 = vld [vmem:[#allocation13 + $0x24] ss:$8 sps:$4 sm:$0xff]  }
 0x88f   : > { %2863 = vmatpush1.bf16.msra.mxu0 %v4391_v59  ;;  %2906 = vmatpush1.bf16.msra.mxu1 %v4393_v63  ;;  %v2050_v59 = vld [vmem:[#allocation10 + $0x2d0] sm:$0xff] }
 0x890   : > { %2864 = vmatprep.subr.bf16.mxu0 %v4400_v2  ;;  %2907 = vmatprep.subr.bf16.mxu1 %v4402_v3  ;;  %v2054_v63 = vld [vmem:[#allocation10 + $0x2f0] sm:$0xff]  ;;  %v2051_v2 = vld [vmem:[#allocation10 + $0x2d8] sm:$0xff] }
 0x891   : > { %v2055_v3 = vld [vmem:[#allocation10 + $0x2f8] sm:$0xff]  ;;  %v4456_v6 = vcombine.high %v2050_v59, %v2054_v63  ;;  %v4455_v12 = vcombine.low %v2050_v59, %v2054_v63  ;;  %v5009_v50 = vld [vmem:[#allocation13 + $0x20] ss:$8 sps:$4 sm:$0xff]  }
 0x892   : > { %v4458_v7 = vcombine.high %v2051_v2, %v2055_v3  ;;  %v4457_v13 = vcombine.low %v2051_v2, %v2055_v3  ;;  %v5020_v59 = vld [vmem:[#allocation13 + $0x54] ss:$8 sps:$4 sm:$0xff]   ;;  %v5018_v63 = vld [vmem:[#allocation13 + $0x50] ss:$8 sps:$4 sm:$0xff]   ;;  %v5021_v2 = vld [vmem:[#allocation13 + $0x60] ss:$8 sps:$4 sm:$0xff]  }
 0x893   : > { %2865 = vmatpush1.bf16.msra.mxu0 %v4399_v8  ;;  %2908 = vmatpush1.bf16.msra.mxu1 %v4401_v9  ;;  %v2058_v8 = vld [vmem:[#allocation10 + $0x310] sm:$0xff]  ;;  %v5026_v3 = vld [vmem:[#allocation13 + $0x74] ss:$8 sps:$4 sm:$0xff]  }
 0x894   : > { %2866 = vmatprep.subr.bf16.mxu0 %v4408_v10  ;;  %2909 = vmatprep.subr.bf16.mxu1 %v4410_v11  ;;  %v2062_v9 = vld [vmem:[#allocation10 + $0x330] sm:$0xff]  ;;  %v2059_v10 = vld [vmem:[#allocation10 + $0x318] sm:$0xff] }
 0x895   : > { %v2063_v11 = vld [vmem:[#allocation10 + $0x338] sm:$0xff]  ;;  %v4464_v14 = vcombine.high %v2058_v8, %v2062_v9  ;;  %v4463_v20 = vcombine.low %v2058_v8, %v2062_v9  ;;  %v5035_v9 = vld [vmem:[#allocation13 + $0xa4] ss:$8 sps:$4 sm:$0xff]  }
 0x896   : > { %v4466_v15 = vcombine.high %v2059_v10, %v2063_v11  ;;  %v4465_v22 = vcombine.low %v2059_v10, %v2063_v11  ;;  %v5030_v8 = vld [vmem:[#allocation13 + $0x90] ss:$8 sps:$4 sm:$0xff]   ;;  %v5033_v10 = vld [vmem:[#allocation13 + $0xa0] ss:$8 sps:$4 sm:$0xff]   ;;  %v5038_v11 = vld [vmem:[#allocation13 + $0xb4] ss:$8 sps:$4 sm:$0xff]  }
 0x897   : > { %2867 = vmatpush1.bf16.msra.mxu0 %v4407_v16  ;;  %2910 = vmatpush1.bf16.msra.mxu1 %v4409_v17  ;;  %v2066_v16 = vld [vmem:[#allocation10 + $0x350] sm:$0xff] }
 0x898   : > { %2868 = vmatprep.subr.bf16.mxu0 %v4416_v18  ;;  %2911 = vmatprep.subr.bf16.mxu1 %v4418_v19  ;;  %v2070_v17 = vld [vmem:[#allocation10 + $0x370] sm:$0xff]  ;;  %v2067_v18 = vld [vmem:[#allocation10 + $0x358] sm:$0xff] }
 0x899   : > { %v2071_v19 = vld [vmem:[#allocation10 + $0x378] sm:$0xff]  ;;  %v4472_v23 = vcombine.high %v2066_v16, %v2070_v17  ;;  %v4471_v27 = vcombine.low %v2066_v16, %v2070_v17  ;;  %v5047_v17 = vld [vmem:[#allocation13 + $0xe4] ss:$8 sps:$4 sm:$0xff]  }
 0x89a   : > { %v4474_v24 = vcombine.high %v2067_v18, %v2071_v19  ;;  %v4473_v28 = vcombine.low %v2067_v18, %v2071_v19  ;;  %v5042_v16 = vld [vmem:[#allocation13 + $0xd0] ss:$8 sps:$4 sm:$0xff]   ;;  %v5045_v18 = vld [vmem:[#allocation13 + $0xe0] ss:$8 sps:$4 sm:$0xff]   ;;  %v5050_v19 = vld [vmem:[#allocation13 + $0xf4] ss:$8 sps:$4 sm:$0xff]  }
 0x89b   : > { %2869 = vmatpush1.bf16.msra.mxu0 %v4415_v25  ;;  %2912 = vmatpush1.bf16.msra.mxu1 %v4417_v34  ;;  %v2074_v25 = vld [vmem:[#allocation10 + $0x390] sm:$0xff] }
 0x89c   : > { %2870 = vmatprep.subr.bf16.mxu0 %v4424_v26  ;;  %2913 = vmatprep.subr.bf16.mxu1 %v4426_v35  ;;  %v2078_v34 = vld [vmem:[#allocation10 + $0x3b0] sm:$0xff]  ;;  %v2075_v26 = vld [vmem:[#allocation10 + $0x398] sm:$0xff] }
 0x89d   : > { %v2079_v35 = vld [vmem:[#allocation10 + $0x3b8] sm:$0xff]  ;;  %v4480_v30 = vcombine.high %v2074_v25, %v2078_v34  ;;  %v4479_v33 = vcombine.low %v2074_v25, %v2078_v34 }
 0x89e   : > { %v4482_v39 = vcombine.high %v2075_v26, %v2079_v35  ;;  %v4481_v36 = vcombine.low %v2075_v26, %v2079_v35 }
 0x89f   : > { %2871 = vmatpush1.bf16.msra.mxu0 %v4423_v40  ;;  %2914 = vmatpush1.bf16.msra.mxu1 %v4425_v21  ;;  %v2082_v40 = vld [vmem:[#allocation10 + $0x3d0] sm:$0xff] }
 0x8a0   : > { %2872 = vmatprep.subr.bf16.mxu0 %v4432_v31  ;;  %2915 = vmatprep.subr.bf16.mxu1 %v4434_v32  ;;  %v2086_v21 = vld [vmem:[#allocation10 + $0x3f0] sm:$0xff]  ;;  %v2083_v31 = vld [vmem:[#allocation10 + $0x3d8] sm:$0xff] }
 0x8a1   : > { %v2087_v32 = vld [vmem:[#allocation10 + $0x3f8] sm:$0xff]  ;;  %v4488_v41 = vcombine.high %v2082_v40, %v2086_v21 }
 0x8a2   : > { %v4490_v42 = vcombine.high %v2083_v31, %v2087_v32 }
 0x8a3   : > { %2873 = vmatpush1.bf16.msra.mxu0 %v4431_v43  ;;  %2916 = vmatpush1.bf16.msra.mxu1 %v4433_v44  ;;  %v4487_v43 = vcombine.low %v2082_v40, %v2086_v21  ;;  %v4489_v44 = vcombine.low %v2083_v31, %v2087_v32 }
 0x8a4   : > { %2874 = vmatprep.subr.bf16.mxu0 %v4440_v45  ;;  %2917 = vmatprep.subr.bf16.mxu1 %v4442_v46  ;;  %v5005_v45 = vld [vmem:[#allocation13 + $0x4] ss:$8 sps:$4 sm:$0xff]   ;;  %v5003_v46 = vld [vmem:[#allocation13] ss:$8 sps:$4 sm:$0xff]  }
 0x8a7   : > { %2875 = vmatpush1.bf16.msra.mxu0 %v4439_v53  ;;  %2918 = vmatpush1.bf16.msra.mxu1 %v4441_v55  ;;  %v5014_v53 = vld [vmem:[#allocation13 + $0x34] ss:$8 sps:$4 sm:$0xff]   ;;  %v5012_v55 = vld [vmem:[#allocation13 + $0x30] ss:$8 sps:$4 sm:$0xff]  }
 0x8a8   : > { %2876 = vmatprep.subr.bf16.mxu0 %v4448_v56  ;;  %2919 = vmatprep.subr.bf16.mxu1 %v4450_v57  ;;  %v5017_v56 = vld [vmem:[#allocation13 + $0x44] ss:$8 sps:$4 sm:$0xff]   ;;  %v5015_v57 = vld [vmem:[#allocation13 + $0x40] ss:$8 sps:$4 sm:$0xff]  }
 0x8ab   : > { %2877 = vmatpush1.bf16.msra.mxu0 %v4447_v4  ;;  %2920 = vmatpush1.bf16.msra.mxu1 %v4449_v5  ;;  %v5024_v4 = vld [vmem:[#allocation13 + $0x70] ss:$8 sps:$4 sm:$0xff]   ;;  %v5029_v5 = vld [vmem:[#allocation13 + $0x84] ss:$8 sps:$4 sm:$0xff]  }
 0x8ac   : > { %2878 = vmatprep.subr.bf16.mxu0 %v4456_v6  ;;  %2921 = vmatprep.subr.bf16.mxu1 %v4458_v7  ;;  %v5027_v6 = vld [vmem:[#allocation13 + $0x80] ss:$8 sps:$4 sm:$0xff]   ;;  %v5032_v7 = vld [vmem:[#allocation13 + $0x94] ss:$8 sps:$4 sm:$0xff]  }
 0x8af   : > { %2879 = vmatpush1.bf16.msra.mxu0 %v4455_v12  ;;  %2922 = vmatpush1.bf16.msra.mxu1 %v4457_v13  ;;  %v5036_v12 = vld [vmem:[#allocation13 + $0xb0] ss:$8 sps:$4 sm:$0xff]   ;;  %v5041_v13 = vld [vmem:[#allocation13 + $0xc4] ss:$8 sps:$4 sm:$0xff]  }
 0x8b0   : > { %2880 = vmatprep.subr.bf16.mxu0 %v4464_v14  ;;  %2923 = vmatprep.subr.bf16.mxu1 %v4466_v15  ;;  %v5039_v14 = vld [vmem:[#allocation13 + $0xc0] ss:$8 sps:$4 sm:$0xff]   ;;  %v5044_v15 = vld [vmem:[#allocation13 + $0xd4] ss:$8 sps:$4 sm:$0xff]  }
 0x8b3   : > { %2881 = vmatpush1.bf16.msra.mxu0 %v4463_v20  ;;  %2924 = vmatpush1.bf16.msra.mxu1 %v4465_v22  ;;  %v5048_v20 = vld [vmem:[#allocation13 + $0xf0] ss:$8 sps:$4 sm:$0xff]   ;;  %v5053_v22 = vld [vmem:[#allocation13 + $0x104] ss:$8 sps:$4 sm:$0xff]  }
 0x8b4   : > { %2882 = vmatprep.subr.bf16.mxu0 %v4472_v23  ;;  %2925 = vmatprep.subr.bf16.mxu1 %v4474_v24  ;;  %v6079_v23 = vld [vmem:[#allocation11] sm:$0xff] }
 0x8b5   : > { %v2093_v24 = vrot.slane %v6079_v23, %v5968_v62  ;;  %v2101_v25 = vrot.slane %v6079_v23, %v738_v37  ;;  %v2097_v34 = vrot.slane %v6079_v23, %v5965_v61  ;;  %v2105_v26 = vrot.slane %v6079_v23, %v742_v38 }
 0x8b7   : > { %2883 = vmatpush1.bf16.msra.mxu0 %v4471_v27  ;;  %2926 = vmatpush1.bf16.msra.mxu1 %v4473_v28 }
 0x8b8   : > { %2884 = vmatprep.subr.bf16.mxu0 %v4480_v30  ;;  %2927 = vmatprep.subr.bf16.mxu1 %v4482_v39 }
 0x8bb   : > { %2885 = vmatpush1.bf16.msra.mxu0 %v4479_v33  ;;  %2928 = vmatpush1.bf16.msra.mxu1 %v4481_v36 }
 0x8bc   : > { %2886 = vmatprep.subr.bf16.mxu0 %v4488_v41  ;;  %2929 = vmatprep.subr.bf16.mxu1 %v4490_v42 }
 0x8bf   : > { %2887 = vmatpush1.bf16.msra.mxu0 %v4487_v43  ;;  %2930 = vmatpush1.bf16.msra.mxu1 %v4489_v44 }
 0x8c0   : > { %3874 = vmatprep.subr.bf16.mxu0 %v5005_v45 }
 0x8c2   : > { %2889 = vmatmul.mubr.bf16.vlgmr.msra.gmra.mrb[12].mxu0 %v6073_v29  ;;  %2932 = vmatmul.mubr.bf16.vlgmr.msra.gmra.mrb[28].mxu1 %v6073_v29  ;;  %v5023_v29 = vld [vmem:[#allocation13 + $0x64] ss:$8 sps:$4 sm:$0xff]  }
 0x8c3   : > { %3875 = vmatpush1.bf16.msra.mxu0 %v5003_v46 }
 0x8c4   : > { %3876 = vmatprep.subr.bf16.mxu0 %v5008_v47 }
 0x8c7   : > { %3877 = vmatpush1.bf16.msra.mxu0 %v5006_v48 }
 0x8c8   : > { %3878 = vmatprep.subr.bf16.mxu0 %v5011_v49 }
 0x8cb   : > { %3879 = vmatpush1.bf16.msra.mxu0 %v5009_v50 }
 0x8cc   : > { %3880 = vmatprep.subr.bf16.mxu0 %v5014_v53 }
 0x8cf   : > { %3881 = vmatpush1.bf16.msra.mxu0 %v5012_v55 }
 0x8d0   : > { %3882 = vmatprep.subr.bf16.mxu0 %v5017_v56 }
 0x8d3   : > { %3883 = vmatpush1.bf16.msra.mxu0 %v5015_v57 }
 0x8d4   : > { %3884 = vmatprep.subr.bf16.mxu0 %v5020_v59 }
 0x8d7   : > { %3885 = vmatpush1.bf16.msra.mxu0 %v5018_v63 }
 0x8d8   : > { %3886 = vmatprep.subr.bf16.mxu0 %v5023_v29 }
 0x8db   : > { %3887 = vmatpush1.bf16.msra.mxu0 %v5021_v2 }
 0x8dc   : > { %3888 = vmatprep.subr.bf16.mxu0 %v5026_v3 }
 0x8df   : > { %3889 = vmatpush1.bf16.msra.mxu0 %v5024_v4 }
 0x8e0   : > { %3890 = vmatprep.subr.bf16.mxu0 %v5029_v5 }
 0x8e3   : > { %3891 = vmatpush1.bf16.msra.mxu0 %v5027_v6 }
 0x8e4   : > { %3892 = vmatprep.subr.bf16.mxu0 %v5032_v7 }
 0x8e7   : > { %3893 = vmatpush1.bf16.msra.mxu0 %v5030_v8 }
 0x8e8   : > { %3894 = vmatprep.subr.bf16.mxu0 %v5035_v9 }
 0x8eb   : > { %3895 = vmatpush1.bf16.msra.mxu0 %v5033_v10 }
 0x8ec   : > { %3896 = vmatprep.subr.bf16.mxu0 %v5038_v11 }
 0x8ef   : > { %3897 = vmatpush1.bf16.msra.mxu0 %v5036_v12 }
 0x8f0   : > { %3898 = vmatprep.subr.bf16.mxu0 %v5041_v13 }
 0x8f3   : > { %3899 = vmatpush1.bf16.msra.mxu0 %v5039_v14 }
 0x8f4   : > { %3900 = vmatprep.subr.bf16.mxu0 %v5044_v15 }
 0x8f7   : > { %3901 = vmatpush1.bf16.msra.mxu0 %v5042_v16 }
 0x8f8   : > { %3902 = vmatprep.subr.bf16.mxu0 %v5047_v17 }
 0x8fb   : > { %3903 = vmatpush1.bf16.msra.mxu0 %v5045_v18 }
 0x8fc   : > { %3904 = vmatprep.subr.bf16.mxu0 %v5050_v19 }
 0x8ff   : > { %3905 = vmatpush1.bf16.msra.mxu0 %v5048_v20 }
 0x900   : > { %3917 = vmatprep.subr.bf16.mxu0 %v5053_v22 }
 0x955   : > { %v2804_v35 = vpop.f32.mrb[8].mxu0  ;;  %v2847_v27 = vpop.f32.mrb[24].mxu1 }
 0x956   : > { %v6091_v28 = vadd.f32 %v2804_v35, %v2093_v24  ;;  %v6093_v30 = vadd.f32 %v2847_v27, %v2101_v25  ;;  %v2806_v39 = vpop.f32.mrb[9].mxu0  ;;  %v2849_v40 = vpop.f32.mrb[25].mxu1 }
 0x957   : > { %v6095_v21 = vadd.f32 %v2806_v39, %v2097_v34  ;;  %v6097_v31 = vadd.f32 %v2849_v40, %v2105_v26  ;;  %v2808_v37 = vpop.f32.mrb[10].mxu0  ;;  %v2851_v32 = vpop.f32.mrb[26].mxu1 }
 0x958   : > { %v2958_v33 = vmul.f32 0.044715, %v6091_v28  ;;  %v2960_v36 = vmul.f32 0.044715, %v6093_v30  ;;  %v2809_v41 = vadd.f32 %v2808_v37, %v2093_v24  ;;  %v2852_v38 = vadd.f32 %v2851_v32, %v2101_v25  ;;  %v2810_v42 = vpop.f32.mrb[11].mxu0  ;;  %v2853_v43 = vpop.f32.mrb[27].mxu1 }
 0x959   : > { %v2959_v44 = vmul.f32 0.044715, %v6095_v21  ;;  %v2961_v45 = vmul.f32 0.044715, %v6097_v31  ;;  %v6103_v46 = vadd.f32 %v2810_v42, %v2097_v34  ;;  %v6105_v47 = vadd.f32 %v2853_v43, %v2105_v26 }
 0x95a   : > { %v2974_v48 = vmul.f32 %v2958_v33, %v6091_v28  ;;  %v2976_v49 = vmul.f32 %v2960_v36, %v6093_v30  ;;  %v2966_v50 = vmul.f32 0.044715, %v2809_v41  ;;  %v2968_v53 = vmul.f32 0.044715, %v2852_v38 }
 0x95b   : > { %v2975_v55 = vmul.f32 %v2959_v44, %v6095_v21  ;;  %v2977_v56 = vmul.f32 %v2961_v45, %v6097_v31  ;;  %v2967_v57 = vmul.f32 0.044715, %v6103_v46  ;;  %v2969_v59 = vmul.f32 0.044715, %v6105_v47 }
 0x95c   : > { %v2990_v63 = vmul.f32 %v2974_v48, %v6091_v28  ;;  %v2992_v29 = vmul.f32 %v2976_v49, %v6093_v30  ;;  %v2982_v2 = vmul.f32 %v2966_v50, %v2809_v41  ;;  %v2984_v3 = vmul.f32 %v2968_v53, %v2852_v38 }
 0x95d   : > { %v2991_v4 = vmul.f32 %v2975_v55, %v6095_v21  ;;  %v2983_v5 = vmul.f32 %v2967_v57, %v6103_v46  ;;  %v2985_v6 = vmul.f32 %v2969_v59, %v6105_v47  ;;  %v2993_v11 = vmul.f32 %v2977_v56, %v6097_v31 }
 0x95e   : > { %v3006_v7 = vadd.f32 %v2990_v63, %v6091_v28  ;;  %v3008_v8 = vadd.f32 %v2992_v29, %v6093_v30  ;;  %v2998_v9 = vmul.f32 %v2982_v2, %v2809_v41  ;;  %v3000_v10 = vmul.f32 %v2984_v3, %v2852_v38 }
 0x95f   : > { %v2999_v12 = vmul.f32 %v2983_v5, %v6103_v46  ;;  %v3001_v13 = vmul.f32 %v2985_v6, %v6105_v47  ;;  %v3007_v18 = vadd.f32 %v2991_v4, %v6095_v21  ;;  %v3009_v34 = vadd.f32 %v2993_v11, %v6097_v31 }
 0x960   : > { %v3022_v14 = vmul.f32 0.7978846, %v3006_v7  ;;  %v3024_v15 = vmul.f32 0.7978846, %v3008_v8  ;;  %v3014_v16 = vadd.f32 %v2998_v9, %v2809_v41  ;;  %v3016_v17 = vadd.f32 %v3000_v10, %v2852_v38 }
 0x961   : > { %v3015_v19 = vadd.f32 %v2999_v12, %v6103_v46  ;;  %v3023_v24 = vmul.f32 0.7978846, %v3007_v18  ;;  %v3017_v26 = vadd.f32 %v3001_v13, %v6105_v47  ;;  %v3025_v35 = vmul.f32 0.7978846, %v3009_v34  ;;  %v5056_v12 = vld [vmem:[#allocation13 + $0x114] ss:$8 sps:$4 sm:$0xff]  }
 0x962   : > { %5219 = vtanh.f32 %v3022_v14  ;;  %v3030_v20 = vmul.f32 0.7978846, %v3014_v16  ;;  %v3032_v22 = vmul.f32 0.7978846, %v3016_v17  ;;  %v2942_v42 = vmul.f32 0.5, %v6091_v28 }
 0x963   : > { %5221 = vtanh.f32 %v3024_v15  ;;  %v3031_v25 = vmul.f32 0.7978846, %v3015_v19  ;;  %v3033_v27 = vmul.f32 0.7978846, %v3017_v26  ;;  %v2950_v43 = vmul.f32 0.5, %v2809_v41 }
 0x964   : > { %5223 = vtanh.f32 %v3030_v20  ;;  %v2944_v48 = vmul.f32 0.5, %v6093_v30  ;;  %v2952_v49 = vmul.f32 0.5, %v2852_v38  ;;  %v2943_v55 = vmul.f32 0.5, %v6095_v21  ;;  %v5057_v14 = vld [vmem:[#allocation13 + $0x120] ss:$8 sps:$4 sm:$0xff]  }
 0x965   : > { %5225 = vtanh.f32 %v3032_v22  ;;  %v2951_v29 = vmul.f32 0.5, %v6103_v46  ;;  %v2945_v30 = vmul.f32 0.5, %v6097_v31  ;;  %v2953_v38 = vmul.f32 0.5, %v6105_v47  ;;  %v5051_v46 = vld [vmem:[#allocation13 + $0x100] ss:$8 sps:$4 sm:$0xff]  }
 0x966   : > { %5227 = vtanh.f32 %v3023_v24  ;;  %v5054_v31 = vld [vmem:[#allocation13 + $0x110] ss:$8 sps:$4 sm:$0xff]   ;;  %v5059_v47 = vld [vmem:[#allocation13 + $0x124] ss:$8 sps:$4 sm:$0xff]   ;;  %v5062_v15 = vld [vmem:[#allocation13 + $0x134] ss:$8 sps:$4 sm:$0xff]  }
 0x967   : > { %5229 = vtanh.f32 %v3031_v25  ;;  %v5060_v16 = vld [vmem:[#allocation13 + $0x130] ss:$8 sps:$4 sm:$0xff]   ;;  %v5065_v17 = vld [vmem:[#allocation13 + $0x144] ss:$8 sps:$4 sm:$0xff]   ;;  %v5063_v18 = vld [vmem:[#allocation13 + $0x140] ss:$8 sps:$4 sm:$0xff]  }
 0x968   : > { %5231 = vtanh.f32 %v3025_v35  ;;  %v5068_v19 = vld [vmem:[#allocation13 + $0x154] ss:$8 sps:$4 sm:$0xff]   ;;  %v5066_v20 = vld [vmem:[#allocation13 + $0x150] ss:$8 sps:$4 sm:$0xff]   ;;  %v5071_v22 = vld [vmem:[#allocation13 + $0x164] ss:$8 sps:$4 sm:$0xff]  }
 0x969   : > { %5233 = vtanh.f32 %v3033_v27  ;;  %v5069_v24 = vld [vmem:[#allocation13 + $0x160] ss:$8 sps:$4 sm:$0xff]   ;;  %v2116_v25 = vsub.s32 6, %v5962_v60  ;;  %v5074_v34 = vld [vmem:[#allocation13 + $0x174] ss:$8 sps:$4 sm:$0xff]   ;;  %v2120_v26 = vsub.s32 7, %v5962_v60  ;;  %v2109_v27 = vrot.slane %v6079_v23, %v746_v51 }
 0x96a   : > { %v5072_v35 = vld [vmem:[#allocation13 + $0x170] ss:$8 sps:$4 sm:$0xff]   ;;  %v5075_v51 = vld [vmem:[#allocation13 + $0x180] ss:$8 sps:$4 sm:$0xff]  }
 0x96c   : > { %v5220_v39 = vpop.eup %5219 }
 0x96d   : > { %v5222_v40 = vpop.eup %5221  ;;  %v3054_v37 = vadd.f32 1.0, %v5220_v39  ;;  %v2117_v39 = vrot.slane %v6079_v23, %v2116_v25 }
 0x96e   : > { %v5224_v32 = vpop.eup %5223  ;;  %v3056_v33 = vadd.f32 1.0, %v5222_v40  ;;  %v2113_v40 = vrot.slane %v6079_v23, %v750_v52  ;;  %v5080_v52 = vld [vmem:[#allocation13 + $0x194] ss:$8 sps:$4 sm:$0xff]  }
 0x96f   : > { %v5226_v36 = vpop.eup %5225  ;;  %v3062_v44 = vadd.f32 1.0, %v5224_v32  ;;  %v3070_v57 = vmul.f32 %v3054_v37, %v2942_v42  ;;  %v2121_v37 = vrot.slane %v6079_v23, %v2120_v26  ;;  %v5077_v32 = vld [vmem:[#allocation13 + $0x184] ss:$8 sps:$4 sm:$0xff]  }
 0x970   : > { %v5228_v45 = vpop.eup %5227  ;;  %v3064_v50 = vadd.f32 1.0, %v5226_v36  ;;  %v6131_v3 = vmul.f32 %v3056_v33, %v2944_v48 }
 0x971   : > { %v5230_v53 = vpop.eup %5229  ;;  %v3055_v56 = vadd.f32 1.0, %v5228_v45  ;;  %v3078_v59 = vmul.f32 %v3062_v44, %v2950_v43 }
 0x972   : > { %v5232_v63 = vpop.eup %5231  ;;  %v3063_v2 = vadd.f32 1.0, %v5230_v53  ;;  %v6133_v28 = vmul.f32 %v3064_v50, %v2952_v49 }
 0x973   : > { %v5234_v41 = vpop.eup %5233  ;;  %v3086_v4 = vpack.c.bf16 %v3078_v59, %v3070_v57  ;;  %v3057_v5 = vadd.f32 1.0, %v5232_v63  ;;  %v3071_v6 = vmul.f32 %v3055_v56, %v2943_v55 }
 0x974   : > { %v3079_v21 = vmul.f32 %v3063_v2, %v2951_v29  ;;  %v3065_v7 = vadd.f32 1.0, %v5234_v41  ;;  %v3088_v8 = vpack.c.bf16 %v6133_v28, %v6131_v3  ;;  %v5114_v3 = vld [vmem:[#allocation13 + $0x250] ss:$8 sps:$4 sm:$0xff]   ;;  %v5119_v28 = vld [vmem:[#allocation13 + $0x264] ss:$8 sps:$4 sm:$0xff]  }
 0x975   : > { %v3073_v10 = vmul.f32 %v3057_v5, %v2945_v30 }
 0x976   : > { %v3087_v9 = vpack.c.bf16 %v3079_v21, %v3071_v6  ;;  %v3081_v11 = vmul.f32 %v3065_v7, %v2953_v38  ;;  %v5078_v6 = vld [vmem:[#allocation13 + $0x190] ss:$8 sps:$4 sm:$0xff]  }
 0x978   : > { %3906 = vmatprep.mubr.bf16.mxu0 %v3087_v9  ;;  %v3089_v13 = vpack.c.bf16 %v3081_v11, %v3073_v10  ;;  %v5083_v10 = vld [vmem:[#allocation13 + $0x1a4] ss:$8 sps:$4 sm:$0xff]  }
 0x979   : > { %3907 = vmatmul.mubr.bf16.vlgmr.msra.gmra.mrb[16].mxu0 %v3086_v4 }
 0x97a   : > { %3918 = vmatpush1.bf16.msra.mxu0 %v5051_v46  ;;  %3949 = vmatprep.mubr.bf16.mxu0 %v3089_v13 }
 0x97b   : > { %3919 = vmatprep.subr.bf16.mxu0 %v5056_v12 }
 0x97e   : > { %3920 = vmatpush1.bf16.msra.mxu0 %v5054_v31 }
 0x97f   : > { %3921 = vmatprep.subr.bf16.mxu0 %v5059_v47 }
 0x982   : > { %3922 = vmatpush1.bf16.msra.mxu0 %v5057_v14 }
 0x983   : > { %3923 = vmatprep.subr.bf16.mxu0 %v5062_v15 }
 0x986   : > { %3924 = vmatpush1.bf16.msra.mxu0 %v5060_v16 }
 0x987   : > { %3925 = vmatprep.subr.bf16.mxu0 %v5065_v17 }
 0x98a   : > { %3926 = vmatpush1.bf16.msra.mxu0 %v5063_v18 }
 0x98b   : > { %3927 = vmatprep.subr.bf16.mxu0 %v5068_v19 }
 0x98e   : > { %3928 = vmatpush1.bf16.msra.mxu0 %v5066_v20  ;;  %v5081_v20 = vld [vmem:[#allocation13 + $0x1a0] ss:$8 sps:$4 sm:$0xff]  }
 0x98f   : > { %3929 = vmatprep.subr.bf16.mxu0 %v5071_v22 }
 0x992   : > { %3930 = vmatpush1.bf16.msra.mxu0 %v5069_v24 }
 0x993   : > { %3931 = vmatprep.subr.bf16.mxu0 %v5074_v34  ;;  %v5086_v34 = vld [vmem:[#allocation13 + $0x1b4] ss:$8 sps:$4 sm:$0xff]  }
 0x995   : > { %v2890_v33 = vpop.f32.mrb[12].mxu0  ;;  %v2933_v36 = vpop.f32.mrb[28].mxu1 }
 0x996   : > { %3932 = vmatpush1.bf16.msra.mxu0 %v5072_v35  ;;  %v6149_v42 = vadd.f32 %v2890_v33, %v2109_v27  ;;  %v6151_v43 = vadd.f32 %v2933_v36, %v2117_v39  ;;  %v2892_v44 = vpop.f32.mrb[13].mxu0  ;;  %v2935_v45 = vpop.f32.mrb[29].mxu1  ;;  %v5084_v36 = vld [vmem:[#allocation13 + $0x1b0] ss:$8 sps:$4 sm:$0xff]  }
 0x997   : > { %v6153_v48 = vadd.f32 %v2892_v44, %v2113_v40  ;;  %v6155_v49 = vadd.f32 %v2935_v45, %v2121_v37  ;;  %v2894_v60 = vpop.f32.mrb[14].mxu0  ;;  %v2937_v50 = vpop.f32.mrb[30].mxu1  ;;  %3933 = vmatprep.subr.bf16.mxu0 %v5077_v32  ;;  %v5089_v44 = vld [vmem:[#allocation13 + $0x1c4] ss:$8 sps:$4 sm:$0xff]  }
 0x998   : > { %v2962_v23 = vmul.f32 0.044715, %v6149_v42  ;;  %v2964_v53 = vmul.f32 0.044715, %v6151_v43  ;;  %v6159_v55 = vadd.f32 %v2894_v60, %v2109_v27  ;;  %v6161_v56 = vadd.f32 %v2937_v50, %v2117_v39  ;;  %v2896_v57 = vpop.f32.mrb[15].mxu0  ;;  %v2939_v59 = vpop.f32.mrb[31].mxu1 }
 0x999   : > { %v2963_v63 = vmul.f32 0.044715, %v6153_v48  ;;  %v2965_v29 = vmul.f32 0.044715, %v6155_v49  ;;  %v6165_v2 = vadd.f32 %v2896_v57, %v2113_v40  ;;  %v6167_v41 = vadd.f32 %v2939_v59, %v2121_v37  ;;  %v5092_v57 = vld [vmem:[#allocation13 + $0x1d4] ss:$8 sps:$4 sm:$0xff]  }
 0x99a   : > { %v2978_v4 = vmul.f32 %v2962_v23, %v6149_v42  ;;  %v2980_v30 = vmul.f32 %v2964_v53, %v6151_v43  ;;  %v2970_v38 = vmul.f32 0.044715, %v6159_v55  ;;  %v2972_v5 = vmul.f32 0.044715, %v6161_v56  ;;  %3934 = vmatpush1.bf16.msra.mxu0 %v5075_v51  ;;  %v5090_v59 = vld [vmem:[#allocation13 + $0x1d0] ss:$8 sps:$4 sm:$0xff]  }
 0x99b   : > { %v2979_v21 = vmul.f32 %v2963_v63, %v6153_v48  ;;  %v2981_v7 = vmul.f32 %v2965_v29, %v6155_v49  ;;  %v2971_v9 = vmul.f32 0.044715, %v6165_v2  ;;  %v2973_v46 = vmul.f32 0.044715, %v6167_v41  ;;  %3935 = vmatprep.subr.bf16.mxu0 %v5080_v52  ;;  %v5087_v52 = vld [vmem:[#allocation13 + $0x1c0] ss:$8 sps:$4 sm:$0xff]  }
 0x99c   : > { %v2994_v11 = vmul.f32 %v2978_v4, %v6149_v42  ;;  %v2996_v12 = vmul.f32 %v2980_v30, %v6151_v43  ;;  %v2986_v13 = vmul.f32 %v2970_v38, %v6159_v55  ;;  %v2988_v31 = vmul.f32 %v2972_v5, %v6161_v56  ;;  %v5095_v63 = vld [vmem:[#allocation13 + $0x1e4] ss:$8 sps:$4 sm:$0xff]   ;;  %v5093_v5 = vld [vmem:[#allocation13 + $0x1e0] ss:$8 sps:$4 sm:$0xff]  }
 0x99d   : > { %v2995_v47 = vmul.f32 %v2979_v21, %v6153_v48  ;;  %v2987_v14 = vmul.f32 %v2971_v9, %v6165_v2  ;;  %v2989_v15 = vmul.f32 %v2973_v46, %v6167_v41  ;;  %v2997_v22 = vmul.f32 %v2981_v7, %v6155_v49  ;;  %v5098_v7 = vld [vmem:[#allocation13 + $0x1f4] ss:$8 sps:$4 sm:$0xff]  }
 0x99e   : > { %v3010_v16 = vadd.f32 %v2994_v11, %v6149_v42  ;;  %v3012_v17 = vadd.f32 %v2996_v12, %v6151_v43  ;;  %v3002_v18 = vmul.f32 %v2986_v13, %v6159_v55  ;;  %v3004_v19 = vmul.f32 %v2988_v31, %v6161_v56  ;;  %3936 = vmatpush1.bf16.msra.mxu0 %v5078_v6 }
 0x99f   : > { %v3003_v24 = vmul.f32 %v2987_v14, %v6165_v2  ;;  %v3005_v25 = vmul.f32 %v2989_v15, %v6167_v41  ;;  %3937 = vmatprep.subr.bf16.mxu0 %v5083_v10  ;;  %v3011_v40 = vadd.f32 %v2995_v47, %v6153_v48  ;;  %v3013_v60 = vadd.f32 %v2997_v22, %v6155_v49  ;;  %v5101_v22 = vld [vmem:[#allocation13 + $0x204] ss:$8 sps:$4 sm:$0xff]  }
 0x9a0   : > { %v3026_v26 = vmul.f32 0.7978846, %v3010_v16  ;;  %v3028_v35 = vmul.f32 0.7978846, %v3012_v17  ;;  %v3018_v27 = vadd.f32 %v3002_v18, %v6159_v55  ;;  %v3020_v39 = vadd.f32 %v3004_v19, %v6161_v56 }
 0x9a1   : > { %v3019_v37 = vadd.f32 %v3003_v24, %v6165_v2  ;;  %v3027_v45 = vmul.f32 0.7978846, %v3011_v40  ;;  %v3021_v50 = vadd.f32 %v3005_v25, %v6167_v41  ;;  %v3029_v23 = vmul.f32 0.7978846, %v3013_v60  ;;  %v5113_v60 = vld [vmem:[#allocation13 + $0x244] ss:$8 sps:$4 sm:$0xff]  }
 0x9a2   : > { %5235 = vtanh.f32 %v3026_v26  ;;  %v3034_v32 = vmul.f32 0.7978846, %v3018_v27  ;;  %v3036_v33 = vmul.f32 0.7978846, %v3020_v39  ;;  %3938 = vmatpush1.bf16.msra.mxu0 %v5081_v20  ;;  %v2946_v9 = vmul.f32 0.5, %v6149_v42 }
 0x9a3   : > { %5237 = vtanh.f32 %v3028_v35  ;;  %3939 = vmatprep.subr.bf16.mxu0 %v5086_v34  ;;  %v3035_v51 = vmul.f32 0.7978846, %v3019_v37  ;;  %v3037_v53 = vmul.f32 0.7978846, %v3021_v50  ;;  %v2954_v46 = vmul.f32 0.5, %v6159_v55 }
 0x9a4   : > { %5239 = vtanh.f32 %v3034_v32  ;;  %v2948_v12 = vmul.f32 0.5, %v6151_v43  ;;  %v2956_v13 = vmul.f32 0.5, %v6161_v56  ;;  %v2947_v14 = vmul.f32 0.5, %v6153_v48  ;;  %v5096_v42 = vld [vmem:[#allocation13 + $0x1f0] ss:$8 sps:$4 sm:$0xff]  }
 0x9a5   : > { %5241 = vtanh.f32 %v3036_v33  ;;  %v2955_v55 = vmul.f32 0.5, %v6165_v2  ;;  %v2949_v24 = vmul.f32 0.5, %v6155_v49  ;;  %v2957_v25 = vmul.f32 0.5, %v6167_v41  ;;  %v5099_v39 = vld [vmem:[#allocation13 + $0x200] ss:$8 sps:$4 sm:$0xff]  }
 0x9a6   : > { %3940 = vmatpush1.bf16.msra.mxu0 %v5084_v36  ;;  %5243 = vtanh.f32 %v3027_v45  ;;  %v5104_v33 = vld [vmem:[#allocation13 + $0x214] ss:$8 sps:$4 sm:$0xff]   ;;  %v5102_v41 = vld [vmem:[#allocation13 + $0x210] ss:$8 sps:$4 sm:$0xff]   ;;  %v5107_v36 = vld [vmem:[#allocation13 + $0x224] ss:$8 sps:$4 sm:$0xff]  }
 0x9a7   : > { %3941 = vmatprep.subr.bf16.mxu0 %v5089_v44  ;;  %5245 = vtanh.f32 %v3035_v51  ;;  %v5105_v44 = vld [vmem:[#allocation13 + $0x220] ss:$8 sps:$4 sm:$0xff]   ;;  %v5110_v45 = vld [vmem:[#allocation13 + $0x234] ss:$8 sps:$4 sm:$0xff]   ;;  %v5108_v51 = vld [vmem:[#allocation13 + $0x230] ss:$8 sps:$4 sm:$0xff]  }
 0x9a8   : > { %5247 = vtanh.f32 %v3029_v23  ;;  %v5111_v50 = vld [vmem:[#allocation13 + $0x240] ss:$8 sps:$4 sm:$0xff]   ;;  %v5122_v23 = vld [vmem:[#allocation13 + $0x274] ss:$8 sps:$4 sm:$0xff]  }
 0x9a9   : > { %5249 = vtanh.f32 %v3037_v53  ;;  %v5120_v53 = vld [vmem:[#allocation13 + $0x270] ss:$8 sps:$4 sm:$0xff]  }
 0x9aa   : > { %3942 = vmatpush1.bf16.msra.mxu0 %v5087_v52  ;;  %v5116_v52 = vld [vmem:[#allocation13 + $0x254] ss:$8 sps:$4 sm:$0xff]  }
 0x9ab   : > { %3943 = vmatprep.subr.bf16.mxu0 %v5092_v57  ;;  %v5125_v57 = vld [vmem:[#allocation13 + $0x284] ss:$8 sps:$4 sm:$0xff]  }
 0x9ac   : > { %v5236_v29 = vpop.eup %5235 }
 0x9ad   : > { %v5238_v4 = vpop.eup %5237  ;;  %v3058_v30 = vadd.f32 1.0, %v5236_v29  ;;  %v5126_v29 = vld [vmem:[#allocation13 + $0x290] ss:$8 sps:$4 sm:$0xff]  }
 0x9ae   : > { %v5240_v38 = vpop.eup %5239  ;;  %3944 = vmatpush1.bf16.msra.mxu0 %v5090_v59  ;;  %v3060_v6 = vadd.f32 1.0, %v5238_v4  ;;  %v5123_v59 = vld [vmem:[#allocation13 + $0x280] ss:$8 sps:$4 sm:$0xff]   ;;  %v5131_v4 = vld [vmem:[#allocation13 + $0x2a4] ss:$8 sps:$4 sm:$0xff]  }
 0x9af   : > { %v5242_v21 = vpop.eup %5241  ;;  %3945 = vmatprep.subr.bf16.mxu0 %v5095_v63  ;;  %v3066_v10 = vadd.f32 1.0, %v5240_v38  ;;  %v6202_v16 = vmul.f32 %v3058_v30, %v2946_v9  ;;  %v5128_v63 = vld [vmem:[#allocation13 + $0x294] ss:$8 sps:$4 sm:$0xff]   ;;  %v5129_v30 = vld [vmem:[#allocation13 + $0x2a0] ss:$8 sps:$4 sm:$0xff]  }
 0x9b0   : > { %v5244_v11 = vpop.eup %5243  ;;  %v3068_v31 = vadd.f32 1.0, %v5242_v21  ;;  %v6207_v20 = vmul.f32 %v3060_v6, %v2948_v12  ;;  %v5134_v38 = vld [vmem:[#allocation13 + $0x2b4] ss:$8 sps:$4 sm:$0xff]   ;;  %v5137_v6 = vld [vmem:[#allocation13 + $0x2c4] ss:$8 sps:$4 sm:$0xff]  }
 0x9b1   : > { %v5246_v47 = vpop.eup %5245  ;;  %v3059_v15 = vadd.f32 1.0, %v5244_v11  ;;  %v6204_v17 = vmul.f32 %v3066_v10, %v2954_v46  ;;  %v5135_v21 = vld [vmem:[#allocation13 + $0x2c0] ss:$8 sps:$4 sm:$0xff]   ;;  %v5138_v9 = vld [vmem:[#allocation13 + $0x2d0] ss:$8 sps:$4 sm:$0xff]  }
 0x9b2   : > { %v5248_v18 = vpop.eup %5247  ;;  %3946 = vmatpush1.bf16.msra.mxu0 %v5093_v5  ;;  %v3067_v19 = vadd.f32 1.0, %v5246_v47  ;;  %v6209_v43 = vmul.f32 %v3068_v31, %v2956_v13  ;;  %v5132_v5 = vld [vmem:[#allocation13 + $0x2b0] ss:$8 sps:$4 sm:$0xff]   ;;  %v5143_v46 = vld [vmem:[#allocation13 + $0x2e4] ss:$8 sps:$4 sm:$0xff]  }
 0x9b3   : > { %v5250_v56 = vpop.eup %5249  ;;  %3947 = vmatprep.subr.bf16.mxu0 %v5098_v7  ;;  %v3090_v48 = vpack.c.bf16 %v6204_v17, %v6202_v16  ;;  %v3061_v34 = vadd.f32 1.0, %v5248_v18  ;;  %v3075_v26 = vmul.f32 %v3059_v15, %v2947_v14  ;;  %v5140_v7 = vld [vmem:[#allocation13 + $0x2d4] ss:$8 sps:$4 sm:$0xff]   ;;  %v5141_v10 = vld [vmem:[#allocation13 + $0x2e0] ss:$8 sps:$4 sm:$0xff]  }
 0x9b4   : > { %v3083_v35 = vmul.f32 %v3067_v19, %v2955_v55  ;;  %v3069_v27 = vadd.f32 1.0, %v5250_v56  ;;  %v3092_v2 = vpack.c.bf16 %v6209_v43, %v6207_v20  ;;  %v5146_v11 = vld [vmem:[#allocation13 + $0x2f4] ss:$8 sps:$4 sm:$0xff]   ;;  %v5144_v12 = vld [vmem:[#allocation13 + $0x2f0] ss:$8 sps:$4 sm:$0xff]  }
 0x9b5   : > { %v6217_v37 = vmul.f32 %v3061_v34, %v2949_v24  ;;  %v5149_v13 = vld [vmem:[#allocation13 + $0x304] ss:$8 sps:$4 sm:$0xff]   ;;  %v5147_v31 = vld [vmem:[#allocation13 + $0x300] ss:$8 sps:$4 sm:$0xff]   ;;  %v5152_v47 = vld [vmem:[#allocation13 + $0x314] ss:$8 sps:$4 sm:$0xff]  }
 0x9b6   : > { %3948 = vmatpush1.bf16.msra.mxu0 %v5096_v42  ;;  %v3091_v40 = vpack.c.bf16 %v3083_v35, %v3075_v26  ;;  %v6219_v32 = vmul.f32 %v3069_v27, %v2957_v25  ;;  %v5150_v14 = vld [vmem:[#allocation13 + $0x310] ss:$8 sps:$4 sm:$0xff]   ;;  %v5155_v15 = vld [vmem:[#allocation13 + $0x324] ss:$8 sps:$4 sm:$0xff]   ;;  %v5153_v18 = vld [vmem:[#allocation13 + $0x320] ss:$8 sps:$4 sm:$0xff]  }
 0x9b7   : > { %3960 = vmatprep.subr.bf16.mxu0 %v5101_v22  ;;  %v5158_v42 = vld [vmem:[#allocation13 + $0x334] ss:$8 sps:$4 sm:$0xff]   ;;  %v5156_v55 = vld [vmem:[#allocation13 + $0x330] ss:$8 sps:$4 sm:$0xff]   ;;  %v5161_v19 = vld [vmem:[#allocation13 + $0x344] ss:$8 sps:$4 sm:$0xff]  }
 0x9b8   : > { %v3093_v49 = vpack.c.bf16 %v6219_v32, %v6217_v37  ;;  %v5159_v56 = vld [vmem:[#allocation13 + $0x340] ss:$8 sps:$4 sm:$0xff]   ;;  %v5164_v16 = vld [vmem:[#allocation13 + $0x354] ss:$8 sps:$4 sm:$0xff]   ;;  %v5162_v17 = vld [vmem:[#allocation13 + $0x350] ss:$8 sps:$4 sm:$0xff]  }
 0x9b9   : > { %3950 = vmatmul.mubr.bf16.vlgmr.msra.gmra.mrb[16].mxu0 %v3088_v8  ;;  %v5117_v8 = vld [vmem:[#allocation13 + $0x260] ss:$8 sps:$4 sm:$0xff]   ;;  %v5167_v22 = vld [vmem:[#allocation13 + $0x364] ss:$8 sps:$4 sm:$0xff]   ;;  %v5170_v24 = vld [vmem:[#allocation13 + $0x374] ss:$8 sps:$4 sm:$0xff]  }
 0x9ba   : > { %3961 = vmatpush1.bf16.msra.mxu0 %v5099_v39  ;;  %3992 = vmatprep.mubr.bf16.mxu0 %v3091_v40  ;;  %v5168_v25 = vld [vmem:[#allocation13 + $0x370] ss:$8 sps:$4 sm:$0xff]   ;;  %v5173_v34 = vld [vmem:[#allocation13 + $0x384] ss:$8 sps:$4 sm:$0xff]   ;;  %v5171_v26 = vld [vmem:[#allocation13 + $0x380] ss:$8 sps:$4 sm:$0xff]  }
 0x9bb   : > { %3962 = vmatprep.subr.bf16.mxu0 %v5104_v33  ;;  %v5176_v35 = vld [vmem:[#allocation13 + $0x394] ss:$8 sps:$4 sm:$0xff]   ;;  %v5174_v27 = vld [vmem:[#allocation13 + $0x390] ss:$8 sps:$4 sm:$0xff]   ;;  %v5179_v39 = vld [vmem:[#allocation13 + $0x3a4] ss:$8 sps:$4 sm:$0xff]  }
 0x9bc   : > { %v5177_v40 = vld [vmem:[#allocation13 + $0x3a0] ss:$8 sps:$4 sm:$0xff]   ;;  %v5182_v37 = vld [vmem:[#allocation13 + $0x3b4] ss:$8 sps:$4 sm:$0xff]   ;;  %v5180_v32 = vld [vmem:[#allocation13 + $0x3b0] ss:$8 sps:$4 sm:$0xff]  }
 0x9bd   : > { %v5185_v33 = vld [vmem:[#allocation13 + $0x3c4] ss:$8 sps:$4 sm:$0xff]  }
 0x9be   : > { %3963 = vmatpush1.bf16.msra.mxu0 %v5102_v41  ;;  %v5188_v41 = vld [vmem:[#allocation13 + $0x3d4] ss:$8 sps:$4 sm:$0xff]  }
 0x9bf   : > { %3964 = vmatprep.subr.bf16.mxu0 %v5107_v36  ;;  %v5186_v36 = vld [vmem:[#allocation13 + $0x3d0] ss:$8 sps:$4 sm:$0xff]  }
 0x9c2   : > { %3965 = vmatpush1.bf16.msra.mxu0 %v5105_v44  ;;  %v5191_v44 = vld [vmem:[#allocation13 + $0x3e4] ss:$8 sps:$4 sm:$0xff]  }
 0x9c3   : > { %3966 = vmatprep.subr.bf16.mxu0 %v5110_v45  ;;  %v5189_v45 = vld [vmem:[#allocation13 + $0x3e0] ss:$8 sps:$4 sm:$0xff]  }
 0x9c6   : > { %3967 = vmatpush1.bf16.msra.mxu0 %v5108_v51  ;;  %v5194_v51 = vld [vmem:[#allocation13 + $0x3f4] ss:$8 sps:$4 sm:$0xff]  }
 0x9c7   : > { %3968 = vmatprep.subr.bf16.mxu0 %v5113_v60  ;;  %v5192_v60 = vld [vmem:[#allocation13 + $0x3f0] ss:$8 sps:$4 sm:$0xff]  }
 0x9ca   : > { %3969 = vmatpush1.bf16.msra.mxu0 %v5111_v50  ;;  %v3222_v50 = vld [vmem:[#allocation14] sm:$0x3] }
 0x9cb   : > { %3970 = vmatprep.subr.bf16.mxu0 %v5116_v52  ;;  %v3227_v52 = vrot.slane %v3222_v50, %v5968_v62 }
 0x9ce   : > { %3971 = vmatpush1.bf16.msra.mxu0 %v5114_v3  ;;  %v3231_v3 = vrot.slane %v3222_v50, %v5965_v61 }
 0x9cf   : > { %3972 = vmatprep.subr.bf16.mxu0 %v5119_v28 }
 0x9d2   : > { %3973 = vmatpush1.bf16.msra.mxu0 %v5117_v8 }
 0x9d3   : > { %3974 = vmatprep.subr.bf16.mxu0 %v5122_v23 }
 0x9d6   : > { %3975 = vmatpush1.bf16.msra.mxu0 %v5120_v53 }
 0x9d7   : > { %3976 = vmatprep.subr.bf16.mxu0 %v5125_v57 }
 0x9da   : > { %3977 = vmatpush1.bf16.msra.mxu0 %v5123_v59 }
 0x9db   : > { %3978 = vmatprep.subr.bf16.mxu0 %v5128_v63 }
 0x9de   : > { %3979 = vmatpush1.bf16.msra.mxu0 %v5126_v29 }
 0x9df   : > { %3980 = vmatprep.subr.bf16.mxu0 %v5131_v4 }
 0x9e2   : > { %3981 = vmatpush1.bf16.msra.mxu0 %v5129_v30 }
 0x9e3   : > { %3982 = vmatprep.subr.bf16.mxu0 %v5134_v38 }
 0x9e6   : > { %3983 = vmatpush1.bf16.msra.mxu0 %v5132_v5 }
 0x9e7   : > { %3984 = vmatprep.subr.bf16.mxu0 %v5137_v6 }
 0x9ea   : > { %3985 = vmatpush1.bf16.msra.mxu0 %v5135_v21 }
 0x9eb   : > { %3986 = vmatprep.subr.bf16.mxu0 %v5140_v7 }
 0x9ee   : > { %3987 = vmatpush1.bf16.msra.mxu0 %v5138_v9 }
 0x9ef   : > { %3988 = vmatprep.subr.bf16.mxu0 %v5143_v46 }
 0x9f2   : > { %3989 = vmatpush1.bf16.msra.mxu0 %v5141_v10 }
 0x9f3   : > { %3990 = vmatprep.subr.bf16.mxu0 %v5146_v11 }
 0x9f6   : > { %3991 = vmatpush1.bf16.msra.mxu0 %v5144_v12 }
 0x9f7   : > { %4003 = vmatprep.subr.bf16.mxu0 %v5149_v13 }
 0x9f9   : > { %3993 = vmatmul.mubr.bf16.vlgmr.msra.gmra.mrb[16].mxu0 %v3090_v48  ;;  %v5165_v48 = vld [vmem:[#allocation13 + $0x360] ss:$8 sps:$4 sm:$0xff]  }
 0x9fa   : > { %4004 = vmatpush1.bf16.msra.mxu0 %v5147_v31  ;;  %4035 = vmatprep.mubr.bf16.mxu0 %v3093_v49  ;;  %v5183_v49 = vld [vmem:[#allocation13 + $0x3c0] ss:$8 sps:$4 sm:$0xff]  }
 0x9fb   : > { %4005 = vmatprep.subr.bf16.mxu0 %v5152_v47 }
 0x9fe   : > { %4006 = vmatpush1.bf16.msra.mxu0 %v5150_v14 }
 0x9ff   : > { %4007 = vmatprep.subr.bf16.mxu0 %v5155_v15 }
 0xa02   : > { %4008 = vmatpush1.bf16.msra.mxu0 %v5153_v18 }
 0xa03   : > { %4009 = vmatprep.subr.bf16.mxu0 %v5158_v42 }
 0xa06   : > { %4010 = vmatpush1.bf16.msra.mxu0 %v5156_v55 }
 0xa07   : > { %4011 = vmatprep.subr.bf16.mxu0 %v5161_v19 }
 0xa0a   : > { %4012 = vmatpush1.bf16.msra.mxu0 %v5159_v56 }
 0xa0b   : > { %4013 = vmatprep.subr.bf16.mxu0 %v5164_v16 }
 0xa0e   : > { %4014 = vmatpush1.bf16.msra.mxu0 %v5162_v17 }
 0xa0f   : > { %4015 = vmatprep.subr.bf16.mxu0 %v5167_v22 }
 0xa12   : > { %4016 = vmatpush1.bf16.msra.mxu0 %v5165_v48 }
 0xa13   : > { %4017 = vmatprep.subr.bf16.mxu0 %v5170_v24 }
 0xa16   : > { %4018 = vmatpush1.bf16.msra.mxu0 %v5168_v25 }
 0xa17   : > { %4019 = vmatprep.subr.bf16.mxu0 %v5173_v34 }
 0xa1a   : > { %4020 = vmatpush1.bf16.msra.mxu0 %v5171_v26 }
 0xa1b   : > { %4021 = vmatprep.subr.bf16.mxu0 %v5176_v35 }
 0xa1e   : > { %4022 = vmatpush1.bf16.msra.mxu0 %v5174_v27 }
 0xa1f   : > { %4023 = vmatprep.subr.bf16.mxu0 %v5179_v39 }
 0xa22   : > { %4024 = vmatpush1.bf16.msra.mxu0 %v5177_v40 }
 0xa23   : > { %4025 = vmatprep.subr.bf16.mxu0 %v5182_v37 }
 0xa26   : > { %4026 = vmatpush1.bf16.msra.mxu0 %v5180_v32 }
 0xa27   : > { %4027 = vmatprep.subr.bf16.mxu0 %v5185_v33 }
 0xa2a   : > { %4028 = vmatpush1.bf16.msra.mxu0 %v5183_v49 }
 0xa2b   : > { %4029 = vmatprep.subr.bf16.mxu0 %v5188_v41 }
 0xa2e   : > { %4030 = vmatpush1.bf16.msra.mxu0 %v5186_v36 }
 0xa2f   : > { %4031 = vmatprep.subr.bf16.mxu0 %v5191_v44 }
 0xa32   : > { %4032 = vmatpush1.bf16.msra.mxu0 %v5189_v45 }
 0xa33   : > { %4033 = vmatprep.subr.bf16.mxu0 %v5194_v51 }
 0xa36   : > { %4034 = vmatpush1.bf16.msra.mxu0 %v5192_v60 }
 0xa39   : > { %4036 = vmatmul.mubr.bf16.vlgmr.msra.gmra.mrb[16].mxu0 %v3092_v2 }
 0xb0c   : > { %v4037_v28 = vpop.f32.mrb[16].mxu0 }
 0xb0d   : > { %v4661_v8 = vadd.f32 %v4037_v28, %v3227_v52  ;;  %v4039_v23 = vpop.f32.mrb[17].mxu0 }
 0xb0e   : > { %v4662_v53 = vadd.f32 %v4039_v23, %v3231_v3  ;;  %v4041_v57 = vpop.f32.mrb[18].mxu0 }
 0xb0f   : > { %v4046_v59 = vadd.f32 %v4661_v8, %v6025_v54  ;;  %v4663_v20 = vadd.f32 %v4041_v57, %v3227_v52  ;;  %v4043_v43 = vpop.f32.mrb[19].mxu0 }
 0xb10   : > { %v4047_v61 = vadd.f32 %v4662_v53, %v6028_v58  ;;  %v4664_v62 = vadd.f32 %v4043_v43, %v3231_v3 }
 0xb11   : > { %4050 = vst [vmem:[%s555_s3] sm:$0xff] %v4046_v59  ;;  %v4048_v2 = vadd.f32 %v4663_v20, %v6031_v0 }
 0xb12   : > { %4051 = vst [vmem:[%s555_s3 + $0x8] sm:$0xff] %v4047_v61  ;;  %v4049_v54 = vadd.f32 %v4664_v62, %v6033_v1 }
 0xb13   : > { %4052 = vst [vmem:[%s555_s3 + $0x10] sm:$0xff] %v4048_v2 }
 0xb14   : > { %4053 = vst [vmem:[%s555_s3 + $0x18] sm:$0xff] %v4049_v54 }
 0xb15   : > { %5494 = shalt.err (!%p5491_p10)
}
 0xb16   : > { %s5495_s7 = scalar_lea.hbm %s6248_s14, 512  ;;  %s5499_s3 = scalar_lea.hbm %s6345_s2, 1024 }
 0xb17   : > { %p5496_p11 = scmp.ne.s32.totalorder %s6248_s14, %s5495_s7  ;;  %p5500_p9 = scmp.lt.u32.totalorder %s6248_s14, %s6345_s2 }
 0xb18   : > { %p5501_p7 = scmp.lt.u32.totalorder %s5499_s3, %s5495_s7  ;;  %p5503_p12 = scmp.lt.u32.totalorder %s5495_s7, %s6248_s14 }
 0xb19   : > { %p5497_p3 = pnand %p5496_p11, %p6346_p1 }
 0xb1a   : > { %p5502_p4 = por %p5501_p7, %p5500_p9 }
 0xb1b   : > { %p5498_p5 = pneg %p5497_p3 }
 0xb1c   : > { %p5504_p13 = por %p5503_p12, %p5502_p4 }
 0xb1e   : > { %p5505_p0 = pnand %p5504_p13, %p5498_p5 }
 0xb20   : > { %5508 = shalt.err (!%p5505_p0)
}
 0xb21   : > { %s5585_s22 = smov 256   ;;  %s5586_s24 = smov 16  }
 0xb22   : > { %4711 = dma.vmem_to_hbm [thread:$0]  (%p6346_p1), %s6241_s13, 512, %s6248_s14, %s4055_s8, %s5585_s22, %s5585_s22, %s5586_s24  }
 0xb23 PF: > { %s4084_s4 = sand.u32 1, %s5551_s25   ;;  %p6347_p2 = scmp.ne.s32.totalorder %s6330_s19, 0 }
 0xb24   : > { %p6348_p8 = scmp.ge.s32.totalorder %s5563_s28, 2  ;;  %s4085_s16 = scalar_lea.sflag [#allocation4], %s4084_s4 }
 0xb26   : > { %p4740_p6 = pnand %p6348_p8, %p6347_p2 }
 0xb28   : > { %5546 = dma.done.wait (!%p4740_p6), %s4085_s16, 512  }
 0xb29   : > { %5548 = vsyncadd (!%p4740_p6), %s4085_s16, 4294966784  ;;  %p30_p10 = scmp.ge.s32.totalorder %s5857_s18, 4   ;;  %s6349_s25 = smov %s5555_s26 }
 0xb2a   : > { %s6350_s26 = smov %s5559_s27  ;;  %s6351_s27 = smov %s5869_s17 }
 0xb2b   : > { %s6352_s28 = smov %s5857_s18  ;;  %32 = sbr.rel (!%p30_p10) target bundleno = 17 (0x11), region = 145 }
 0xb32   :  { %4090 = vsyncpa [#allocation3], 1 }
 0xb33   :  { %4092 = vsyncpa [#allocation3 + $0x1], 1 }
 0xb34   :  { %4093 = vsyncpa [#allocation6], 1 }
 0xb35   :  { %4094 = vsyncpa [#allocation9], 1 }
 0xb36   :  { %4095 = vsyncpa [#allocation12], 1 }
 0xb37   :  { %4096 = vsyncpa [#allocation15], 1 }
 0xb38   :  { %4097 = vsyncpa [#allocation4], 1 }
 0xb39   :  { %4099 = vsyncpa [#allocation4 + $0x1], 1 }

</bundles_post_ra>
